<compile_context>
chip_gen: v7x
topology: tpu7x:2x2x1
jax: 0.10.0
libtpu: 0.0.40
codegen_flags: <defaults>
</compile_context>

<pallas_src>
import functools

import jax
import jax.numpy as jnp
import numpy as np
from jax.experimental import pallas as pl
from jax.experimental.pallas import tpu as pltpu


# ----------------------------- Pallas kernel --------------------------------

def _layer_norm(x, g, b, eps=1e-5):
    mu = jnp.mean(x, axis=-1, keepdims=True)
    xc = x - mu
    var = jnp.mean(xc * xc, axis=-1, keepdims=True)
    return xc * jax.lax.rsqrt(var + eps) * g + b


def base_encoder_kernel(x_ref, wqkv_ref, rwb_ref, remb_ref, rbias_ref, wo_ref,
                        g1_ref, be1_ref, w1_ref, bi1_ref, w2_ref, bi2_ref,
                        g2_ref, be2_ref, o_ref, *, n_head, d_head):
    f32 = jnp.float32
    bf16 = jnp.bfloat16

    x = x_ref[...]                               # (Q, Dm) f32
    Q, Dm = x.shape
    H, Dh = n_head, d_head
    K = Q                                        # mems=None -> klen == qlen
    scale = 1.0 / (Dh ** 0.5)

    # fused QKV projection for all heads: one lane-dense MXU matmul; keep the
    # activation bf16 (single cast) so every MXU operand below is bf16.
    heads = jnp.dot(x.astype(bf16), wqkv_ref[...],
                    preferred_element_type=f32).astype(bf16)   # (Q, 3*H*Dh)

    # ---- rel_shift masks (cheap iota + compare, built once) -----------------
    ri = jax.lax.broadcasted_iota(jnp.int32, (Q, K), 0)   # query index i
    ci = jax.lax.broadcasted_iota(jnp.int32, (Q, K), 1)   # key   index j
    lower_mask = ci <= ri                  # taken from skewed row i
    upper_mask = ci >= ri + 2              # taken from skewed row i+1; j==i+1 -> 0

    def rel_shift(raw):                    # raw: (Q, K) f32
        # Row i of the rel-shifted matrix is row i of `raw` rolled cyclically
        # right by (i+1).  Realized as: strided lane roll by i (XLU) followed
        # by a uniform lane roll by 1 (XLU) -- no MXU work at all.
        cur = pltpu.roll(raw, 0, 1, stride=1, stride_axis=0)   # row i -> roll i
        cur = pltpu.roll(cur, 1, 1)                            # all rows -> +1
        # "row i+1" part: shift rows up by one (sublane roll; last row unused).
        nxt = pltpu.roll(cur, Q - 1, 0)
        return (jnp.where(lower_mask, cur, 0.0)
                + jnp.where(upper_mask, nxt, 0.0))

    # ---- per-head attention -------------------------------------------------
    # TODO(synk): batch AC / BD-raw / PV over heads with an (H, Q, Dh)
    #             dot_general once n_head grows (avoids 64-lane-offset slices).
    pvs = []
    for h in range(H):                      # n_head is small & static
        q = heads[:, h * Dh:(h + 1) * Dh]                       # (Q, Dh) bf16
        k = heads[:, (H + h) * Dh:(H + h + 1) * Dh]
        v = heads[:, (2 * H + h) * Dh:(2 * H + h + 1) * Dh]

        # AC term: (q + r_w_bias) @ k^T          (bf16 MXU, f32 acc)
        ac = jax.lax.dot_general(q + rwb_ref[h], k,
                                 (((1,), (1,)), ((), ())),
                                 preferred_element_type=f32)    # (Q, K)

        # BD term: rel_shift(q @ r_emb^T + r_bias)   (bf16 MXU + XLU skew)
        b_raw = jax.lax.dot_general(q, remb_ref[h],
                                    (((1,), (1,)), ((), ())),
                                    preferred_element_type=f32)  # (Q, K)
        bd = rel_shift(b_raw + rbias_ref[h])

        logits = (ac + bd) * scale
        # softmax over key axis (enc_attn_mask=None path; dropout -> identity)
        m = jnp.max(logits, axis=-1, keepdims=True)
        e = jnp.exp(logits - m)
        p = e * pl.reciprocal(jnp.sum(e, axis=-1, keepdims=True), approx=True)

        pvs.append(jnp.dot(p.astype(bf16), v,
                           preferred_element_type=f32))         # (Q, Dh) f32

    # single fused output projection: (Q, H*Dh) @ (H*Dh, Dm), 128-deep
    # contraction instead of H 64-deep matmuls + f32 accumulation passes.
    pv_cat = jnp.concatenate(pvs, axis=1).astype(bf16)          # (Q, H*Dh)
    attn_out = jnp.dot(pv_cat, wo_ref[...], preferred_element_type=f32)

    # post-lnorm residual (pre_lnorm kwarg not set -> False)
    y1 = _layer_norm(x + attn_out, g1_ref[...], be1_ref[...])

    # PositionwiseFF: Linear -> ReLU -> Linear, post-lnorm residual
    hid = jnp.maximum(
        jnp.dot(y1.astype(bf16), w1_ref[...], preferred_element_type=f32)
        + bi1_ref[...], 0.0)
    core = (jnp.dot(hid.astype(bf16), w2_ref[...], preferred_element_type=f32)
            + bi2_ref[...])
    o_ref[...] = _layer_norm(y1 + core, g2_ref[...], be2_ref[...])


# ------------------------- parameter initialization --------------------------

def init_params(key, k_len, n_head, d_model, d_head, d_inner):
    ks = jax.random.split(key, 12)
    s = 0.1
    f32 = jnp.float32
    return dict(
        r_emb=jax.random.normal(ks[0], (k_len, n_head, d_head), f32) * s,
        r_w_bias=jax.random.normal(ks[1], (n_head, d_head), f32) * s,
        r_bias=jax.random.normal(ks[2], (k_len, n_head), f32) * s,
        w_qkv=jax.random.normal(ks[3], (d_model, 3 * n_head * d_head), f32) * s,
        w_o=jax.random.normal(ks[4], (n_head * d_head, d_model), f32) * s,
        ln1_g=jnp.ones((1, d_model), f32) + 0.05 * jax.random.normal(ks[5], (1, d_model), f32),
        ln1_b=jax.random.normal(ks[6], (1, d_model), f32) * s,
        w_ff1=jax.random.normal(ks[7], (d_model, d_inner), f32) * s,
        b_ff1=jax.random.normal(ks[8], (1, d_inner), f32) * s,
        w_ff2=jax.random.normal(ks[9], (d_inner, d_model), f32) * s,
        b_ff2=jax.random.normal(ks[10], (1, d_model), f32) * s,
        ln2_g=jnp.ones((1, d_model), f32),
        ln2_b=jnp.zeros((1, d_model), f32),
    )


# --------------------------------- wrapper -----------------------------------

def base_encoder_forward(params, inputs, input_lengths=None, enc_attn_mask=None):
    assert inputs.ndim == 3            # matches the PyTorch assert
    del input_lengths                  # unused by the PyTorch forward as well
    if enc_attn_mask is not None:
        raise NotImplementedError  # TODO(synk): masked-attention path (default is None)

    Q, B, Dm = inputs.shape
    H, Dh = params['r_w_bias'].shape
    # TODO(synk): fold this transpose into the BlockSpec (block (Q, 1, Dm) over
    # [Q, B, Dm]) once second-minor block dims of 1 are layout-legal for small B;
    # at demo sizes the extra HBM round trip is negligible.
    x = jnp.transpose(inputs, (1, 0, 2)).astype(jnp.float32)   # (B, Q, Dm)

    # r_emb / r_bias length handling exactly as the PyTorch module (mems=None).
    klen = Q
    r_emb, r_bias = params['r_emb'], params['r_bias']
    k_len = r_emb.shape[0]
    if klen > k_len:
        r_emb = jnp.concatenate(
            [jnp.broadcast_to(r_emb[:1], (klen - k_len,) + r_emb.shape[1:]), r_emb], 0)
        r_bias = jnp.concatenate(
            [jnp.broadcast_to(r_bias[:1], (klen - k_len, r_bias.shape[1])), r_bias], 0)
    else:
        r_emb, r_bias = r_emb[-klen:], r_bias[-klen:]

    bf16, f32 = jnp.bfloat16, jnp.float32
    # head-major layouts; every MXU operand is bf16 (f32 accumulation in-kernel).
    r_emb_h = jnp.transpose(r_emb, (1, 0, 2)).astype(bf16)            # (H, K, Dh)
    r_bias_h = jnp.transpose(r_bias, (1, 0))[:, None, :].astype(f32)  # (H, 1, K)
    rwb = params['r_w_bias'][:, None, :].astype(bf16)                 # (H, 1, Dh)
    w_qkv = params['w_qkv'].astype(bf16)                              # (Dm, 3*H*Dh)
    w_o = params['w_o'].astype(bf16)                                  # (H*Dh, Dm)
    w_ff1 = params['w_ff1'].astype(bf16)
    w_ff2 = params['w_ff2'].astype(bf16)

    args = (x, w_qkv, rwb, r_emb_h, r_bias_h, w_o,
            params['ln1_g'].astype(f32), params['ln1_b'].astype(f32),
            w_ff1, params['b_ff1'].astype(f32),
            w_ff2, params['b_ff2'].astype(f32),
            params['ln2_g'].astype(f32), params['ln2_b'].astype(f32))

    def full_spec(a):
        nd = a.ndim
        # TODO(synk): pipeline_mode=pl.Buffered(1) for these grid-invariant
        # weights to halve their VMEM reservation at production shapes (v7x).
        return pl.BlockSpec(a.shape, lambda b, _nd=nd: (0,) * _nd)

    # None == pl.Squeezed(): leading batch dim is squeezed out of the kernel ref,
    # so the kernel sees lane-dense (Q, Dm) blocks directly.
    in_specs = ([pl.BlockSpec((None, Q, Dm), lambda b: (b, 0, 0))]
                + [full_spec(a) for a in args[1:]])

    out = pl.pallas_call(
        functools.partial(base_encoder_kernel, n_head=H, d_head=Dh),
        out_shape=jax.ShapeDtypeStruct((B, Q, Dm), jnp.float32),
        grid_spec=pltpu.PrefetchScalarGridSpec(
            num_scalar_prefetch=0,
            grid=(B,),
            in_specs=in_specs,
            out_specs=pl.BlockSpec((None, Q, Dm), lambda b: (b, 0, 0)),
        ),
        compiler_params=pltpu.CompilerParams(
            dimension_semantics=("parallel",),   # batch elements are independent
            vmem_limit_bytes=32 * 1024 * 1024),
    )(*args)
    return jnp.transpose(out, (1, 0, 2))   # back to [qlen, bsz, d_model]


# ----------------------------- pure-JAX reference ----------------------------

def _rel_shift_ref(x):
    zero = jnp.zeros((x.shape[0], 1) + x.shape[2:], x.dtype)
    xp = jnp.concatenate([zero, x], axis=1)
    xp = xp.reshape((x.shape[1] + 1, x.shape[0]) + x.shape[2:])
    return xp[1:].reshape(x.shape)


def base_encoder_reference(params, inputs):
    Q, B, Dm = inputs.shape
    H, Dh = params['r_w_bias'].shape
    x = inputs.astype(jnp.float32)
    w_heads = x @ params['w_qkv']
    wq, wk, wv = jnp.split(w_heads, 3, axis=-1)
    wq = wq.reshape(Q, B, H, Dh)
    wk = wk.reshape(Q, B, H, Dh)
    wv = wv.reshape(Q, B, H, Dh)

    klen = Q
    r_emb, r_bias = params['r_emb'], params['r_bias']
    k_len = r_emb.shape[0]
    if klen > k_len:
        r_emb = jnp.concatenate(
            [jnp.broadcast_to(r_emb[0:1], (klen - k_len,) + r_emb.shape[1:]), r_emb], 0)
        r_bias = jnp.concatenate(
            [jnp.broadcast_to(r_bias[0:1], (klen - k_len, r_bias.shape[1])), r_bias], 0)
    else:
        r_emb, r_bias = r_emb[-klen:], r_bias[-klen:]

    rw_q = wq + params['r_w_bias'][None, None]
    AC = jnp.einsum('ibnd,jbnd->ijbn', rw_q, wk)
    B_ = jnp.einsum('ibnd,jnd->ijbn', wq, r_emb)
    D_ = r_bias[None, :, None, :]
    BD = _rel_shift_ref(B_ + D_)
    score = (AC + BD) * (1.0 / (Dh ** 0.5))
    prob = jax.nn.softmax(score, axis=1)
    vec = jnp.einsum('ijbn,jbnd->ibnd', prob, wv).reshape(Q, B, H * Dh)
    attn_out = vec @ params['w_o']

    def ln(z, g, b):
        mu = jnp.mean(z, -1, keepdims=True)
        v = jnp.mean((z - mu) ** 2, -1, keepdims=True)
        return (z - mu) * jax.lax.rsqrt(v + 1e-5) * g.reshape(-1) + b.reshape(-1)

    y1 = ln(x + attn_out, params['ln1_g'], params['ln1_b'])
    core = (jnp.maximum(y1 @ params['w_ff1'] + params['b_ff1'].reshape(-1), 0.0)
            @ params['w_ff2'] + params['b_ff2'].reshape(-1))
    return ln(y1 + core, params['ln2_g'], params['ln2_b'])


# ----------------------------------- main ------------------------------------

if __name__ == "__main__":
    # Small but lane-aligned sizes: qlen / d_model / d_inner multiples of 128
    # keep every vector load/store unmasked (lane-dense).
    # TODO(synk): benchmark at production shapes with xprof (min over runs);
    #             demo size is dominated by per-step overhead + weight DMA.
    k_len, n_head, d_model, d_head, d_inner, dropout = 128, 2, 128, 64, 256, 0.0
    qlen, bsz = 128, 2

    key = jax.random.PRNGKey(0)
    kp, kx = jax.random.split(key)
    params = init_params(kp, k_len, n_head, d_model, d_head, d_inner)
    inputs = jax.random.normal(kx, (qlen, bsz, d_model), jnp.float32)
    input_lengths = jnp.full((bsz,), qlen, dtype=jnp.int32)

    out = base_encoder_forward(params, inputs, input_lengths, enc_attn_mask=None)
    out = jax.block_until_ready(out)

    # NOTE: bf16 MXU operands + approx reciprocal vs. the f32 reference; the
    # 3e-2 tolerance accounts for that (documented, expected).
    ref = base_encoder_reference(params, inputs)
    np.testing.assert_allclose(np.asarray(out), np.asarray(ref), rtol=3e-2, atol=3e-2)
    print("KERNEL_OK")
</pallas_src>

<mosaic_0001>
module attributes {stable_mosaic.version = 11 : i64} {
  func.func @base_encoder_kernel(%arg0: i32, %arg1: memref<1x128x128xf32, #tpu.memory_space<vmem>>, %arg2: memref<128x384xbf16, #tpu.memory_space<vmem>>, %arg3: memref<2x1x64xbf16, #tpu.memory_space<vmem>>, %arg4: memref<2x128x64xbf16, #tpu.memory_space<vmem>>, %arg5: memref<2x1x128xf32, #tpu.memory_space<vmem>>, %arg6: memref<128x128xbf16, #tpu.memory_space<vmem>>, %arg7: memref<1x128xf32, #tpu.memory_space<vmem>>, %arg8: memref<1x128xf32, #tpu.memory_space<vmem>>, %arg9: memref<128x256xbf16, #tpu.memory_space<vmem>>, %arg10: memref<1x256xf32, #tpu.memory_space<vmem>>, %arg11: memref<256x128xbf16, #tpu.memory_space<vmem>>, %arg12: memref<1x128xf32, #tpu.memory_space<vmem>>, %arg13: memref<1x128xf32, #tpu.memory_space<vmem>>, %arg14: memref<1x128xf32, #tpu.memory_space<vmem>>, %arg15: memref<1x128x128xf32, #tpu.memory_space<vmem>>) attributes {dimension_semantics = [#tpu.dimension_semantics<parallel>], iteration_bounds = array<i64: 2>, scalar_prefetch = 0 : i64, scratch_operands = 0 : i64, tpu.core_type = #tpu.core_type<tc>, window_params = [{transform_indices = @transform_0, window_bounds = array<i64: 1, 128, 128>}, {pipeline_mode = #tpu.pipeline_mode<synchronous>, transform_indices = @transform_1, window_bounds = array<i64: 128, 384>}, {pipeline_mode = #tpu.pipeline_mode<synchronous>, transform_indices = @transform_2, window_bounds = array<i64: 2, 1, 64>}, {pipeline_mode = #tpu.pipeline_mode<synchronous>, transform_indices = @transform_3, window_bounds = array<i64: 2, 128, 64>}, {pipeline_mode = #tpu.pipeline_mode<synchronous>, transform_indices = @transform_4, window_bounds = array<i64: 2, 1, 128>}, {pipeline_mode = #tpu.pipeline_mode<synchronous>, transform_indices = @transform_5, window_bounds = array<i64: 128, 128>}, {pipeline_mode = #tpu.pipeline_mode<synchronous>, transform_indices = @transform_6, window_bounds = array<i64: 1, 128>}, {pipeline_mode = #tpu.pipeline_mode<synchronous>, transform_indices = @transform_7, window_bounds = array<i64: 1, 128>}, {pipeline_mode = #tpu.pipeline_mode<synchronous>, transform_indices = @transform_8, window_bounds = array<i64: 128, 256>}, {pipeline_mode = #tpu.pipeline_mode<synchronous>, transform_indices = @transform_9, window_bounds = array<i64: 1, 256>}, {pipeline_mode = #tpu.pipeline_mode<synchronous>, transform_indices = @transform_10, window_bounds = array<i64: 256, 128>}, {pipeline_mode = #tpu.pipeline_mode<synchronous>, transform_indices = @transform_11, window_bounds = array<i64: 1, 128>}, {pipeline_mode = #tpu.pipeline_mode<synchronous>, transform_indices = @transform_12, window_bounds = array<i64: 1, 128>}, {pipeline_mode = #tpu.pipeline_mode<synchronous>, transform_indices = @transform_13, window_bounds = array<i64: 1, 128>}, {transform_indices = @transform_14, window_bounds = array<i64: 1, 128, 128>}]} {
    %c0 = arith.constant 0 : index
    %c0_0 = arith.constant 0 : index
    %c0_1 = arith.constant 0 : index
    %0 = vector.load %arg1[%c0, %c0_0, %c0_1] : memref<1x128x128xf32, #tpu.memory_space<vmem>>, vector<1x128x128xf32>
    %1 = vector.shape_cast %0 : vector<1x128x128xf32> to vector<128x128xf32>
    %2 = arith.truncf %1 : vector<128x128xf32> to vector<128x128xbf16>
    %c0_2 = arith.constant 0 : index
    %c0_3 = arith.constant 0 : index
    %3 = vector.load %arg2[%c0_2, %c0_3] : memref<128x384xbf16, #tpu.memory_space<vmem>>, vector<128x384xbf16>
    %cst = arith.constant dense<0.000000e+00> : vector<128x384xf32>
    %4 = tpu.matmul %2, %3, %cst {dimension_numbers = #tpu.dot_dimension_numbers<[1], [0], [0], [1], [0, 0, 1, 1], [], []>} : vector<128x128xbf16>, vector<128x384xbf16>, vector<128x384xf32> -> vector<128x384xf32>
    %5 = arith.truncf %4 : vector<128x384xf32> to vector<128x384xbf16>
    %6 = tpu.iota {dimensions = array<i32: 0>} : vector<128x128xi32>
    %7 = tpu.iota {dimensions = array<i32: 1>} : vector<128x128xi32>
    %8 = arith.cmpi sle, %7, %6 : vector<128x128xi32>
    %c2_i32 = arith.constant 2 : i32
    %9 = vector.broadcast %c2_i32 : i32 to vector<128x128xi32>
    %10 = arith.addi %6, %9 : vector<128x128xi32>
    %11 = arith.cmpi sge, %7, %10 : vector<128x128xi32>
    %12 = vector.extract_strided_slice %5 {offsets = [0, 0], sizes = [128, 64], strides = [1, 1]} : vector<128x384xbf16> to vector<128x64xbf16>
    %13 = vector.extract_strided_slice %5 {offsets = [0, 128], sizes = [128, 64], strides = [1, 1]} : vector<128x384xbf16> to vector<128x64xbf16>
    %14 = vector.extract_strided_slice %5 {offsets = [0, 256], sizes = [128, 64], strides = [1, 1]} : vector<128x384xbf16> to vector<128x64xbf16>
    %c0_4 = arith.constant 0 : index
    %c0_5 = arith.constant 0 : index
    %c0_6 = arith.constant 0 : index
    %15 = vector.load %arg3[%c0_4, %c0_5, %c0_6] : memref<2x1x64xbf16, #tpu.memory_space<vmem>>, vector<1x1x64xbf16>
    %16 = vector.shape_cast %15 : vector<1x1x64xbf16> to vector<1x64xbf16>
    %17 = vector.broadcast %16 : vector<1x64xbf16> to vector<128x64xbf16>
    %18 = arith.addf %12, %17 : vector<128x64xbf16>
    %cst_7 = arith.constant dense<0.000000e+00> : vector<128x128xf32>
    %19 = tpu.matmul %18, %13, %cst_7 {dimension_numbers = #tpu.dot_dimension_numbers<[1], [1], [0], [0], [0, 0, 1, 0], [], []>} : vector<128x64xbf16>, vector<128x64xbf16>, vector<128x128xf32> -> vector<128x128xf32>
    %c0_8 = arith.constant 0 : index
    %c0_9 = arith.constant 0 : index
    %c0_10 = arith.constant 0 : index
    %20 = vector.load %arg4[%c0_8, %c0_9, %c0_10] : memref<2x128x64xbf16, #tpu.memory_space<vmem>>, vector<1x128x64xbf16>
    %21 = vector.shape_cast %20 : vector<1x128x64xbf16> to vector<128x64xbf16>
    %cst_11 = arith.constant dense<0.000000e+00> : vector<128x128xf32>
    %22 = tpu.matmul %12, %21, %cst_11 {dimension_numbers = #tpu.dot_dimension_numbers<[1], [1], [0], [0], [0, 0, 1, 0], [], []>} : vector<128x64xbf16>, vector<128x64xbf16>, vector<128x128xf32> -> vector<128x128xf32>
    %c0_12 = arith.constant 0 : index
    %c0_13 = arith.constant 0 : index
    %c0_14 = arith.constant 0 : index
    %23 = vector.load %arg5[%c0_12, %c0_13, %c0_14] : memref<2x1x128xf32, #tpu.memory_space<vmem>>, vector<1x1x128xf32>
    %24 = vector.shape_cast %23 : vector<1x1x128xf32> to vector<1x128xf32>
    %25 = vector.broadcast %24 : vector<1x128xf32> to vector<128x128xf32>
    %26 = arith.addf %22, %25 : vector<128x128xf32>
    %c0_i32 = arith.constant 0 : i32
    %27 = tpu.dynamic_rotate %26 by %c0_i32 dim 1 {stride = 1 : si32, stride_dimension = 0 : si32} : vector<128x128xf32>, i32 -> vector<128x128xf32>
    %c1_i32 = arith.constant 1 : i32
    %28 = tpu.dynamic_rotate %27 by %c1_i32 dim 1 : vector<128x128xf32>, i32 -> vector<128x128xf32>
    %c127_i32 = arith.constant 127 : i32
    %29 = tpu.dynamic_rotate %28 by %c127_i32 dim 0 : vector<128x128xf32>, i32 -> vector<128x128xf32>
    %cst_15 = arith.constant 0.000000e+00 : f32
    %30 = vector.broadcast %cst_15 : f32 to vector<128x128xf32>
    %31 = arith.select %8, %28, %30 : vector<128x128xi1>, vector<128x128xf32>
    %cst_16 = arith.constant 0.000000e+00 : f32
    %32 = vector.broadcast %cst_16 : f32 to vector<128x128xf32>
    %33 = arith.select %11, %29, %32 : vector<128x128xi1>, vector<128x128xf32>
    %34 = arith.addf %31, %33 : vector<128x128xf32>
    %35 = arith.addf %19, %34 : vector<128x128xf32>
    %cst_17 = arith.constant 1.250000e-01 : f32
    %36 = vector.broadcast %cst_17 : f32 to vector<128x128xf32>
    %37 = arith.mulf %35, %36 : vector<128x128xf32>
    %cst_18 = arith.constant dense<0xFF800000> : vector<128xf32>
    %38 = vector.multi_reduction <maximumf>, %37, %cst_18 [1] : vector<128x128xf32> to vector<128xf32>
    %39 = vector.shape_cast %38 : vector<128xf32> to vector<128x1xf32>
    %40 = vector.broadcast %39 : vector<128x1xf32> to vector<128x128xf32>
    %41 = arith.subf %37, %40 : vector<128x128xf32>
    %42 = math.exp %41 : vector<128x128xf32>
    %cst_19 = arith.constant dense<0.000000e+00> : vector<128xf32>
    %43 = vector.multi_reduction <add>, %42, %cst_19 [1] : vector<128x128xf32> to vector<128xf32>
    %44 = vector.shape_cast %43 : vector<128xf32> to vector<128x1xf32>
    %45 = tpu.reciprocal %44 {approx = true} : vector<128x1xf32> -> vector<128x1xf32>
    %46 = vector.broadcast %45 : vector<128x1xf32> to vector<128x128xf32>
    %47 = arith.mulf %42, %46 : vector<128x128xf32>
    %48 = arith.truncf %47 : vector<128x128xf32> to vector<128x128xbf16>
    %cst_20 = arith.constant dense<0.000000e+00> : vector<128x64xf32>
    %49 = tpu.matmul %48, %14, %cst_20 {dimension_numbers = #tpu.dot_dimension_numbers<[1], [0], [0], [1], [0, 0, 1, 1], [], []>} : vector<128x128xbf16>, vector<128x64xbf16>, vector<128x64xf32> -> vector<128x64xf32>
    %50 = vector.extract_strided_slice %5 {offsets = [0, 64], sizes = [128, 64], strides = [1, 1]} : vector<128x384xbf16> to vector<128x64xbf16>
    %51 = vector.extract_strided_slice %5 {offsets = [0, 192], sizes = [128, 64], strides = [1, 1]} : vector<128x384xbf16> to vector<128x64xbf16>
    %52 = vector.extract_strided_slice %5 {offsets = [0, 320], sizes = [128, 64], strides = [1, 1]} : vector<128x384xbf16> to vector<128x64xbf16>
    %c1 = arith.constant 1 : index
    %c0_21 = arith.constant 0 : index
    %c0_22 = arith.constant 0 : index
    %53 = vector.load %arg3[%c1, %c0_21, %c0_22] : memref<2x1x64xbf16, #tpu.memory_space<vmem>>, vector<1x1x64xbf16>
    %54 = vector.shape_cast %53 : vector<1x1x64xbf16> to vector<1x64xbf16>
    %55 = vector.broadcast %54 : vector<1x64xbf16> to vector<128x64xbf16>
    %56 = arith.addf %50, %55 : vector<128x64xbf16>
    %cst_23 = arith.constant dense<0.000000e+00> : vector<128x128xf32>
    %57 = tpu.matmul %56, %51, %cst_23 {dimension_numbers = #tpu.dot_dimension_numbers<[1], [1], [0], [0], [0, 0, 1, 0], [], []>} : vector<128x64xbf16>, vector<128x64xbf16>, vector<128x128xf32> -> vector<128x128xf32>
    %c1_24 = arith.constant 1 : index
    %c0_25 = arith.constant 0 : index
    %c0_26 = arith.constant 0 : index
    %58 = vector.load %arg4[%c1_24, %c0_25, %c0_26] : memref<2x128x64xbf16, #tpu.memory_space<vmem>>, vector<1x128x64xbf16>
    %59 = vector.shape_cast %58 : vector<1x128x64xbf16> to vector<128x64xbf16>
    %cst_27 = arith.constant dense<0.000000e+00> : vector<128x128xf32>
    %60 = tpu.matmul %50, %59, %cst_27 {dimension_numbers = #tpu.dot_dimension_numbers<[1], [1], [0], [0], [0, 0, 1, 0], [], []>} : vector<128x64xbf16>, vector<128x64xbf16>, vector<128x128xf32> -> vector<128x128xf32>
    %c1_28 = arith.constant 1 : index
    %c0_29 = arith.constant 0 : index
    %c0_30 = arith.constant 0 : index
    %61 = vector.load %arg5[%c1_28, %c0_29, %c0_30] : memref<2x1x128xf32, #tpu.memory_space<vmem>>, vector<1x1x128xf32>
    %62 = vector.shape_cast %61 : vector<1x1x128xf32> to vector<1x128xf32>
    %63 = vector.broadcast %62 : vector<1x128xf32> to vector<128x128xf32>
    %64 = arith.addf %60, %63 : vector<128x128xf32>
    %c0_i32_31 = arith.constant 0 : i32
    %65 = tpu.dynamic_rotate %64 by %c0_i32_31 dim 1 {stride = 1 : si32, stride_dimension = 0 : si32} : vector<128x128xf32>, i32 -> vector<128x128xf32>
    %c1_i32_32 = arith.constant 1 : i32
    %66 = tpu.dynamic_rotate %65 by %c1_i32_32 dim 1 : vector<128x128xf32>, i32 -> vector<128x128xf32>
    %c127_i32_33 = arith.constant 127 : i32
    %67 = tpu.dynamic_rotate %66 by %c127_i32_33 dim 0 : vector<128x128xf32>, i32 -> vector<128x128xf32>
    %cst_34 = arith.constant 0.000000e+00 : f32
    %68 = vector.broadcast %cst_34 : f32 to vector<128x128xf32>
    %69 = arith.select %8, %66, %68 : vector<128x128xi1>, vector<128x128xf32>
    %cst_35 = arith.constant 0.000000e+00 : f32
    %70 = vector.broadcast %cst_35 : f32 to vector<128x128xf32>
    %71 = arith.select %11, %67, %70 : vector<128x128xi1>, vector<128x128xf32>
    %72 = arith.addf %69, %71 : vector<128x128xf32>
    %73 = arith.addf %57, %72 : vector<128x128xf32>
    %cst_36 = arith.constant 1.250000e-01 : f32
    %74 = vector.broadcast %cst_36 : f32 to vector<128x128xf32>
    %75 = arith.mulf %73, %74 : vector<128x128xf32>
    %cst_37 = arith.constant dense<0xFF800000> : vector<128xf32>
    %76 = vector.multi_reduction <maximumf>, %75, %cst_37 [1] : vector<128x128xf32> to vector<128xf32>
    %77 = vector.shape_cast %76 : vector<128xf32> to vector<128x1xf32>
    %78 = vector.broadcast %77 : vector<128x1xf32> to vector<128x128xf32>
    %79 = arith.subf %75, %78 : vector<128x128xf32>
    %80 = math.exp %79 : vector<128x128xf32>
    %cst_38 = arith.constant dense<0.000000e+00> : vector<128xf32>
    %81 = vector.multi_reduction <add>, %80, %cst_38 [1] : vector<128x128xf32> to vector<128xf32>
    %82 = vector.shape_cast %81 : vector<128xf32> to vector<128x1xf32>
    %83 = tpu.reciprocal %82 {approx = true} : vector<128x1xf32> -> vector<128x1xf32>
    %84 = vector.broadcast %83 : vector<128x1xf32> to vector<128x128xf32>
    %85 = arith.mulf %80, %84 : vector<128x128xf32>
    %86 = arith.truncf %85 : vector<128x128xf32> to vector<128x128xbf16>
    %cst_39 = arith.constant dense<0.000000e+00> : vector<128x64xf32>
    %87 = tpu.matmul %86, %52, %cst_39 {dimension_numbers = #tpu.dot_dimension_numbers<[1], [0], [0], [1], [0, 0, 1, 1], [], []>} : vector<128x128xbf16>, vector<128x64xbf16>, vector<128x64xf32> -> vector<128x64xf32>
    %88 = tpu.concatenate %49, %87 in 1 : vector<128x64xf32>, vector<128x64xf32> -> vector<128x128xf32>
    %89 = arith.truncf %88 : vector<128x128xf32> to vector<128x128xbf16>
    %c0_40 = arith.constant 0 : index
    %c0_41 = arith.constant 0 : index
    %90 = vector.load %arg6[%c0_40, %c0_41] : memref<128x128xbf16, #tpu.memory_space<vmem>>, vector<128x128xbf16>
    %cst_42 = arith.constant dense<0.000000e+00> : vector<128x128xf32>
    %91 = tpu.matmul %89, %90, %cst_42 {dimension_numbers = #tpu.dot_dimension_numbers<[1], [0], [0], [1], [0, 0, 1, 1], [], []>} : vector<128x128xbf16>, vector<128x128xbf16>, vector<128x128xf32> -> vector<128x128xf32>
    %92 = arith.addf %1, %91 : vector<128x128xf32>
    %c0_43 = arith.constant 0 : index
    %c0_44 = arith.constant 0 : index
    %93 = vector.load %arg7[%c0_43, %c0_44] : memref<1x128xf32, #tpu.memory_space<vmem>>, vector<1x128xf32>
    %c0_45 = arith.constant 0 : index
    %c0_46 = arith.constant 0 : index
    %94 = vector.load %arg8[%c0_45, %c0_46] : memref<1x128xf32, #tpu.memory_space<vmem>>, vector<1x128xf32>
    %cst_47 = arith.constant dense<0.000000e+00> : vector<128xf32>
    %95 = vector.multi_reduction <add>, %92, %cst_47 [1] : vector<128x128xf32> to vector<128xf32>
    %96 = vector.shape_cast %95 : vector<128xf32> to vector<128x1xf32>
    %cst_48 = arith.constant 1.280000e+02 : f32
    %97 = vector.broadcast %cst_48 : f32 to vector<128x1xf32>
    %98 = arith.divf %96, %97 : vector<128x1xf32>
    %99 = vector.broadcast %98 : vector<128x1xf32> to vector<128x128xf32>
    %100 = arith.subf %92, %99 : vector<128x128xf32>
    %101 = arith.mulf %100, %100 : vector<128x128xf32>
    %cst_49 = arith.constant dense<0.000000e+00> : vector<128xf32>
    %102 = vector.multi_reduction <add>, %101, %cst_49 [1] : vector<128x128xf32> to vector<128xf32>
    %103 = vector.shape_cast %102 : vector<128xf32> to vector<128x1xf32>
    %cst_50 = arith.constant 1.280000e+02 : f32
    %104 = vector.broadcast %cst_50 : f32 to vector<128x1xf32>
    %105 = arith.divf %103, %104 : vector<128x1xf32>
    %cst_51 = arith.constant 9.99999974E-6 : f32
    %106 = vector.broadcast %cst_51 : f32 to vector<128x1xf32>
    %107 = arith.addf %105, %106 : vector<128x1xf32>
    %108 = math.rsqrt %107 : vector<128x1xf32>
    %109 = vector.broadcast %108 : vector<128x1xf32> to vector<128x128xf32>
    %110 = arith.mulf %100, %109 : vector<128x128xf32>
    %111 = vector.broadcast %93 : vector<1x128xf32> to vector<128x128xf32>
    %112 = arith.mulf %110, %111 : vector<128x128xf32>
    %113 = vector.broadcast %94 : vector<1x128xf32> to vector<128x128xf32>
    %114 = arith.addf %112, %113 : vector<128x128xf32>
    %115 = arith.truncf %114 : vector<128x128xf32> to vector<128x128xbf16>
    %c0_52 = arith.constant 0 : index
    %c0_53 = arith.constant 0 : index
    %116 = vector.load %arg9[%c0_52, %c0_53] : memref<128x256xbf16, #tpu.memory_space<vmem>>, vector<128x256xbf16>
    %cst_54 = arith.constant dense<0.000000e+00> : vector<128x256xf32>
    %117 = tpu.matmul %115, %116, %cst_54 {dimension_numbers = #tpu.dot_dimension_numbers<[1], [0], [0], [1], [0, 0, 1, 1], [], []>} : vector<128x128xbf16>, vector<128x256xbf16>, vector<128x256xf32> -> vector<128x256xf32>
    %c0_55 = arith.constant 0 : index
    %c0_56 = arith.constant 0 : index
    %118 = vector.load %arg10[%c0_55, %c0_56] : memref<1x256xf32, #tpu.memory_space<vmem>>, vector<1x256xf32>
    %119 = vector.broadcast %118 : vector<1x256xf32> to vector<128x256xf32>
    %120 = arith.addf %117, %119 : vector<128x256xf32>
    %cst_57 = arith.constant 0.000000e+00 : f32
    %121 = vector.broadcast %cst_57 : f32 to vector<128x256xf32>
    %122 = arith.maximumf %120, %121 : vector<128x256xf32>
    %123 = arith.truncf %122 : vector<128x256xf32> to vector<128x256xbf16>
    %c0_58 = arith.constant 0 : index
    %c0_59 = arith.constant 0 : index
    %124 = vector.load %arg11[%c0_58, %c0_59] : memref<256x128xbf16, #tpu.memory_space<vmem>>, vector<256x128xbf16>
    %cst_60 = arith.constant dense<0.000000e+00> : vector<128x128xf32>
    %125 = tpu.matmul %123, %124, %cst_60 {dimension_numbers = #tpu.dot_dimension_numbers<[1], [0], [0], [1], [0, 0, 1, 1], [], []>} : vector<128x256xbf16>, vector<256x128xbf16>, vector<128x128xf32> -> vector<128x128xf32>
    %c0_61 = arith.constant 0 : index
    %c0_62 = arith.constant 0 : index
    %126 = vector.load %arg12[%c0_61, %c0_62] : memref<1x128xf32, #tpu.memory_space<vmem>>, vector<1x128xf32>
    %127 = vector.broadcast %126 : vector<1x128xf32> to vector<128x128xf32>
    %128 = arith.addf %125, %127 : vector<128x128xf32>
    %129 = arith.addf %114, %128 : vector<128x128xf32>
    %c0_63 = arith.constant 0 : index
    %c0_64 = arith.constant 0 : index
    %130 = vector.load %arg13[%c0_63, %c0_64] : memref<1x128xf32, #tpu.memory_space<vmem>>, vector<1x128xf32>
    %c0_65 = arith.constant 0 : index
    %c0_66 = arith.constant 0 : index
    %131 = vector.load %arg14[%c0_65, %c0_66] : memref<1x128xf32, #tpu.memory_space<vmem>>, vector<1x128xf32>
    %cst_67 = arith.constant dense<0.000000e+00> : vector<128xf32>
    %132 = vector.multi_reduction <add>, %129, %cst_67 [1] : vector<128x128xf32> to vector<128xf32>
    %133 = vector.shape_cast %132 : vector<128xf32> to vector<128x1xf32>
    %cst_68 = arith.constant 1.280000e+02 : f32
    %134 = vector.broadcast %cst_68 : f32 to vector<128x1xf32>
    %135 = arith.divf %133, %134 : vector<128x1xf32>
    %136 = vector.broadcast %135 : vector<128x1xf32> to vector<128x128xf32>
    %137 = arith.subf %129, %136 : vector<128x128xf32>
    %138 = arith.mulf %137, %137 : vector<128x128xf32>
    %cst_69 = arith.constant dense<0.000000e+00> : vector<128xf32>
    %139 = vector.multi_reduction <add>, %138, %cst_69 [1] : vector<128x128xf32> to vector<128xf32>
    %140 = vector.shape_cast %139 : vector<128xf32> to vector<128x1xf32>
    %cst_70 = arith.constant 1.280000e+02 : f32
    %141 = vector.broadcast %cst_70 : f32 to vector<128x1xf32>
    %142 = arith.divf %140, %141 : vector<128x1xf32>
    %cst_71 = arith.constant 9.99999974E-6 : f32
    %143 = vector.broadcast %cst_71 : f32 to vector<128x1xf32>
    %144 = arith.addf %142, %143 : vector<128x1xf32>
    %145 = math.rsqrt %144 : vector<128x1xf32>
    %146 = vector.broadcast %145 : vector<128x1xf32> to vector<128x128xf32>
    %147 = arith.mulf %137, %146 : vector<128x128xf32>
    %148 = vector.broadcast %130 : vector<1x128xf32> to vector<128x128xf32>
    %149 = arith.mulf %147, %148 : vector<128x128xf32>
    %150 = vector.broadcast %131 : vector<1x128xf32> to vector<128x128xf32>
    %151 = arith.addf %149, %150 : vector<128x128xf32>
    %c0_72 = arith.constant 0 : index
    %c0_73 = arith.constant 0 : index
    %c0_74 = arith.constant 0 : index
    %152 = vector.load %arg15[%c0_72, %c0_73, %c0_74] : memref<1x128x128xf32, #tpu.memory_space<vmem>>, vector<1x128x128xf32>
    %153 = vector.shape_cast %152 : vector<1x128x128xf32> to vector<128x128xf32>
    %154 = vector.shape_cast %151 : vector<128x128xf32> to vector<1x128x128xf32>
    tpu.vector_store %arg15[%c0_72, %c0_73, %c0_74], %154 {strides = array<i32>} : memref<1x128x128xf32, #tpu.memory_space<vmem>>, vector<1x128x128xf32>,
    return
  }
  func.func @transform_0(%arg0: i32) -> (i32, i32, i32) {
    %c0_i32 = arith.constant 0 : i32
    %c0_i32_0 = arith.constant 0 : i32
    %c0_i32_1 = arith.constant 0 : i32
    return %arg0, %c0_i32, %c0_i32_0 : i32, i32, i32
  }
  func.func @transform_1(%arg0: i32) -> (i32, i32) {
    %c0_i32 = arith.constant 0 : i32
    %c0_i32_0 = arith.constant 0 : i32
    %c0_i32_1 = arith.constant 0 : i32
    return %c0_i32, %c0_i32_0 : i32, i32
  }
  func.func @transform_2(%arg0: i32) -> (i32, i32, i32) {
    %c0_i32 = arith.constant 0 : i32
    %c0_i32_0 = arith.constant 0 : i32
    %c0_i32_1 = arith.constant 0 : i32
    %c0_i32_2 = arith.constant 0 : i32
    return %c0_i32, %c0_i32_0, %c0_i32_1 : i32, i32, i32
  }
  func.func @transform_3(%arg0: i32) -> (i32, i32, i32) {
    %c0_i32 = arith.constant 0 : i32
    %c0_i32_0 = arith.constant 0 : i32
    %c0_i32_1 = arith.constant 0 : i32
    %c0_i32_2 = arith.constant 0 : i32
    return %c0_i32, %c0_i32_0, %c0_i32_1 : i32, i32, i32
  }
  func.func @transform_4(%arg0: i32) -> (i32, i32, i32) {
    %c0_i32 = arith.constant 0 : i32
    %c0_i32_0 = arith.constant 0 : i32
    %c0_i32_1 = arith.constant 0 : i32
    %c0_i32_2 = arith.constant 0 : i32
    return %c0_i32, %c0_i32_0, %c0_i32_1 : i32, i32, i32
  }
  func.func @transform_5(%arg0: i32) -> (i32, i32) {
    %c0_i32 = arith.constant 0 : i32
    %c0_i32_0 = arith.constant 0 : i32
    %c0_i32_1 = arith.constant 0 : i32
    return %c0_i32, %c0_i32_0 : i32, i32
  }
  func.func @transform_6(%arg0: i32) -> (i32, i32) {
    %c0_i32 = arith.constant 0 : i32
    %c0_i32_0 = arith.constant 0 : i32
    %c0_i32_1 = arith.constant 0 : i32
    return %c0_i32, %c0_i32_0 : i32, i32
  }
  func.func @transform_7(%arg0: i32) -> (i32, i32) {
    %c0_i32 = arith.constant 0 : i32
    %c0_i32_0 = arith.constant 0 : i32
    %c0_i32_1 = arith.constant 0 : i32
    return %c0_i32, %c0_i32_0 : i32, i32
  }
  func.func @transform_8(%arg0: i32) -> (i32, i32) {
    %c0_i32 = arith.constant 0 : i32
    %c0_i32_0 = arith.constant 0 : i32
    %c0_i32_1 = arith.constant 0 : i32
    return %c0_i32, %c0_i32_0 : i32, i32
  }
  func.func @transform_9(%arg0: i32) -> (i32, i32) {
    %c0_i32 = arith.constant 0 : i32
    %c0_i32_0 = arith.constant 0 : i32
    %c0_i32_1 = arith.constant 0 : i32
    return %c0_i32, %c0_i32_0 : i32, i32
  }
  func.func @transform_10(%arg0: i32) -> (i32, i32) {
    %c0_i32 = arith.constant 0 : i32
    %c0_i32_0 = arith.constant 0 : i32
    %c0_i32_1 = arith.constant 0 : i32
    return %c0_i32, %c0_i32_0 : i32, i32
  }
  func.func @transform_11(%arg0: i32) -> (i32, i32) {
    %c0_i32 = arith.constant 0 : i32
    %c0_i32_0 = arith.constant 0 : i32
    %c0_i32_1 = arith.constant 0 : i32
    return %c0_i32, %c0_i32_0 : i32, i32
  }
  func.func @transform_12(%arg0: i32) -> (i32, i32) {
    %c0_i32 = arith.constant 0 : i32
    %c0_i32_0 = arith.constant 0 : i32
    %c0_i32_1 = arith.constant 0 : i32
    return %c0_i32, %c0_i32_0 : i32, i32
  }
  func.func @transform_13(%arg0: i32) -> (i32, i32) {
    %c0_i32 = arith.constant 0 : i32
    %c0_i32_0 = arith.constant 0 : i32
    %c0_i32_1 = arith.constant 0 : i32
    return %c0_i32, %c0_i32_0 : i32, i32
  }
  func.func @transform_14(%arg0: i32) -> (i32, i32, i32) {
    %c0_i32 = arith.constant 0 : i32
    %c0_i32_0 = arith.constant 0 : i32
    %c0_i32_1 = arith.constant 0 : i32
    return %arg0, %c0_i32, %c0_i32_0 : i32, i32, i32
  }
}

</mosaic_0001>

<bundles_post_ra>
// kernel: tpu_custom_call.1
= control target key start
LH: loop header
LB: loop body
LE: loop exit
PB: predicated region body
PF: predicated region fallthrough
CT: control target
= control target key end

     0   :  { %s7908_s0 = inlined_call_operand.hbm [shape: f32[2,128,128], index: 0, kind: input, shape index: {}]   ;;  %s7909_s1 = inlined_call_operand.vmem [shape: bf16[128,384], index: 1, kind: input, shape index: {}]   ;;  %s7910_s2 = inlined_call_operand.vmem [shape: bf16[2,1,64], index: 2, kind: input, shape index: {}]   ;;  %s7911_s3 = inlined_call_operand.vmem [shape: bf16[2,128,64], index: 3, kind: input, shape index: {}]   ;;  %s7912_s4 = inlined_call_operand.vmem [shape: f32[2,1,128], index: 4, kind: input, shape index: {}]   ;;  %s7913_s5 = inlined_call_operand.hbm [shape: bf16[128,128], index: 5, kind: input, shape index: {}]   ;;  %s7914_s6 = inlined_call_operand.vmem [shape: f32[1,128], index: 6, kind: input, shape index: {}]   ;;  %s7915_s7 = inlined_call_operand.vmem [shape: f32[1,128], index: 7, kind: input, shape index: {}]   ;;  %s7916_s8 = inlined_call_operand.hbm [shape: bf16[128,256], index: 8, kind: input, shape index: {}]   ;;  %s7917_s9 = inlined_call_operand.vmem [shape: f32[1,256], index: 9, kind: input, shape index: {}]   ;;  %s7918_s10 = inlined_call_operand.hbm [shape: bf16[256,128], index: 10, kind: input, shape index: {}]   ;;  %s7919_s11 = inlined_call_operand.vmem [shape: f32[1,128], index: 11, kind: input, shape index: {}]   ;;  %s7920_s12 = inlined_call_operand.vmem [shape: f32[1,128], index: 12, kind: input, shape index: {}]   ;;  %s7921_s13 = inlined_call_operand.vmem [shape: f32[1,128], index: 13, kind: input, shape index: {}]   ;;  %s7922_s14 = inlined_call_operand.hbm [shape: f32[2,128,128], index: 14, kind: output, shape index: {}]  }
   0x1   :  { %8006 = sst [smem:[#allocation59_spill]] %s7913_s5 }
   0x2   :  { %8007 = sst [smem:[#allocation60_spill]] %s7915_s7 }
   0x3   :  { %8008 = sst [smem:[#allocation61_spill]] %s7917_s9 }
   0x4   :  { %8009 = sst [smem:[#allocation62_spill]] %s7919_s11 }
   0x5   :  { %8010 = sst [smem:[#allocation63_spill]] %s7920_s12 }
   0x6   :  { %8011 = sst [smem:[#allocation64_spill]] %s7921_s13 }
   0x7   :  { %8012 = sst [smem:[#allocation65_spill]] %s7922_s14 }
   0x8   :  { %19 = vsyncpa [#allocation3], 0 }
   0x9   :  { %21 = vsyncpa [#allocation3 + $0x1], 0 }
   0xa   :  { %22 = vsyncpa [#allocation6], 0 }
   0xb   :  { %23 = vsyncpa [#allocation9], 0 }
   0xc   :  { %24 = vsyncpa [#allocation4], 0 }
   0xd   :  { %26 = vsyncpa [#allocation4 + $0x1], 0  ;;  %s5510_s29 = smov 0   ;;  %s5512_s30 = smov 0  }
   0xe   :  { %s5514_s15 = smov 0   ;;  %s5516_s16 = smov 0  }
   0xf LB: > { %8013 = sst [smem:[#allocation15_spill]] %s5391_s29  ;;  %s5531_s17 = sadd.s32 4294967295, %s5403_s16   ;;  %s5403_s16 = sphi %s5516_s16, %s8173_s16   ;;  %s5399_s15 = sphi %s5514_s15, %s8172_s15   ;;  %s5395_s30 = sphi %s5512_s30, %s8171_s30   ;;  %s5391_s29 = sphi %s5510_s29, %s8170_s29  }
  0x10   : > { %s4114_s18 = sadd.s32 4294967294, %s5403_s16   ;;  %p52_p0 = scmp.ne.s32.totalorder %s5395_s30, %s5391_s29 }
  0x11   : > { %p7926_p1 = scmp.eq.s32.totalorder %s5531_s17, 0  ;;  %p355_p3 = scmp.eq.s32.totalorder %s4114_s18, 1 }
  0x12   : > { %p4115_p5 = scmp.ge.s32.totalorder %s5403_s16, 1  ;;  %p362_p7 = scmp.lt.s32.totalorder %s5403_s16, 3 }
  0x13   : > { %p5540_p4 = por %p7926_p1, %p52_p0  ;;  %p5545_p6 = por %p355_p3, %p52_p0 }
  0x14   : > { %p5550_p8 = pnand %p4115_p5, %p362_p7  ;;  %s5405_s22 = smov [#allocation5]  }
  0x15   : > { %s8014_s19 = scalar_select %p5540_p4, 1, 0 }
  0x16   : > { %s8015_s20 = scalar_select %p5545_p6, 1, 0 }
  0x17   : > { %s8017_s21 = scalar_select %p5550_p8, 1, 0 }
  0x18   : > { %8016 = sst [smem:[#allocation16_spill]] %s8015_s20  ;;  %s386_s23 = sshll.u32 %s5405_s22, 4  ;;  %s5554_s23 = int_to_ptr.vmem [resolvable:$true] %s386_s23 }
  0x19   : > { %p4785_p9 = pneg %p5550_p8  ;;  %s5406_s25 = smov [#allocation7]  }
  0x1a   : > { %s405_s26 = sshll.u32 %s5406_s25, 4  ;;  %s8019_s5 = sld [smem:[#allocation59_spill]]  ;;  %s5565_s26 = int_to_ptr.vmem [resolvable:$true] %s405_s26 }
  0x1b   : > { %p5561_p11 = pnand %p4785_p9, %p7926_p1 }
  0x1d   : > { %p5575_p13 = pneg %p5561_p11 }
  0x20   : > { %s5215_s18 = scalar_lea.hbm %s8019_s5, 1024 }
  0x21   : > { %p5216_p12 = scmp.ne.s32.totalorder %s8019_s5, %s5215_s18  ;;  %p5222_p5 = scmp.lt.u32.totalorder %s5215_s18, %s8019_s5 }
  0x23   : > { %p5218_p0 = pnand %p5575_p13, %p5216_p12 }
  0x25   : > { %p5219_p3 = pneg %p5218_p0 }
  0x27   : > { %p5224_p7 = pnand %p5222_p5, %p5219_p3 }
  0x29   : > { %5227 = shalt.err (!%p5224_p7)
}
  0x2a   : > { %s5228_s20 = scalar_lea.vmem %s5554_s23, 1024  ;;  %p5236_p2 = scmp.lt.s32.totalorder %s5554_s23, %s5554_s23 }
  0x2b   : > { %p5229_p9 = scmp.ne.s32.totalorder %s5554_s23, %s5228_s20  ;;  %p5237_p6 = scmp.lt.s32.totalorder %s5228_s20, %s5228_s20 }
  0x2d   : > { %p5231_p10 = pnand %p5229_p9, %p5575_p13  ;;  %p5238_p12 = por %p5237_p6, %p5236_p2 }
  0x2f   : > { %p5232_p1 = pneg %p5231_p10 }
  0x31   : > { %p5239_p0 = pnand %p5238_p12, %p5232_p1 }
  0x33   : > { %5242 = shalt.err (!%p5239_p0)
}
  0x34   : > { %s7927_s27 = smov 64   ;;  %s7928_s14 = smov 4  }
  0x35   : > { %4788 = dma.hbm_to_vmem [thread:$0]  (!%p5561_p11), %s8019_s5, 1024, %s5554_s23, [#allocation6], %s7927_s27, %s7927_s27, %s7928_s14  }
  0x36   : > { %s5243_s20 = scalar_lea.hbm %s7916_s8, 2048 }
  0x37   : > { %p5244_p1 = scmp.ne.s32.totalorder %s7916_s8, %s5243_s20  ;;  %p5250_p10 = scmp.lt.u32.totalorder %s5243_s20, %s7916_s8 }
  0x39   : > { %p5246_p2 = pnand %p5244_p1, %p5575_p13 }
  0x3b   : > { %p5247_p6 = pneg %p5246_p2 }
  0x3d   : > { %p5252_p3 = pnand %p5250_p10, %p5247_p6 }
  0x3f   : > { %5255 = shalt.err (!%p5252_p3)
}
  0x40   : > { %s5256_s23 = scalar_lea.vmem %s5565_s26, 2048  ;;  %p5264_p12 = scmp.lt.s32.totalorder %s5565_s26, %s5565_s26 }
  0x41   : > { %p5257_p5 = scmp.ne.s32.totalorder %s5565_s26, %s5256_s23  ;;  %p5265_p0 = scmp.lt.s32.totalorder %s5256_s23, %s5256_s23 }
  0x43   : > { %p5259_p7 = pnand %p5257_p5, %p5575_p13  ;;  %p5266_p1 = por %p5265_p0, %p5264_p12 }
  0x45   : > { %p5260_p9 = pneg %p5259_p7 }
  0x47   : > { %p5267_p2 = pnand %p5266_p1, %p5260_p9 }
  0x49   : > { %5270 = shalt.err (!%p5267_p2)
}
  0x4a   : > { %s5409_s12 = smov 128   ;;  %s5410_s9 = smov 8  }
  0x4b   : > { %4791 = dma.hbm_to_vmem [thread:$0]  (!%p5561_p11), %s7916_s8, 2048, %s5565_s26, [#allocation6], %s5409_s12, %s5409_s12, %s5410_s9  }
  0x4c   : > { %s5411_s28 = smov [#allocation8]   ;;  %s5626_s22 = sadd.s32 1, %s5403_s16  }
  0x4d   : > { %s421_s18 = sshll.u32 %s5411_s28, 4  ;;  %s5271_s23 = scalar_lea.hbm %s7918_s10, 2048  ;;  %s422_s18 = int_to_ptr.vmem [resolvable:$true] %s421_s18 }
  0x4e   : > { %p5272_p6 = scmp.ne.s32.totalorder %s7918_s10, %s5271_s23  ;;  %p5278_p5 = scmp.lt.u32.totalorder %s5271_s23, %s7918_s10 }
  0x50   : > { %p5274_p10 = pnand %p5272_p6, %p5575_p13 }
  0x52   : > { %p5275_p3 = pneg %p5274_p10 }
  0x54   : > { %p5280_p7 = pnand %p5278_p5, %p5275_p3 }
  0x56   : > { %5283 = shalt.err (!%p5280_p7)
}
  0x57   : > { %s5284_s26 = scalar_lea.vmem %s422_s18, 2048  ;;  %p5292_p1 = scmp.lt.s32.totalorder %s422_s18, %s422_s18 }
  0x58   : > { %p5285_p9 = scmp.ne.s32.totalorder %s422_s18, %s5284_s26  ;;  %p5293_p2 = scmp.lt.s32.totalorder %s5284_s26, %s5284_s26 }
  0x5a   : > { %p5287_p12 = pnand %p5285_p9, %p5575_p13  ;;  %p5294_p4 = por %p5293_p2, %p5292_p1 }
  0x5c   : > { %p5288_p0 = pneg %p5287_p12 }
  0x5e   : > { %p5295_p8 = pnand %p5294_p4, %p5288_p0 }
  0x60   : > { %5298 = shalt.err (!%p5295_p8)
}
  0x61   : > { %s8021_s27 = smov 4   ;;  %s8022_s14 = smov 64  }
  0x62   : > { %4794 = dma.hbm_to_vmem [thread:$0]  (!%p5561_p11), %s7918_s10, 2048, %s422_s18, [#allocation9], %s8022_s14, %s8022_s14, %s8021_s27  }
  0x63   : > { %s36_s29 = ssub.s32 %s5403_s16, %s5626_s22  ;;  %s39_s24 = sadd.s32 1, %s5399_s15 }
  0x64   : > { %p37_p4 = scmp.eq.s32.totalorder %s36_s29, 0  ;;  %p46_p8 = scmp.ne.s32.totalorder %s5399_s15, %s5395_s30 }
  0x65   : > { %p47_p13 = scmp.eq.s32.totalorder %s5403_s16, 0  ;;  %p4806_p6 = scmp.lt.s32.totalorder %s5403_s16, 2 }
  0x66   : > { %s5657_s11 = scalar_select %p37_p4, %s5399_s15, %s39_s24  }
  0x67   : > { %p48_p10 = por %p47_p13, %p46_p8  ;;  %p8023_p3 = scmp.eq.s32.totalorder %s5531_s17, 1 }
  0x68   : > { %s444_s28 = sand.u32 1, %s5399_s15   ;;  %s4271_s25 = sshll.u32 %s5403_s16, 11 }
  0x69   : > { %p5661_p5 = por %p8023_p3, %p46_p8  ;;  %s4120_s20 = sshll.u32 %s444_s28, 7 }
  0x6a   : > { %s5670_s18 = scalar_lea.hbm %s7908_s0, %s4271_s25  ;;  %s448_s27 = scalar_lea.vmem [#allocation2], %s4120_s20 }
  0x6b   : > { %s455_s14 = sshll.u32 %s448_s27, 4  ;;  %p5672_p11 = pnand %p4806_p6, %p48_p10  ;;  %s5676_s14 = int_to_ptr.vmem [resolvable:$true] %s455_s14 }
  0x6c   : > { %s5678_s7 = scalar_lea.sflag [#allocation3], %s444_s28  ;;  %s5299_s29 = scalar_lea.hbm %s5670_s18, 2048 }
  0x6d   : > { %p5300_p7 = scmp.ne.s32.totalorder %s5670_s18, %s5299_s29  ;;  %p5301_p9 = pneg %p5672_p11 }
  0x6e   : > { %s5304_s20 = scalar_lea.hbm %s7908_s0, 4096  ;;  %p5305_p1 = scmp.lt.u32.totalorder %s5670_s18, %s7908_s0 }
  0x6f   : > { %p5302_p12 = pnand %p5301_p9, %p5300_p7  ;;  %p5306_p2 = scmp.lt.u32.totalorder %s5304_s20, %s5299_s29 }
  0x70   : > { %p5308_p8 = scmp.lt.u32.totalorder %s5299_s29, %s5670_s18 }
  0x71   : > { %p5303_p0 = pneg %p5302_p12  ;;  %p5307_p4 = por %p5306_p2, %p5305_p1 }
  0x73   : > { %p5309_p13 = por %p5308_p8, %p5307_p4 }
  0x75   : > { %p5310_p6 = pnand %p5309_p13, %p5303_p0 }
  0x77   : > { %5313 = shalt.err (!%p5310_p6)
}
  0x78   : > { %s5314_s28 = scalar_lea.vmem %s5676_s14, 2048  ;;  %s5412_s27 = smov [#allocation2]  }
  0x79   : > { %p5315_p10 = scmp.ne.s32.totalorder %s5676_s14, %s5314_s28  ;;  %s5319_s24 = sshll.u32 %s5412_s27, 4  ;;  %s5320_s24 = int_to_ptr.vmem [resolvable:$false] %s5319_s24 }
  0x7a   : > { %s5321_s25 = scalar_lea.vmem %s5320_s24, 4096  ;;  %p5322_p12 = scmp.lt.s32.totalorder %s5676_s14, %s5320_s24 }
  0x7b   : > { %p5317_p3 = pnand %p5315_p10, %p5301_p9  ;;  %p5323_p1 = scmp.lt.s32.totalorder %s5321_s25, %s5314_s28 }
  0x7d   : > { %p5318_p7 = pneg %p5317_p3  ;;  %p5324_p2 = por %p5323_p1, %p5322_p12 }
  0x7f   : > { %p5325_p4 = pnand %p5324_p2, %p5318_p7 }
  0x81   : > { %5328 = shalt.err (!%p5325_p4)
}
  0x82   : > { %4798 = dma.hbm_to_vmem [thread:$0]  (!%p5672_p11), %s5670_s18, 2048, %s5676_s14, %s5678_s7, %s5409_s12, %s5409_s12, %s5410_s9  }
  0x83   : > { %p8026_p9 = scmp.ne.s32.totalorder %s8017_s21, 0 }
  0x85   : > { %467 = sbr.rel (%p8026_p9) target bundleno = 3597 (0xe0d), region = 76 }
  0x8c   : > { %s5712_s29 = sand.u32 1, %s5395_s30   ;;  %p8027_p0 = scmp.ne.s32.totalorder %s8014_s19, 0 }
  0x8d   : > { %s7931_s20 = sshll.u32 %s5712_s29, 7  ;;  %s470_s23 = scalar_lea.sflag [#allocation3], %s5712_s29 }
  0x8e   : > { %s5718_s5 = scalar_lea.vmem [#allocation2], %s7931_s20 }
  0x8f   : > { %5374 = dma.done.wait (%p8027_p0), %s470_s23, 2048  }
  0x90   : > { %5376 = vsyncadd (%p8027_p0), %s470_s23, 4294965248  ;;  %p8028_p11 = scmp.eq.s32.totalorder %s5531_s17, 0 }
  0x92   : > { %5378 = dma.done.wait (%p8028_p11), [#allocation6], 3072   ;;  %p8029_p8 = pmov %p8028_p11 }
  0x94   : > { %5380 = vsyncadd (%p8029_p8), [#allocation6], 4294964224  ;;  %p8030_p13 = pmov %p8029_p8 }
  0x95   : > { %p8031_p6 = pmov %p8029_p8 }
  0x96   : > { %5382 = dma.done.wait (%p8030_p13), [#allocation9], 2048  }
  0x97   : > { %5384 = vsyncadd (%p8031_p6), [#allocation9], 4294965248  ;;  %v7936_v0 = vmov 0   ;;  %v4911_v1 = vld [vmem:[%s7909_s1 + $0x4] ss:$12 sps:$4 sm:$0xff]   ;;  %v532_v10 = vld [vmem:[%s5718_s5 + $0x8] sm:$0xff] }
  0x98   : > { %747 = vmatprep.mubr.bf16.mxu0 %v7936_v0  ;;  %v4913_v2 = vld [vmem:[%s7909_s1] ss:$12 sps:$4 sm:$0xff]   ;;  %715 = vmatprep.subr.bf16.mxu0 %v4911_v1  ;;  %v4914_v3 = vld [vmem:[%s7909_s1 + $0x1c] ss:$12 sps:$4 sm:$0xff]   ;;  %v4916_v4 = vld [vmem:[%s7909_s1 + $0x18] ss:$12 sps:$4 sm:$0xff]  }
  0x99   : > { %716 = vmatpush1.bf16.msra.mxu0 %v4913_v2  ;;  %v4917_v5 = vld [vmem:[%s7909_s1 + $0x34] ss:$12 sps:$4 sm:$0xff]   ;;  %v4919_v6 = vld [vmem:[%s7909_s1 + $0x30] ss:$12 sps:$4 sm:$0xff]   ;;  %v4920_v7 = vld [vmem:[%s7909_s1 + $0x4c] ss:$12 sps:$4 sm:$0xff]   ;;  %v949_v2 = vlaneseq }
  0x9a   : > { %717 = vmatprep.subr.bf16.mxu0 %v4914_v3  ;;  %v531_v8 = vld [vmem:[%s5718_s5] sm:$0xff]  ;;  %v4922_v9 = vld [vmem:[%s7909_s1 + $0x48] ss:$12 sps:$4 sm:$0xff]   ;;  %v4931_v20 = vld [vmem:[%s7909_s1 + $0x90] ss:$12 sps:$4 sm:$0xff]   ;;  %vm1095_vm0 = vcmask 523264  }
  0x9b   : > { %v4923_v11 = vld [vmem:[%s7909_s1 + $0x64] ss:$12 sps:$4 sm:$0xff]   ;;  %v547_v12 = vpack.c.bf16 %v532_v10, %v531_v8  ;;  %v4925_v13 = vld [vmem:[%s7909_s1 + $0x60] ss:$12 sps:$4 sm:$0xff]   ;;  %v4926_v14 = vld [vmem:[%s7909_s1 + $0x7c] ss:$12 sps:$4 sm:$0xff]  }
  0x9c   : > { %v4936_v15 = vld [vmem:[%s7909_s1 + $0x8] ss:$12 sps:$4 sm:$0xff]   ;;  %v4928_v16 = vld [vmem:[%s7909_s1 + $0x78] ss:$12 sps:$4 sm:$0xff]   ;;  %v4937_v17 = vld [vmem:[%s7909_s1 + $0x20] ss:$12 sps:$4 sm:$0xff]  }
  0x9d   : > { %718 = vmatpush1.bf16.msra.mxu0 %v4916_v4  ;;  %4481 = vmatprep.mubr.bf16.mxu1 %v547_v12  ;;  %v4929_v18 = vld [vmem:[%s7909_s1 + $0x94] ss:$12 sps:$4 sm:$0xff]   ;;  %v4939_v19 = vld [vmem:[%s7909_s1 + $0x38] ss:$12 sps:$4 sm:$0xff]   ;;  %v4940_v22 = vld [vmem:[%s7909_s1 + $0x50] ss:$12 sps:$4 sm:$0xff]  }
  0x9e   : > { %719 = vmatprep.subr.bf16.mxu0 %v4917_v5  ;;  %4465 = vmatprep.subr.bf16.mxu1 %v4936_v15  ;;  %v4932_v21 = vld [vmem:[%s7909_s1 + $0xac] ss:$12 sps:$4 sm:$0xff]   ;;  %v4934_v23 = vld [vmem:[%s7909_s1 + $0xa8] ss:$12 sps:$4 sm:$0xff]   ;;  %v4935_v24 = vld [vmem:[%s7911_s3] sm:$0xff]   ;;  %v5869_v3 = vshrl.u32 %v949_v2, 7 }
  0x9f   : > { %4466 = vmatpush3.bf16.msra.mxu1 %v4936_v15  ;;  %v4942_v25 = vld [vmem:[%s7909_s1 + $0x68] ss:$12 sps:$4 sm:$0xff]   ;;  %v4943_v26 = vld [vmem:[%s7909_s1 + $0x80] ss:$12 sps:$4 sm:$0xff]   ;;  %v1121_v27 = vsel %vm1095_vm0, %v4935_v24, 0  ;;  %v534_v29 = vld [vmem:[%s5718_s5 + $0x18] sm:$0xff] }
  0xa0   : > { %4467 = vmatprep.subr.bf16.mxu1 %v4937_v17  ;;  %v533_v28 = vld [vmem:[%s5718_s5 + $0x10] sm:$0xff]  ;;  %v4938_v30 = vld [vmem:[%s7911_s3 + $0x8] sm:$0xff]   ;;  %v4945_v31 = vld [vmem:[%s7909_s1 + $0x98] ss:$12 sps:$4 sm:$0xff]   ;;  %s5414_s12 = smov 64   ;;  %s5415_s28 = smov 272  }
  0xa1   : > { %720 = vmatpush1.bf16.msra.mxu0 %v4919_v6  ;;  %v548_v32 = vpack.c.bf16 %v534_v29, %v533_v28  ;;  %v4946_v33 = vld [vmem:[%s7909_s1 + $0xb0] ss:$12 sps:$4 sm:$0xff]   ;;  %v535_v34 = vld [vmem:[%s5718_s5 + $0x20] sm:$0xff]  ;;  %v536_v35 = vld [vmem:[%s5718_s5 + $0x28] sm:$0xff]  ;;  %v1124_v37 = vsel %vm1095_vm0, %v4938_v30, 0  ;;  %v5875_v6 = vsub.s32 0, %v5869_v3 }
  0xa2   : > { %721 = vmatprep.subr.bf16.mxu0 %v4920_v7  ;;  %v4941_v36 = vld [vmem:[%s7911_s3 + $0x10] sm:$0xff]   ;;  %v549_v38 = vpack.c.bf16 %v536_v35, %v535_v34  ;;  %v538_v41 = vld [vmem:[%s5718_s5 + $0x38] sm:$0xff]  ;;  %v539_v43 = vld [vmem:[%s5718_s5 + $0x40] sm:$0xff]  ;;  %s5416_s27 = smov 256   ;;  %s5417_s24 = smov 280   ;;  %vm1352_vm1 = vcmp.lt.s32.totalorder %v5869_v3, 7 }
  0xa3   : > { %4468 = vmatpush3.bf16.msra.mxu1 %v4937_v17  ;;  %v1127_v39 = vsel %vm1095_vm0, %v4941_v36, 0  ;;  %v537_v40 = vld [vmem:[%s5718_s5 + $0x30] sm:$0xff]  ;;  %v4944_v42 = vld [vmem:[%s7911_s3 + $0x18] sm:$0xff]   ;;  %v540_v44 = vld [vmem:[%s5718_s5 + $0x48] sm:$0xff]  ;;  %8032 = vst [vmem:[#allocation17_spill] sm:$0xff] %v5875_v6  ;;  %s5418_s25 = smov 264  }
  0xa4   : > { %4469 = vmatprep.subr.bf16.mxu1 %v4939_v19  ;;  %v550_v45 = vpack.c.bf16 %v538_v41, %v537_v40  ;;  %v551_v46 = vpack.c.bf16 %v540_v44, %v539_v43  ;;  %v1130_v47 = vsel %vm1095_vm0, %v4944_v42, 0  ;;  %v4947_v48 = vld [vmem:[%s7911_s3 + $0x20] sm:$0xff]   ;;  %v541_v49 = vld [vmem:[%s5718_s5 + $0x50] sm:$0xff]  ;;  %v542_v50 = vld [vmem:[%s5718_s5 + $0x58] sm:$0xff]  ;;  %s5419_s23 = smov 304   ;;  %s5420_s21 = smov 288  }
  0xa5   : > { %722 = vmatpush1.bf16.msra.mxu0 %v4922_v9  ;;  %v543_v51 = vld [vmem:[%s5718_s5 + $0x60] sm:$0xff]  ;;  %v544_v52 = vld [vmem:[%s5718_s5 + $0x68] sm:$0xff]  ;;  %v552_v53 = vpack.c.bf16 %v542_v50, %v541_v49  ;;  %v1133_v55 = vsel %vm1095_vm0, %v4947_v48, 0  ;;  %v545_v57 = vld [vmem:[%s5718_s5 + $0x70] sm:$0xff]  ;;  %s5421_s19 = smov 312   ;;  %s5422_s9 = smov 296  }
  0xa6   : > { %723 = vmatprep.subr.bf16.mxu0 %v4923_v11  ;;  %v553_v54 = vpack.c.bf16 %v544_v52, %v543_v51  ;;  %v4948_v56 = vld [vmem:[%s7911_s3 + $0x28] sm:$0xff]   ;;  %v546_v58 = vld [vmem:[%s5718_s5 + $0x78] sm:$0xff]  ;;  %v4949_v61 = vld [vmem:[%s7911_s3 + $0x30] sm:$0xff]   ;;  %s7933_s18 = smov 336   ;;  %s7932_s14 = smov 344  }
  0xa7   : > { %4470 = vmatpush3.bf16.msra.mxu1 %v4939_v19  ;;  %v554_v59 = vpack.c.bf16 %v546_v58, %v545_v57  ;;  %v1136_v60 = vsel %vm1095_vm0, %v4948_v56, 0  ;;  %v1139_v62 = vsel %vm1095_vm0, %v4949_v61, 0  ;;  %v4950_v63 = vld [vmem:[%s7911_s3 + $0x38] sm:$0xff]   ;;  %v1016_v4 = vld [vmem:[%s7910_s2] sm:$0x1]  ;;  %s5425_s7 = smov 320  }
  0xa8   : > { %4471 = vmatprep.subr.bf16.mxu1 %v4940_v22  ;;  %v1142_v1 = vsel %vm1095_vm0, %v4950_v63, 0  ;;  %v1018_v5 = vpack.i.b16 %v1016_v4, %v1016_v4  ;;  %s7934_s26 = smov 328   ;;  %s5427_s20 = smov 368  }
  0xa9   : > { %724 = vmatpush1.bf16.msra.mxu0 %v4925_v13 }
  0xaa   : > { %725 = vmatprep.subr.bf16.mxu0 %v4926_v14  ;;  %v5878_v9 = vrot.slane %v1018_v5, %v5875_v6 }
  0xab   : > { %4472 = vmatpush3.bf16.msra.mxu1 %v4940_v22 }
  0xac   : > { %4473 = vmatprep.subr.bf16.mxu1 %v4942_v25 }
  0xad   : > { %726 = vmatpush1.bf16.msra.mxu0 %v4928_v16 }
  0xae   : > { %727 = vmatprep.subr.bf16.mxu0 %v4929_v18 }
  0xaf   : > { %4474 = vmatpush3.bf16.msra.mxu1 %v4942_v25 }
  0xb0   : > { %4475 = vmatprep.subr.bf16.mxu1 %v4943_v26 }
  0xb1   : > { %728 = vmatpush1.bf16.msra.mxu0 %v4931_v20 }
  0xb2   : > { %729 = vmatprep.subr.bf16.mxu0 %v4932_v21 }
  0xb3   : > { %4476 = vmatpush3.bf16.msra.mxu1 %v4943_v26 }
  0xb4   : > { %4477 = vmatprep.subr.bf16.mxu1 %v4945_v31 }
  0xb5   : > { %730 = vmatpush1.bf16.msra.mxu0 %v4934_v23 }
  0xb6   : > { %4737 = vmatprep.subr.msk.bf16.mxu0 %vm1095_vm0, %v4935_v24 }
  0xb7   : > { %4478 = vmatpush3.bf16.msra.mxu1 %v4945_v31 }
  0xb8   : > { %748 = vmatmul.mubr.bf16.vlgmr.msra.gmra.mrb[0].mxu0 %v547_v12  ;;  %4479 = vmatprep.subr.bf16.mxu1 %v4946_v33 }
  0xb9   : > { %757 = vmatprep.mubr.bf16.mxu0 %v7936_v0 }
  0xbb   : > { %4480 = vmatpush3.bf16.msra.mxu1 %v4946_v33 }
  0xbe   : > { %4498 = vmatpush3.bf16.xpose.msra.mxu0 %v1121_v27  ;;  %4482 = vmatmul.mubr.bf16.vlgmr.msra.gmra.mrb[0].mxu1 %v548_v32 }
  0xbf   : > { %4738 = vmatprep.subr.msk.bf16.mxu0 %vm1095_vm0, %v4938_v30  ;;  %4485 = vmatprep.mubr.bf16.mxu1 %v549_v38 }
  0xc0   : > { %758 = vmatmul.mubr.bf16.gmra.mrb[4].mxu0 %v548_v32 }
  0xc1   : > { %767 = vmatprep.mubr.bf16.mxu0 %v7936_v0 }
  0xc6   : > { %4500 = vmatpush3.bf16.xpose.msra.mxu0 %v1124_v37  ;;  %4486 = vmatmul.mubr.bf16.gmra.mrb[4].mxu1 %v550_v45 }
  0xc7   : > { %4739 = vmatprep.subr.msk.bf16.mxu0 %vm1095_vm0, %v4941_v36  ;;  %4489 = vmatprep.mubr.bf16.mxu1 %v551_v46 }
  0xc8   : > { %768 = vmatmul.mubr.bf16.gmra.mrb[8].mxu0 %v549_v38 }
  0xc9   : > { %777 = vmatprep.mubr.bf16.mxu0 %v7936_v0 }
  0xce   : > { %4502 = vmatpush3.bf16.xpose.msra.mxu0 %v1127_v39  ;;  %4490 = vmatmul.mubr.bf16.gmra.mrb[8].mxu1 %v552_v53 }
  0xcf   : > { %4740 = vmatprep.subr.msk.bf16.mxu0 %vm1095_vm0, %v4944_v42  ;;  %4493 = vmatprep.mubr.bf16.mxu1 %v553_v54 }
  0xd0   : > { %778 = vmatmul.mubr.bf16.gmra.mrb[12].mxu0 %v550_v45 }
  0xd1   : > { %787 = vmatprep.mubr.bf16.mxu0 %v7936_v0 }
  0xd6   : > { %4504 = vmatpush3.bf16.xpose.msra.mxu0 %v1130_v47  ;;  %4494 = vmatmul.mubr.bf16.gmra.mrb[12].mxu1 %v554_v59 }
  0xd7   : > { %4741 = vmatprep.subr.msk.bf16.mxu0 %vm1095_vm0, %v4947_v48 }
  0xd8   : > { %788 = vmatmul.mubr.bf16.gmra.mrb[16].mxu0 %v551_v46 }
  0xd9   : > { %797 = vmatprep.mubr.bf16.mxu0 %v7936_v0 }
  0xde   : > { %4506 = vmatpush3.bf16.xpose.msra.mxu0 %v1133_v55 }
  0xdf   : > { %4742 = vmatprep.subr.msk.bf16.mxu0 %vm1095_vm0, %v4948_v56 }
  0xe0   : > { %798 = vmatmul.mubr.bf16.gmra.mrb[20].mxu0 %v552_v53 }
  0xe1   : > { %807 = vmatprep.mubr.bf16.mxu0 %v7936_v0 }
  0xe6   : > { %4508 = vmatpush3.bf16.xpose.msra.mxu0 %v1136_v60 }
  0xe7   : > { %4743 = vmatprep.subr.msk.bf16.mxu0 %vm1095_vm0, %v4949_v61 }
  0xe8   : > { %808 = vmatmul.mubr.bf16.gmra.mrb[24].mxu0 %v553_v54 }
  0xe9   : > { %817 = vmatprep.mubr.bf16.mxu0 %v7936_v0 }
  0xee   : > { %4510 = vmatpush3.bf16.xpose.msra.mxu0 %v1139_v62 }
  0xef   : > { %4744 = vmatprep.subr.msk.bf16.mxu0 %vm1095_vm0, %v4950_v63 }
  0xf0   : > { %818 = vmatmul.mubr.bf16.gmra.mrb[28].mxu0 %v554_v59 }
  0xf6   : > { %4512 = vmatpush3.bf16.xpose.msra.mxu0 %v1142_v1  ;;  %v4951_v1 = vld [vmem:[%s7911_s3 + $0x40] sm:$0xff]  }
 0x18b   : > { %v749_v7 = vpop.f32.mrb[0].mxu0 }
 0x18c   : > { %v751_v8 = vpop.f32.mrb[1].mxu0 }
 0x18d   : > { %v753_v10 = vpop.f32.mrb[2].mxu0 }
 0x18e   : > { %v5880_v11 = vpack.c.bf16 %v753_v10, %v749_v7  ;;  %v755_v12 = vpop.f32.mrb[3].mxu0  ;;  %v1962_v7 = vsel %vm1095_vm0, %v4951_v1, 0 }
 0x18f   : > { %v5882_v13 = vpack.c.bf16 %v755_v12, %v751_v8  ;;  %v4952_v8 = vld [vmem:[%s7911_s3 + $0x48] sm:$0xff]  }
 0x190   : > { %1881 = vrot.lane.b32.xlu1 %v5880_v11, %s5414_s12  ;;  %4513 = vmatprep.mubr.msk.bf16.mxu0 %vm1095_vm0, %v5880_v11  ;;  %v1024_v14 = vadd.bf16 %v5878_v9, %v5880_v11 }
 0x191   : > { %4745 = vmatprep.subr.msk.bf16.mxu1 %vm1095_vm0, %v5882_v13  ;;  %v1442_v15 = vsel %vm1095_vm0, %v5882_v13, 0 }
 0x192   : > { %4530 = vmatpush3.bf16.xpose.msra.mxu1 %v1442_v15  ;;  %4545 = vmatprep.mubr.msk.bf16.mxu1 %vm1095_vm0, %v1024_v14  ;;  %v1965_v15 = vsel %vm1095_vm0, %v4952_v8, 0 }
 0x193   : > { %v759_v16 = vpop.f32.mrb[4].mxu0 }
 0x194   : > { %v761_v17 = vpop.f32.mrb[5].mxu0 }
 0x195   : > { %v763_v18 = vpop.f32.mrb[6].mxu0 }
 0x196   : > { %v5895_v19 = vpack.c.bf16 %v763_v18, %v759_v16  ;;  %v765_v20 = vpop.f32.mrb[7].mxu0  ;;  %v4953_v16 = vld [vmem:[%s7911_s3 + $0x50] sm:$0xff]  }
 0x197   : > { %v5897_v21 = vpack.c.bf16 %v765_v20, %v761_v17  ;;  %v1968_v20 = vsel %vm1095_vm0, %v4953_v16, 0 }
 0x198   : > { %1883 = vrot.lane.b32.xlu0 %v5895_v19, %s5414_s12  ;;  %4514 = vmatmul.mubr.msk.bf16.vlgmr.msra.gmra.mrb[32].mxu0 %vm1095_vm0, %v5895_v19  ;;  %v1025_v5 = vadd.bf16 %v5878_v9, %v5895_v19 }
 0x199   : > { %4746 = vmatprep.subr.msk.bf16.mxu1 %vm1095_vm0, %v5897_v21  ;;  %v1445_v22 = vsel %vm1095_vm0, %v5897_v21, 0 }
 0x19a   : > { %4532 = vmatpush3.bf16.xpose.msra.mxu1 %v1445_v22  ;;  %v4954_v22 = vld [vmem:[%s7911_s3 + $0x58] sm:$0xff]  }
 0x19b   : > { %v769_v23 = vpop.f32.mrb[8].mxu0 }
 0x19c   : > { %v771_v24 = vpop.f32.mrb[9].mxu0 }
 0x19d   : > { %v773_v25 = vpop.f32.mrb[10].mxu0 }
 0x19e   : > { %v5907_v26 = vpack.c.bf16 %v773_v25, %v769_v23  ;;  %v775_v27 = vpop.f32.mrb[11].mxu0  ;;  %v4955_v25 = vld [vmem:[%s7911_s3 + $0x60] sm:$0xff]  }
 0x19f   : > { %v5909_v28 = vpack.c.bf16 %v775_v27, %v771_v24  ;;  %v1971_v24 = vsel %vm1095_vm0, %v4954_v22, 0  ;;  %v1974_v27 = vsel %vm1095_vm0, %v4955_v25, 0 }
 0x1a0   : > { %4517 = vmatprep.mubr.msk.bf16.mxu0 %vm1095_vm0, %v5907_v26  ;;  %v1026_v10 = vadd.bf16 %v5878_v9, %v5907_v26 }
 0x1a1   : > { %4747 = vmatprep.subr.msk.bf16.mxu1 %vm1095_vm0, %v5909_v28  ;;  %v1448_v29 = vsel %vm1095_vm0, %v5909_v28, 0 }
 0x1a2   : > { %4534 = vmatpush3.bf16.xpose.msra.mxu1 %v1448_v29  ;;  %v4956_v29 = vld [vmem:[%s7911_s3 + $0x68] sm:$0xff]  }
 0x1a3   : > { %v779_v30 = vpop.f32.mrb[12].mxu0 }
 0x1a4   : > { %v781_v31 = vpop.f32.mrb[13].mxu0 }
 0x1a5   : > { %v783_v32 = vpop.f32.mrb[14].mxu0 }
 0x1a6   : > { %v5917_v33 = vpack.c.bf16 %v783_v32, %v779_v30  ;;  %v785_v34 = vpop.f32.mrb[15].mxu0  ;;  %v4957_v30 = vld [vmem:[%s7911_s3 + $0x70] sm:$0xff]   ;;  %v4958_v32 = vld [vmem:[%s7911_s3 + $0x78] sm:$0xff]  }
 0x1a7   : > { %v5919_v35 = vpack.c.bf16 %v785_v34, %v781_v31  ;;  %v1980_v31 = vsel %vm1095_vm0, %v4957_v30, 0 }
 0x1a8   : > { %4518 = vmatmul.mubr.msk.bf16.gmra.mrb[36].mxu0 %vm1095_vm0, %v5917_v33  ;;  %v1027_v14 = vadd.bf16 %v5878_v9, %v5917_v33 }
 0x1a9   : > { %4748 = vmatprep.subr.msk.bf16.mxu1 %vm1095_vm0, %v5919_v35  ;;  %v1451_v36 = vsel %vm1095_vm0, %v5919_v35, 0 }
 0x1aa   : > { %4536 = vmatpush3.bf16.xpose.msra.mxu1 %v1451_v36  ;;  %v1983_v36 = vsel %vm1095_vm0, %v4958_v32, 0 }
 0x1ab   : > { %v789_v37 = vpop.f32.mrb[16].mxu0 }
 0x1ac   : > { %v791_v38 = vpop.f32.mrb[17].mxu0 }
 0x1ad   : > { %v793_v39 = vpop.f32.mrb[18].mxu0 }
 0x1ae   : > { %v5927_v40 = vpack.c.bf16 %v793_v39, %v789_v37  ;;  %v795_v41 = vpop.f32.mrb[19].mxu0 }
 0x1af   : > { %v5929_v42 = vpack.c.bf16 %v795_v41, %v791_v38  ;;  %v4483_v38 = vpop.f32.mrb[0].mxu1 }
 0x1b0   : > { %4521 = vmatprep.mubr.msk.bf16.mxu0 %vm1095_vm0, %v5927_v40  ;;  %v1028_v12 = vadd.bf16 %v5878_v9, %v5927_v40  ;;  %v862_v39 = vpop.f32.mrb[1].mxu1 }
 0x1b1   : > { %4749 = vmatprep.subr.msk.bf16.mxu1 %vm1095_vm0, %v5929_v42  ;;  %v1454_v43 = vsel %vm1095_vm0, %v5929_v42, 0  ;;  %v4484_v41 = vpop.f32.mrb[2].mxu1 }
 0x1b2   : > { %4538 = vmatpush3.bf16.xpose.msra.mxu1 %v1454_v43  ;;  %v6030_v43 = vpack.c.bf16 %v4484_v41, %v4483_v38 }
 0x1b3   : > { %v799_v44 = vpop.f32.mrb[20].mxu0 }
 0x1b4   : > { %v801_v45 = vpop.f32.mrb[21].mxu0  ;;  %8033 = vst [vmem:[#allocation18_spill] sm:$0xff] %v6030_v43 }
 0x1b5   : > { %v803_v46 = vpop.f32.mrb[22].mxu0 }
 0x1b6   : > { %v5937_v47 = vpack.c.bf16 %v803_v46, %v799_v44  ;;  %v805_v48 = vpop.f32.mrb[23].mxu0  ;;  %v865_v44 = vpop.f32.mrb[3].mxu1 }
 0x1b7   : > { %v5939_v49 = vpack.c.bf16 %v805_v48, %v801_v45  ;;  %v6032_v45 = vpack.c.bf16 %v865_v44, %v862_v39  ;;  %v4487_v46 = vpop.f32.mrb[4].mxu1 }
 0x1b8   : > { %4522 = vmatmul.mubr.msk.bf16.gmra.mrb[40].mxu0 %vm1095_vm0, %v5937_v47  ;;  %v1029_v17 = vadd.bf16 %v5878_v9, %v5937_v47  ;;  %v878_v48 = vpop.f32.mrb[5].mxu1 }
 0x1b9   : > { %4750 = vmatprep.subr.msk.bf16.mxu1 %vm1095_vm0, %v5939_v49  ;;  %v1457_v50 = vsel %vm1095_vm0, %v5939_v49, 0  ;;  %8034 = vst [vmem:[#allocation19_spill] sm:$0xff] %v6032_v45  ;;  %4561 = vmatprep.subr.bf16.mxu0 %v6032_v45 }
 0x1ba   : > { %4540 = vmatpush3.bf16.xpose.msra.mxu1 %v1457_v50  ;;  %v4488_v50 = vpop.f32.mrb[6].mxu1  ;;  %4562 = vmatpush3.bf16.msra.mxu0 %v6032_v45 }
 0x1bb   : > { %v809_v51 = vpop.f32.mrb[24].mxu0  ;;  %4563 = vmatprep.subr.bf16.mxu0 %v6030_v43 }
 0x1bc   : > { %v811_v52 = vpop.f32.mrb[25].mxu0 }
 0x1bd   : > { %v813_v53 = vpop.f32.mrb[26].mxu0 }
 0x1be   : > { %v5947_v54 = vpack.c.bf16 %v813_v53, %v809_v51  ;;  %v815_v55 = vpop.f32.mrb[27].mxu0  ;;  %v6035_v51 = vpack.c.bf16 %v4488_v50, %v4487_v46  ;;  %4564 = vmatpush3.bf16.msra.mxu0 %v6030_v43 }
 0x1bf   : > { %v5949_v56 = vpack.c.bf16 %v815_v55, %v811_v52  ;;  %v881_v52 = vpop.f32.mrb[7].mxu1 }
 0x1c0   : > { %4525 = vmatprep.mubr.msk.bf16.mxu0 %vm1095_vm0, %v5947_v54  ;;  %v1030_v18 = vadd.bf16 %v5878_v9, %v5947_v54  ;;  %8035 = vst [vmem:[#allocation20_spill] sm:$0xff] %v6035_v51  ;;  %v6038_v53 = vpack.c.bf16 %v881_v52, %v878_v48  ;;  %v4491_v55 = vpop.f32.mrb[8].mxu1 }
 0x1c1   : > { %4751 = vmatprep.subr.msk.bf16.mxu1 %vm1095_vm0, %v5949_v56  ;;  %v1460_v57 = vsel %vm1095_vm0, %v5949_v56, 0 }
 0x1c2   : > { %4542 = vmatpush3.bf16.xpose.msra.mxu1 %v1460_v57  ;;  %8036 = vst [vmem:[#allocation21_spill] sm:$0xff] %v6038_v53  ;;  %v894_v57 = vpop.f32.mrb[9].mxu1  ;;  %4565 = vmatprep.subr.bf16.mxu0 %v6038_v53 }
 0x1c3   : > { %v819_v58 = vpop.f32.mrb[28].mxu0  ;;  %4566 = vmatpush3.bf16.msra.mxu0 %v6038_v53  ;;  %v6384_v53 = vadd.s32 112, %v5869_v3 }
 0x1c4   : > { %v821_v59 = vpop.f32.mrb[29].mxu0  ;;  %4567 = vmatprep.subr.bf16.mxu0 %v6035_v51 }
 0x1c5   : > { %v823_v60 = vpop.f32.mrb[30].mxu0  ;;  %8061 = vst [vmem:[#allocation44_spill] sm:$0xff] %v6384_v53 }
 0x1c6   : > { %v5957_v61 = vpack.c.bf16 %v823_v60, %v819_v58  ;;  %v825_v62 = vpop.f32.mrb[31].mxu0  ;;  %v4492_v58 = vpop.f32.mrb[10].mxu1 }
 0x1c7   : > { %v5959_v63 = vpack.c.bf16 %v825_v62, %v821_v59  ;;  %v6042_v59 = vpack.c.bf16 %v4492_v58, %v4491_v55  ;;  %v897_v60 = vpop.f32.mrb[11].mxu1  ;;  %4568 = vmatpush3.bf16.msra.mxu0 %v6035_v51 }
 0x1c8   : > { %4526 = vmatmul.mubr.msk.bf16.gmra.mrb[44].mxu0 %vm1095_vm0, %v5957_v61  ;;  %v1031_v23 = vadd.bf16 %v5878_v9, %v5957_v61  ;;  %v1977_v9 = vsel %vm1095_vm0, %v4956_v29, 0  ;;  %v6045_v62 = vpack.c.bf16 %v897_v60, %v894_v57 }
 0x1c9   : > { %4752 = vmatprep.subr.msk.bf16.mxu1 %vm1095_vm0, %v5959_v63  ;;  %v1463_v4 = vsel %vm1095_vm0, %v5959_v63, 0  ;;  %8037 = vst [vmem:[#allocation22_spill] sm:$0xff] %v6042_v59 }
 0x1ca   : > { %4544 = vmatpush3.bf16.xpose.msra.mxu1 %v1463_v4  ;;  %8038 = vst [vmem:[#allocation23_spill] sm:$0xff] %v6045_v62  ;;  %4569 = vmatprep.subr.bf16.mxu0 %v6045_v62 }
 0x1cb   : > { %4753 = vmatprep.subr.msk.bf16.mxu1 %vm1095_vm0, %v4951_v1  ;;  %v4495_v1 = vpop.f32.mrb[12].mxu1  ;;  %4570 = vmatpush3.bf16.msra.mxu0 %v6045_v62 }
 0x1cc   : > { %v910_v4 = vpop.f32.mrb[13].mxu1  ;;  %4571 = vmatprep.subr.bf16.mxu0 %v6042_v59 }
 0x1cf   : > { %4572 = vmatpush3.bf16.msra.mxu0 %v6042_v59  ;;  %v6299_v59 = vadd.s32 32, %v5869_v3 }
 0x1d1   : > { %4546 = vmatmul.mubr.msk.bf16.vlgmr.msra.gmra.mrb[16].mxu1 %vm1095_vm0, %v1025_v5  ;;  %v4496_v5 = vpop.f32.mrb[14].mxu1  ;;  %8051 = vst [vmem:[#allocation36_spill] sm:$0xff] %v6299_v59 }
 0x1d2   : > { %4549 = vmatprep.mubr.msk.bf16.mxu1 %vm1095_vm0, %v1026_v10  ;;  %4594 = vmatpush3.bf16.xpose.msra.mxu1 %v1962_v7  ;;  %v6048_v7 = vpack.c.bf16 %v4496_v5, %v4495_v1 }
 0x1d3   : > { %4754 = vmatprep.subr.msk.bf16.mxu1 %vm1095_vm0, %v4952_v8  ;;  %v913_v8 = vpop.f32.mrb[15].mxu1 }
 0x1d4   : > { %8039 = vst [vmem:[#allocation24_spill] sm:$0xff] %v6048_v7  ;;  %v6051_v10 = vpack.c.bf16 %v913_v8, %v910_v4 }
 0x1d6   : > { %8040 = vst [vmem:[#allocation25_spill] sm:$0xff] %v6051_v10  ;;  %4573 = vmatprep.subr.bf16.mxu0 %v6051_v10 }
 0x1d7   : > { %4574 = vmatpush3.bf16.msra.mxu0 %v6051_v10 }
 0x1d8   : > { %4575 = vmatprep.subr.bf16.mxu0 %v6048_v7 }
 0x1d9   : > { %4550 = vmatmul.mubr.msk.bf16.gmra.mrb[20].mxu1 %vm1095_vm0, %v1027_v14 }
 0x1da   : > { %4596 = vmatpush3.bf16.xpose.msra.mxu1 %v1965_v15  ;;  %4553 = vmatprep.mubr.msk.bf16.mxu1 %vm1095_vm0, %v1028_v12  ;;  %v6065_v12 = vld [vmem:[%s7912_s4] ss:$0 sm:$0xff] }
 0x1db   : > { %4755 = vmatprep.subr.msk.bf16.mxu1 %vm1095_vm0, %v4953_v16  ;;  %4576 = vmatpush3.bf16.msra.mxu0 %v6048_v7 }
 0x1e1   : > { %4554 = vmatmul.mubr.msk.bf16.gmra.mrb[24].mxu1 %vm1095_vm0, %v1029_v17 }
 0x1e2   : > { %4598 = vmatpush3.bf16.xpose.msra.mxu1 %v1968_v20  ;;  %4557 = vmatprep.mubr.msk.bf16.mxu1 %vm1095_vm0, %v1030_v18 }
 0x1e3   : > { %4756 = vmatprep.subr.msk.bf16.mxu1 %vm1095_vm0, %v4954_v22 }
 0x1e9   : > { %4558 = vmatmul.mubr.msk.bf16.gmra.mrb[28].mxu1 %vm1095_vm0, %v1031_v23 }
 0x1ea   : > { %4600 = vmatpush3.bf16.xpose.msra.mxu1 %v1971_v24 }
 0x1eb   : > { %4757 = vmatprep.subr.msk.bf16.mxu1 %vm1095_vm0, %v4955_v25 }
 0x1f2   : > { %4602 = vmatpush3.bf16.xpose.msra.mxu1 %v1974_v27 }
 0x1f3   : > { %4758 = vmatprep.subr.msk.bf16.mxu1 %vm1095_vm0, %v4956_v29 }
 0x1fa   : > { %4604 = vmatpush3.bf16.xpose.msra.mxu1 %v1977_v9 }
 0x1fb   : > { %4759 = vmatprep.subr.msk.bf16.mxu1 %vm1095_vm0, %v4957_v30 }
 0x202   : > { %v1882_v34 = vpop.permute.xlu1 %1881  ;;  %4606 = vmatpush3.bf16.xpose.msra.mxu1 %v1980_v31 }
 0x203   : > { %4609 = vmatprep.mubr.msk.bf16.mxu1 %vm1095_vm0, %v1882_v34  ;;  %4760 = vmatprep.subr.msk.bf16.mxu1 %vm1095_vm0, %v4958_v32 }
 0x20a   : > { %4608 = vmatpush3.bf16.xpose.msra.mxu1 %v1983_v36  ;;  %v1884_v37 = vpop.permute.xlu0 %1883 }
 0x211   : > { %4610 = vmatmul.mubr.msk.bf16.vlgmr.msra.gmra.mrb[32].mxu1 %vm1095_vm0, %v1884_v37 }
 0x26b   : > { %v4515_v14 = vpop.f32.mrb[32].mxu0 }
 0x26c   : > { %v1187_v15 = vadd.f32 %v4515_v14, %v6065_v12  ;;  %v1178_v16 = vpop.f32.mrb[33].mxu0 }
 0x26d   : > { %v1179_v17 = vadd.f32 %v6065_v12, %v1178_v16  ;;  %v4516_v18 = vpop.f32.mrb[34].mxu0 }
 0x26e   : > { %1250 = vrot.lane.b32.xlu1 %v1187_v15, %s5415_s28  ;;  %v1181_v20 = vpop.f32.mrb[35].mxu0  ;;  %v1190_v22 = vadd.f32 %v4516_v18, %v6065_v12 }
 0x26f   : > { %1242 = vrot.lane.b32.xlu0 %v1179_v17, %s5416_s27  ;;  %v1182_v23 = vadd.f32 %v6065_v12, %v1181_v20 }
 0x272   : > { %1254 = vrot.lane.b32.xlu1 %v1190_v22, %s5417_s24 }
 0x273   : > { %1887 = vrot.lane.b32.xlu0 %v5917_v33, %s5414_s12 }
 0x276   : > { %1885 = vrot.lane.b32.xlu1 %v5907_v26, %s5414_s12 }
 0x277   : > { %1895 = vrot.lane.b32.xlu0 %v5957_v61, %s5414_s12 }
 0x27a   : > { %1889 = vrot.lane.b32.xlu1 %v5927_v40, %s5414_s12 }
 0x27b   : > { %1246 = vrot.lane.b32.xlu0 %v1182_v23, %s5418_s25  ;;  %v4519_v24 = vpop.f32.mrb[36].mxu0 }
 0x27c   : > { %v1203_v25 = vadd.f32 %v4519_v24, %v6065_v12  ;;  %v1194_v27 = vpop.f32.mrb[37].mxu0 }
 0x27d   : > { %v4520_v29 = vpop.f32.mrb[38].mxu0  ;;  %v1195_v30 = vadd.f32 %v6065_v12, %v1194_v27 }
 0x27e   : > { %1891 = vrot.lane.b32.xlu1 %v5937_v47, %s5414_s12  ;;  %v1197_v9 = vpop.f32.mrb[39].mxu0  ;;  %v1206_v31 = vadd.f32 %v4520_v29, %v6065_v12 }
 0x27f   : > { %1266 = vrot.lane.b32.xlu0 %v1203_v25, %s5419_s23  ;;  %v1198_v32 = vadd.f32 %v6065_v12, %v1197_v9 }
 0x282   : > { %1893 = vrot.lane.b32.xlu1 %v5947_v54, %s5414_s12 }
 0x283   : > { %1258 = vrot.lane.b32.xlu0 %v1195_v30, %s5420_s21 }
 0x286   : > { %2289 = vrot.lane.b32.xlu1 %v5882_v13, %s5414_s12 }
 0x28a   : > { %1270 = vrot.lane.b32.xlu1 %v1206_v31, %s5421_s19 }
 0x28b   : > { %v4523_v34 = vpop.f32.mrb[40].mxu0 }
 0x28c   : > { %v1219_v36 = vadd.f32 %v4523_v34, %v6065_v12  ;;  %v1210_v37 = vpop.f32.mrb[41].mxu0 }
 0x28d   : > { %v4524_v38 = vpop.f32.mrb[42].mxu0  ;;  %v1211_v39 = vadd.f32 %v6065_v12, %v1210_v37 }
 0x28e   : > { %1262 = vrot.lane.b32.xlu1 %v1198_v32, %s5422_s9  ;;  %1282 = vrot.lane.b32.xlu0 %v1219_v36, %s7933_s18  ;;  %v1222_v13 = vadd.f32 %v4524_v38, %v6065_v12  ;;  %v1213_v41 = vpop.f32.mrb[43].mxu0  ;;  %s5429_s18 = smov 352  }
 0x28f   : > { %v1214_v44 = vadd.f32 %v6065_v12, %v1213_v41 }
 0x292   : > { %1286 = vrot.lane.b32.xlu1 %v1222_v13, %s7932_s14  ;;  %1274 = vrot.lane.b32.xlu0 %v1211_v39, %s5425_s7  ;;  %s7935_s14 = smov 376  }
 0x296   : > { %1278 = vrot.lane.b32.xlu1 %v1214_v44, %s7934_s26  ;;  %s7944_s26 = smov 360  }
 0x29b   : > { %v4527_v46 = vpop.f32.mrb[44].mxu0 }
 0x29c   : > { %v1235_v48 = vadd.f32 %v4527_v46, %v6065_v12  ;;  %v1226_v50 = vpop.f32.mrb[45].mxu0 }
 0x29d   : > { %v4528_v52 = vpop.f32.mrb[46].mxu0  ;;  %v1227_v55 = vadd.f32 %v6065_v12, %v1226_v50 }
 0x29e   : > { %v1238_v57 = vadd.f32 %v4528_v52, %v6065_v12  ;;  %1298 = vrot.lane.b32.xlu0 %v1235_v48, %s5427_s20  ;;  %v1229_v58 = vpop.f32.mrb[47].mxu0 }
 0x29f   : > { %v1230_v60 = vadd.f32 %v6065_v12, %v1229_v58 }
 0x2a0   : > { %1302 = vrot.lane.b32.xlu1 %v1238_v57, %s7935_s14  ;;  %s7942_s14 = smov 1  }
 0x2a2   : > { %1290 = vrot.lane.b32.xlu0 %v1227_v55, %s5429_s18 }
 0x2a4   : > { %1294 = vrot.lane.b32.xlu1 %v1230_v60, %s7944_s26  ;;  %v6113_v1 = vpop.f32.mrb[16].mxu1  ;;  %s8165_s26 = sld [smem:[#allocation65_spill]] }
 0x2a5   : > { %v6115_v4 = vpop.f32.mrb[17].mxu1 }
 0x2a6   : > { %v6117_v5 = vpop.f32.mrb[18].mxu1 }
 0x2a7   : > { %v6119_v8 = vpop.f32.mrb[19].mxu1 }
 0x2ac   : > { %v6121_v14 = vpop.f32.mrb[20].mxu1 }
 0x2ad   : > { %v6123_v15 = vpop.f32.mrb[21].mxu1 }
 0x2ae   : > { %v6125_v16 = vpop.f32.mrb[22].mxu1 }
 0x2af   : > { %v6127_v12 = vpop.f32.mrb[23].mxu1 }
 0x2b4   : > { %v6129_v17 = vpop.f32.mrb[24].mxu1 }
 0x2b5   : > { %v6131_v18 = vpop.f32.mrb[25].mxu1 }
 0x2b6   : > { %v6133_v20 = vpop.f32.mrb[26].mxu1 }
 0x2b7   : > { %v6135_v22 = vpop.f32.mrb[27].mxu1 }
 0x2bc   : > { %v6137_v23 = vpop.f32.mrb[28].mxu1 }
 0x2bd   : > { %v6139_v24 = vpop.f32.mrb[29].mxu1 }
 0x2be   : > { %v6141_v25 = vpop.f32.mrb[30].mxu1 }
 0x2bf   : > { %v6143_v27 = vpop.f32.mrb[31].mxu1 }
 0x2e0   : > { %v1251_v29 = vpop.permute.xlu1 %1250 }
 0x2e1   : > { %1308 = vrot.lane.b32.xlu0 %v1251_v29, %s7942_s14  ;;  %v1243_v9 = vpop.permute.xlu0 %1242 }
 0x2e4   : > { %v1255_v30 = vpop.permute.xlu1 %1254  ;;  %v6146_v31 = vpop.f32.mrb[32].mxu1 }
 0x2e5   : > { %1310 = vrot.lane.b32.xlu1 %v1255_v30, %s7942_s14  ;;  %1304 = vrot.lane.b32.xlu0 %v1243_v9, %s7942_s14  ;;  %v1888_v32 = vpop.permute.xlu0 %1887  ;;  %v6150_v34 = vpop.f32.mrb[33].mxu1 }
 0x2e6   : > { %v6152_v36 = vpop.f32.mrb[34].mxu1 }
 0x2e7   : > { %v6154_v37 = vpop.f32.mrb[35].mxu1 }
 0x2e8   : > { %v1886_v38 = vpop.permute.xlu1 %1885 }
 0x2e9   : > { %v1896_v39 = vpop.permute.xlu0 %1895  ;;  %4613 = vmatprep.mubr.msk.bf16.mxu1 %vm1095_vm0, %v1886_v38 }
 0x2ea   : > { %4614 = vmatmul.mubr.msk.bf16.gmra.mrb[36].mxu1 %vm1095_vm0, %v1888_v32 }
 0x2ec   : > { %v1890_v13 = vpop.permute.xlu1 %1889 }
 0x2ed   : > { %v1247_v41 = vpop.permute.xlu0 %1246  ;;  %4617 = vmatprep.mubr.msk.bf16.mxu1 %vm1095_vm0, %v1890_v13  ;;  %v6180_v13 = vadd.s32 16, %v5869_v3 }
 0x2ee   : > { %1306 = vrot.lane.b32.xlu1 %v1247_v41, %s7942_s14  ;;  %v6183_v41 = vand.u32 127, %v949_v2  ;;  %v6197_v2 = vadd.s32 8, %v5869_v3 }
 0x2ef   : > { %8042 = vst [vmem:[#allocation27_spill] sm:$0xff] %v6180_v13 }
 0x2f0   : > { %v1892_v44 = vpop.permute.xlu1 %1891  ;;  %vm970_vm2 = vcmp.le.s32.totalorder %v6183_v41, %v6180_v13  ;;  %8044 = vst [vmem:[#allocation29_spill] sm:$0xff] %v6197_v2  ;;  %vm968_vm4 = vcmp.le.s32.totalorder %v6183_v41, %v5869_v3  ;;  %vm969_vm5 = vcmp.le.s32.totalorder %v6183_v41, %v6197_v2  ;;  %vm7968_vm14 = vcmp.le.s32.totalorder %v6183_v41, %v6299_v59 }
 0x2f1   : > { %v1267_v46 = vpop.permute.xlu0 %1266 }
 0x2f2   : > { %1316 = vrot.lane.b32.xlu0 %v1267_v46, %s7942_s14  ;;  %4618 = vmatmul.mubr.msk.bf16.gmra.mrb[40].mxu1 %vm1095_vm0, %v1892_v44  ;;  %v6186_v44 = vadd.s32 2, %v6180_v13 }
 0x2f4   : > { %v1894_v48 = vpop.permute.xlu1 %1893  ;;  %8043 = vst [vmem:[#allocation28_spill] sm:$0xff] %v6186_v44  ;;  %vm1002_vm3 = vcmp.ge.s32.totalorder %v6183_v41, %v6186_v44 }
 0x2f5   : > { %v1259_v50 = vpop.permute.xlu0 %1258  ;;  %4621 = vmatprep.mubr.msk.bf16.mxu1 %vm1095_vm0, %v1894_v48 }
 0x2f6   : > { %1312 = vrot.lane.b32.xlu0 %v1259_v50, %s7942_s14 }
 0x2f8   : > { %v6164_v52 = vpop.permute.xlu1 %2289 }
 0x2f9   : > { %8041 = vst [vmem:[#allocation26_spill] sm:$0xff] %v6164_v52  ;;  %4761 = vmatprep.subr.msk.bf16.mxu0 %vm1095_vm0, %v6164_v52 }
 0x2fa   : > { %4622 = vmatmul.mubr.msk.bf16.gmra.mrb[44].mxu1 %vm1095_vm0, %v1896_v39 }
 0x2fc   : > { %v1271_v55 = vpop.permute.xlu1 %1270 }
 0x2fd   : > { %1318 = vrot.lane.b32.xlu1 %v1271_v55, %s7942_s14 }
 0x300   : > { %v1263_v57 = vpop.permute.xlu1 %1262  ;;  %v1283_v58 = vpop.permute.xlu0 %1282 }
 0x301   : > { %1314 = vrot.lane.b32.xlu1 %v1263_v57, %s7942_s14  ;;  %1324 = vrot.lane.b32.xlu0 %v1283_v58, %s7942_s14 }
 0x304   : > { %v1287_v60 = vpop.permute.xlu1 %1286  ;;  %v1275_v29 = vpop.permute.xlu0 %1274 }
 0x305   : > { %1326 = vrot.lane.b32.xlu1 %v1287_v60, %s7942_s14  ;;  %1320 = vrot.lane.b32.xlu0 %v1275_v29, %s7942_s14 }
 0x308   : > { %v1279_v9 = vpop.permute.xlu1 %1278 }
 0x309   : > { %1322 = vrot.lane.b32.xlu1 %v1279_v9, %s7942_s14  ;;  %v6210_v9 = vadd.s32 2, %v6197_v2 }
 0x30b   : > { %8045 = vst [vmem:[#allocation30_spill] sm:$0xff] %v6210_v9  ;;  %vm1001_vm6 = vcmp.ge.s32.totalorder %v6183_v41, %v6210_v9 }
 0x310   : > { %v1299_v30 = vpop.permute.xlu0 %1298 }
 0x311   : > { %1332 = vrot.lane.b32.xlu0 %v1299_v30, %s7942_s14  ;;  %v6213_v30 = vadd.s32 2, %v5869_v3 }
 0x312   : > { %v1303_v32 = vpop.permute.xlu1 %1302 }
 0x313   : > { %1334 = vrot.lane.b32.xlu1 %v1303_v32, %s7942_s14  ;;  %8046 = vst [vmem:[#allocation31_spill] sm:$0xff] %v6213_v30  ;;  %vm1000_vm7 = vcmp.ge.s32.totalorder %v6183_v41, %v6213_v30 }
 0x314   : > { %v1291_v38 = vpop.permute.xlu0 %1290 }
 0x315   : > { %1328 = vrot.lane.b32.xlu0 %v1291_v38, %s7942_s14 }
 0x316   : > { %v1295_v39 = vpop.permute.xlu1 %1294 }
 0x317   : > { %1330 = vrot.lane.b32.xlu1 %v1295_v39, %s7942_s14  ;;  %s8159_s14 = sld [smem:[#allocation61_spill]] }
 0x353   : > { %v1309_v46 = vpop.permute.xlu0 %1308 }
 0x354   : > { %v1338_v50 = vrot.slane %v1309_v46, 1  ;;  %v1371_v58 = vsel %vm970_vm2, %v1309_v46, 0.0 }
 0x357   : > { %v6188_v48 = vpop.permute.xlu1 %1310  ;;  %v1305_v32 = vpop.permute.xlu0 %1304 }
 0x358   : > { %v7938_v55 = vrot.slane %v6188_v48, 1 }
 0x35a   : > { %v1365_v57 = vsel %vm1352_vm1, %v1338_v50, %v7938_v55 }
 0x35b   : > { %v1387_v60 = vsel %vm1002_vm3, %v1365_v57, 0.0  ;;  %v1336_v57 = vrot.slane %v1305_v32, 1 }
 0x35c   : > { %v1403_v29 = vadd.f32 %v1387_v60, %v1371_v58 }
 0x35e   : > { %v1508_v38 = vadd.f32 %v6113_v1, %v1403_v29  ;;  %v1369_v29 = vsel %vm968_vm4, %v1305_v32, 0.0 }
 0x360   : > { %v1307_v39 = vpop.permute.xlu1 %1306  ;;  %v6220_v46 = vmul.f32 0.125, %v1508_v38 }
 0x361   : > { %v1337_v58 = vrot.slane %v1307_v39, 1  ;;  %v1370_v38 = vsel %vm969_vm5, %v1307_v39, 0.0 }
 0x362   : > { %1582 = vmax.xlane.f32.xlu0 %v6220_v46 }
 0x363   : > { %v1366_v1 = vsel %vm1352_vm1, %v1337_v58, %v1338_v50  ;;  %v1367_v60 = vsel %vm1352_vm1, %v1336_v57, %v1337_v58 }
 0x364   : > { %v1386_v0 = vsel %vm1001_vm6, %v1366_v1, 0.0  ;;  %v1385_v55 = vsel %vm1000_vm7, %v1367_v60, 0.0  ;;  %v4178_v1 = vld [vmem:[%s7910_s2 + $0x1] sm:$0x1] }
 0x365   : > { %v1402_v50 = vadd.f32 %v1386_v0, %v1370_v38  ;;  %v1401_v10 = vadd.f32 %v1385_v55, %v1369_v29  ;;  %v1830_v0 = vpack.i.b16 %v4178_v1, %v4178_v1  ;;  %v6272_v29 = vpop.permute.xlu0 %1316 }
 0x367   : > { %v1503_v58 = vadd.f32 %v6119_v8, %v1402_v50  ;;  %v1500_v7 = vadd.f32 %v6115_v4, %v1401_v10  ;;  %v1835_v8 = vrot.slane %v1830_v0, %v5875_v6  ;;  %v6293_v0 = vadd.s32 24, %v5869_v3 }
 0x369   : > { %v6245_v62 = vmul.f32 0.125, %v1503_v58  ;;  %v6247_v32 = vmul.f32 0.125, %v1500_v7  ;;  %v6263_v7 = vadd.s32 120, %v5869_v3  ;;  %v6282_v58 = vadd.s32 48, %v5869_v3  ;;  %8050 = vst [vmem:[#allocation35_spill] sm:$0xff] %v6293_v0 }
 0x36a   : > { %vm971_vm13 = vcmp.le.s32.totalorder %v6183_v41, %v6293_v0 }
 0x36b   : > { %1580 = vmax.xlane.f32.xlu1 %v6245_v62  ;;  %1578 = vmax.xlane.f32.xlu0 %v6247_v32  ;;  %8047 = vst [vmem:[#allocation32_spill] sm:$0xff] %v6263_v7  ;;  %v6270_v60 = vadd.s32 2, %v6263_v7  ;;  %vm7964_vm8 = vcmp.le.s32.totalorder %v6183_v41, %v6263_v7  ;;  %8049 = vst [vmem:[#allocation34_spill] sm:$0xff] %v6282_v58  ;;  %v6302_v2 = vadd.s32 2, %v6282_v58  ;;  %v6305_v7 = vadd.s32 2, %v6293_v0 }
 0x36c   : > { %vm7969_vm10 = vcmp.le.s32.totalorder %v6183_v41, %v6282_v58 }
 0x36d   : > { %8048 = vst [vmem:[#allocation33_spill] sm:$0xff] %v6270_v60  ;;  %vm7965_vm9 = vcmp.ge.s32.totalorder %v6183_v41, %v6270_v60  ;;  %8052 = vst [vmem:[#allocation37_spill] sm:$0xff] %v6302_v2  ;;  %vm1006_vm11 = vcmp.ge.s32.totalorder %v6183_v41, %v6302_v2  ;;  %vm1003_vm12 = vcmp.ge.s32.totalorder %v6183_v41, %v6305_v7 }
 0x36e   : > { %8053 = vst [vmem:[#allocation38_spill] sm:$0xff] %v6305_v7 }
 0x36f   : > { %v6251_v39 = vpop.permute.xlu1 %1318 }
 0x370   : > { %v7955_v13 = vrot.slane %v6251_v39, 1  ;;  %v8080_v0 = vrot.slane %v6251_v39, 1 }
 0x373   : > { %v6256_v55 = vpop.permute.xlu1 %1314 }
 0x374   : > { %v8058_v45 = vrot.slane %v6256_v55, 1 }
 0x377   : > { %v6259_v10 = vpop.permute.xlu1 %1326 }
 0x37b   : > { %v6265_v4 = vpop.permute.xlu1 %1322 }
 0x37c   : > { %1837 = vrot.lane.b32.xlu1 %v1835_v8, %s5414_s12  ;;  %v1313_v8 = vpop.permute.xlu0 %1312 }
 0x37d   : > { %v1373_v51 = vsel %vm7968_vm14, %v1313_v8, 0.0 }
 0x380   : > { %v6317_v60 = vpop.permute.xlu0 %1324 }
 0x381   : > { %2291 = vrot.lane.b32.xlu0 %v5897_v21, %s5414_s12 }
 0x384   : > { %v6369_v2 = vpop.permute.xlu0 %1320 }
 0x385   : > { %v6276_v38 = vpop.permute.xlu1 %1334 }
 0x386   : > { %v7950_v50 = vrot.slane %v6276_v38, 1  ;;  %v1384_v21 = vsel %vm7964_vm8, %v6276_v38, 0.0 }
 0x388   : > { %v1368_v1 = vsel %vm1352_vm1, %v7950_v50, %v1336_v57  ;;  %v7956_v57 = vrot.slane %v6272_v29, 1  ;;  %v1340_v50 = vrot.slane %v1313_v8, 1  ;;  %v8062_v8 = vrot.slane %v6259_v10, 1 }
 0x389   : > { %v1400_v6 = vsel %vm7965_vm9, %v1368_v1, 0.0  ;;  %v6313_v1 = vadd.s32 2, %v6299_v59 }
 0x38a   : > { %v1416_v9 = vadd.f32 %v1400_v6, %v1384_v21  ;;  %v6325_v21 = vadd.s32 80, %v5869_v3  ;;  %v1375_v6 = vsel %vm7969_vm10, %v6272_v29, 0.0  ;;  %v1363_v58 = vsel %vm1352_vm1, %v1340_v50, %v8058_v45 }
 0x38b   : > { %8054 = vst [vmem:[#allocation39_spill] sm:$0xff] %v6313_v1  ;;  %vm1004_vm15 = vcmp.ge.s32.totalorder %v6183_v41, %v6313_v1 }
 0x38c   : > { %v6310_v30 = vadd.f32 %v6141_v25, %v1416_v9  ;;  %8055 = vst [vmem:[#allocation40_spill] sm:$0xff] %v6325_v21  ;;  %v1361_v25 = vsel %vm1352_vm1, %v7956_v57, %v7955_v13  ;;  %v8056_v9 = vrot.slane %v6188_v48, 1  ;;  %v6348_v13 = vadd.s32 64, %v5869_v3 }
 0x38d   : > { %v6363_v43 = vadd.s32 2, %v6325_v21  ;;  %vm7972_vm8 = vcmp.le.s32.totalorder %v6183_v41, %v6325_v21  ;;  %v1389_v45 = vsel %vm1004_vm15, %v1363_v58, 0.0  ;;  %v7974_v58 = vrot.slane %v6369_v2, 1 }
 0x38e   : > { %v1364_v44 = vsel %vm1352_vm1, %v8056_v9, %v1340_v50  ;;  %8057 = vst [vmem:[#allocation41_spill] sm:$0xff] %v6348_v13  ;;  %v1391_v9 = vsel %vm1006_vm11, %v1361_v25, 0.0  ;;  %v1372_v25 = vsel %vm971_vm13, %v6188_v48, 0.0  ;;  %v6380_v50 = vadd.s32 2, %v6348_v13 }
 0x38f   : > { %v1388_v57 = vsel %vm1003_vm12, %v1364_v44, 0.0  ;;  %8059 = vst [vmem:[#allocation42_spill] sm:$0xff] %v6363_v43  ;;  %v1407_v44 = vadd.f32 %v1391_v9, %v1375_v6  ;;  %vm7973_vm9 = vcmp.ge.s32.totalorder %v6183_v41, %v6363_v43  ;;  %v6394_v9 = vpop.permute.xlu0 %1332  ;;  %v1405_v59 = vadd.f32 %v1389_v45, %v1373_v51  ;;  %v6423_v45 = vpop.permute.xlu1 %1330 }
 0x390   : > { %v1404_v7 = vadd.f32 %v1388_v57, %v1372_v25  ;;  %8060 = vst [vmem:[#allocation43_spill] sm:$0xff] %v6380_v50  ;;  %v8063_v57 = vrot.slane %v6317_v60, 1  ;;  %v1379_v1 = vsel %vm7972_vm8, %v6317_v60, 0.0  ;;  %vm7977_vm14 = vcmp.le.s32.totalorder %v6183_v41, %v6348_v13 }
 0x391   : > { %v1524_v25 = vadd.f32 %v6121_v14, %v1407_v44  ;;  %vm7978_vm10 = vcmp.ge.s32.totalorder %v6183_v41, %v6380_v50  ;;  %v8065_v51 = vrot.slane %v6265_v4, 1  ;;  %v6421_v44 = vadd.s32 2, %v6384_v53 }
 0x392   : > { %v1357_v6 = vsel %vm1352_vm1, %v8063_v57, %v8062_v8  ;;  %v1511_v48 = vadd.f32 %v6117_v5, %v1404_v7  ;;  %v6412_v5 = vadd.s32 96, %v5869_v3  ;;  %v1516_v14 = vadd.f32 %v6123_v15, %v1405_v59 }
 0x393   : > { %v1395_v8 = vsel %vm7973_vm9, %v1357_v6, 0.0  ;;  %v1359_v7 = vsel %vm1352_vm1, %v7974_v58, %v8065_v51  ;;  %8066 = vst [vmem:[#allocation46_spill] sm:$0xff] %v6421_v44  ;;  %v6425_v57 = vmul.f32 0.125, %v1524_v25  ;;  %v1377_v43 = vsel %vm7977_vm14, %v6369_v2, 0.0  ;;  %v6436_v51 = vpop.permute.xlu0 %1328 }
 0x394   : > { %8064 = vst [vmem:[#allocation45_spill] sm:$0xff] %v6412_v5  ;;  %v6427_v6 = vmul.f32 0.125, %v1511_v48  ;;  %v1411_v21 = vadd.f32 %v1395_v8, %v1379_v1  ;;  %vm7984_vm8 = vcmp.le.s32.totalorder %v6183_v41, %v6384_v53  ;;  %v1393_v25 = vsel %vm7978_vm10, %v1359_v7, 0.0 }
 0x395   : > { %vm7986_vm9 = vcmp.ge.s32.totalorder %v6183_v41, %v6421_v44  ;;  %v8067_v59 = vrot.slane %v6276_v38, 1  ;;  %v8068_v15 = vrot.slane %v6394_v9, 1  ;;  %v6453_v8 = vadd.s32 2, %v6412_v5 }
 0x396   : > { %v7981_v7 = vrot.slane %v6436_v51, 1  ;;  %v6456_v58 = vmul.f32 0.125, %v1516_v14  ;;  %v1540_v48 = vadd.f32 %v6129_v17, %v1411_v21  ;;  %v1409_v13 = vadd.f32 %v1393_v25, %v1377_v43 }
 0x397   : > { %v1353_v1 = vsel %vm1352_vm1, %v8068_v15, %v8067_v59  ;;  %8069 = vst [vmem:[#allocation47_spill] sm:$0xff] %v6453_v8  ;;  %v1383_v38 = vsel %vm7984_vm8, %v6394_v9, 0.0  ;;  %vm7979_vm14 = vcmp.le.s32.totalorder %v6183_v41, %v6412_v5  ;;  %vm7980_vm10 = vcmp.ge.s32.totalorder %v6183_v41, %v6453_v8 }
 0x398   : > { %v1399_v50 = vsel %vm7986_vm9, %v1353_v1, 0.0  ;;  %v8070_v17 = vrot.slane %v6423_v45, 1  ;;  %v6477_v21 = vmul.f32 0.125, %v1540_v48  ;;  %v1532_v14 = vadd.f32 %v6131_v18, %v1409_v13 }
 0x399   : > { %v1415_v25 = vadd.f32 %v1399_v50, %v1383_v38  ;;  %v1381_v59 = vsel %vm7979_vm14, %v6436_v51, 0.0  ;;  %v6502_v38 = vadd.s32 40, %v5869_v3  ;;  %v8079_v44 = vrot.slane %v6369_v2, 1 }
 0x39a   : > { %v1355_v43 = vsel %vm1352_vm1, %v7981_v7, %v8070_v17  ;;  %v6488_v1 = vmul.f32 0.125, %v1532_v14 }
 0x39b   : > { %v1397_v15 = vsel %vm7980_vm10, %v1355_v43, 0.0  ;;  %v1556_v17 = vadd.f32 %v6137_v23, %v1415_v25  ;;  %8071 = vst [vmem:[#allocation48_spill] sm:$0xff] %v6502_v38  ;;  %vm7992_vm14 = vcmp.le.s32.totalorder %v6183_v41, %v6502_v38 }
 0x39c   : > { %v1413_v48 = vadd.f32 %v1397_v15, %v1381_v59  ;;  %v6516_v59 = vadd.s32 2, %v6502_v38  ;;  %v1360_v38 = vsel %vm1352_vm1, %v8080_v0, %v8079_v44  ;;  %v8083_v0 = vrot.slane %v6317_v60, 1 }
 0x39d   : > { %v6492_v18 = vmul.f32 0.125, %v1556_v17  ;;  %v8075_v17 = vrot.slane %v6272_v29, 1  ;;  %v1374_v29 = vsel %vm7992_vm14, %v6256_v55, 0.0  ;;  %v8084_v44 = vrot.slane %v6265_v4, 1 }
 0x39e   : > { %v1548_v13 = vadd.f32 %v6139_v24, %v1413_v48  ;;  %v6513_v24 = vadd.s32 56, %v5869_v3  ;;  %8073 = vst [vmem:[#allocation50_spill] sm:$0xff] %v6516_v59  ;;  %vm7993_vm10 = vcmp.ge.s32.totalorder %v6183_v41, %v6516_v59  ;;  %v8076_v48 = vrot.slane %v6256_v55, 1 }
 0x3a0   : > { %1590 = vmax.xlane.f32.xlu1 %v6425_v57  ;;  %1584 = vmax.xlane.f32.xlu0 %v6427_v6  ;;  %v6496_v50 = vmul.f32 0.125, %v1548_v13  ;;  %8072 = vst [vmem:[#allocation49_spill] sm:$0xff] %v6513_v24  ;;  %v1362_v13 = vsel %vm1352_vm1, %v8076_v48, %v8075_v17  ;;  %v6534_v7 = vadd.s32 2, %v6513_v24  ;;  %vm7996_vm8 = vcmp.le.s32.totalorder %v6183_v41, %v6513_v24 }
 0x3a1   : > { %v1390_v17 = vsel %vm7993_vm10, %v1362_v13, 0.0  ;;  %v6552_v48 = vadd.s32 88, %v5869_v3  ;;  %v1376_v13 = vsel %vm7996_vm8, %v6251_v39, 0.0 }
 0x3a2   : > { %8077 = vst [vmem:[#allocation52_spill] sm:$0xff] %v6534_v7  ;;  %vm7997_vm9 = vcmp.ge.s32.totalorder %v6183_v41, %v6534_v7  ;;  %v1406_v52 = vadd.f32 %v1390_v17, %v1374_v29  ;;  %v1358_v29 = vsel %vm1352_vm1, %v8084_v44, %v8083_v0  ;;  %v6604_v44 = vadd.s32 104, %v5869_v3 }
 0x3a3   : > { %8078 = vst [vmem:[#allocation53_spill] sm:$0xff] %v6552_v48  ;;  %v1392_v59 = vsel %vm7997_vm9, %v1360_v38, 0.0  ;;  %v6585_v39 = vadd.s32 2, %v6552_v48  ;;  %vm8001_vm8 = vcmp.le.s32.totalorder %v6183_v41, %v6552_v48 }
 0x3a4   : > { %1586 = vmax.xlane.f32.xlu1 %v6456_v58  ;;  %v1519_v24 = vadd.f32 %v6127_v12, %v1406_v52  ;;  %v1408_v7 = vadd.f32 %v1392_v59, %v1376_v13  ;;  %8086 = vst [vmem:[#allocation57_spill] sm:$0xff] %v6604_v44  ;;  %v8087_v12 = vrot.slane %v6436_v51, 1  ;;  %v8088_v52 = vrot.slane %v6259_v10, 1 }
 0x3a5   : > { %8085 = vst [vmem:[#allocation56_spill] sm:$0xff] %v6585_v39  ;;  %vm1011_vm9 = vcmp.ge.s32.totalorder %v6183_v41, %v6585_v39  ;;  %v6626_v51 = vadd.s32 2, %v6604_v44 }
 0x3a6   : > { %v6614_v59 = vmul.f32 0.125, %v1519_v24  ;;  %v1527_v13 = vadd.f32 %v6125_v16, %v1408_v7  ;;  %v8091_v7 = vrot.slane %v6423_v45, 1 }
 0x3a7   : > { %8089 = vst [vmem:[#allocation58_spill] sm:$0xff] %v6626_v51 }
 0x3a8   : > { %1598 = vmax.xlane.f32.xlu1 %v6477_v21 }
 0x3ac   : > { %1594 = vmax.xlane.f32.xlu1 %v6488_v1 }
 0x3b0   : > { %1606 = vmax.xlane.f32.xlu1 %v6492_v18 }
 0x3b4   : > { %1602 = vmax.xlane.f32.xlu1 %v6496_v50 }
 0x3b6   : > { %2293 = vrot.lane.b32.xlu0 %v5909_v28, %s5414_s12  ;;  %v6521_v28 = vadd.s32 72, %v5869_v3 }
 0x3b8   : > { %8074 = vst [vmem:[#allocation51_spill] sm:$0xff] %v6521_v28  ;;  %v6563_v55 = vadd.s32 2, %v6521_v28  ;;  %vm8000_vm14 = vcmp.le.s32.totalorder %v6183_v41, %v6521_v28  ;;  %v1380_v28 = vsel %vm8001_vm8, %v6259_v10, 0.0  ;;  %vm1013_vm8 = vcmp.ge.s32.totalorder %v6183_v41, %v6626_v51 }
 0x3b9   : > { %v1378_v60 = vsel %vm8000_vm14, %v6265_v4, 0.0  ;;  %v1356_v4 = vsel %vm1352_vm1, %v8088_v52, %v8087_v12  ;;  %v6628_v12 = vmul.f32 0.125, %v1527_v13  ;;  %vm981_vm14 = vcmp.le.s32.totalorder %v6183_v41, %v6604_v44 }
 0x3ba   : > { %8081 = vst [vmem:[#allocation54_spill] sm:$0xff] %v6563_v55  ;;  %vm1009_vm10 = vcmp.ge.s32.totalorder %v6183_v41, %v6563_v55  ;;  %v1396_v55 = vsel %vm1011_vm9, %v1356_v4, 0.0  ;;  %v8090_v10 = vrot.slane %v6394_v9, 1  ;;  %v6657_v4 = vmul.f32 0.125, %v6310_v30 }
 0x3bb   : > { %v1394_v0 = vsel %vm1009_vm10, %v1358_v29, 0.0  ;;  %v1412_v16 = vadd.f32 %v1396_v55, %v1380_v28  ;;  %v1382_v28 = vsel %vm981_vm14, %v6423_v45, 0.0 }
 0x3bc   : > { %v1410_v29 = vadd.f32 %v1394_v0, %v1378_v60  ;;  %v1354_v60 = vsel %vm1352_vm1, %v8091_v7, %v8090_v10 }
 0x3bd   : > { %v6504_v23 = vpop.f32.mrb[36].mxu1  ;;  %v1398_v55 = vsel %vm1013_vm8, %v1354_v60, 0.0 }
 0x3be   : > { %v6506_v43 = vpop.f32.mrb[37].mxu1  ;;  %v1535_v24 = vadd.f32 %v6135_v22, %v1410_v29  ;;  %v1543_v22 = vadd.f32 %v6133_v20, %v1412_v16  ;;  %v1414_v52 = vadd.f32 %v1398_v55, %v1382_v28 }
 0x3bf   : > { %v6508_v14 = vpop.f32.mrb[38].mxu1 }
 0x3c0   : > { %v6510_v25 = vpop.f32.mrb[39].mxu1  ;;  %v6642_v0 = vmul.f32 0.125, %v1535_v24  ;;  %v6653_v9 = vmul.f32 0.125, %v1543_v22  ;;  %v1551_v20 = vadd.f32 %v6143_v27, %v1414_v52 }
 0x3c2   : > { %v6661_v13 = vmul.f32 0.125, %v1551_v20 }
 0x3c5   : > { %v6523_v15 = vpop.f32.mrb[40].mxu1 }
 0x3c6   : > { %v6536_v5 = vpop.f32.mrb[41].mxu1 }
 0x3c7   : > { %v6538_v8 = vpop.f32.mrb[42].mxu1 }
 0x3c8   : > { %v6546_v53 = vpop.f32.mrb[43].mxu1 }
 0x3cd   : > { %v6574_v2 = vpop.f32.mrb[44].mxu1 }
 0x3ce   : > { %8082 = vst [vmem:[#allocation55_spill] sm:$0xff] %v6574_v2  ;;  %v6587_v17 = vpop.f32.mrb[45].mxu1 }
 0x3cf   : > { %v6589_v38 = vpop.f32.mrb[46].mxu1 }
 0x3d0   : > { %v6596_v2 = vpop.f32.mrb[47].mxu1 }
 0x3d5   : > { %1588 = vmax.xlane.f32.xlu0 %v6614_v59 }
 0x3d9   : > { %1592 = vmax.xlane.f32.xlu0 %v6628_v12 }
 0x3dd   : > { %1596 = vmax.xlane.f32.xlu0 %v6642_v0 }
 0x3e1   : > { %1600 = vmax.xlane.f32.xlu0 %v6653_v9 }
 0x3e5   : > { %1608 = vmax.xlane.f32.xlu0 %v6657_v4 }
 0x3e9   : > { %1604 = vmax.xlane.f32.xlu0 %v6661_v13 }
 0x3ef   : > { %v1583_v45 = vpop.xlane.xlu0 %1582 }
 0x3f0   : > { %v1612_v29 = vsub.f32 %v6220_v46, %v1583_v45 }
 0x3f2   : > { %v1630_v24 = vmul.f32 1.442695, %v1612_v29 }
 0x3f4   : > { %5007 = vpow2.f32 %v1630_v24 }
 0x3f8   : > { %v1581_v16 = vpop.xlane.xlu1 %1580  ;;  %v1579_v10 = vpop.xlane.xlu0 %1578 }
 0x3f9   : > { %v1611_v7 = vsub.f32 %v6245_v62, %v1581_v16  ;;  %v1610_v30 = vsub.f32 %v6247_v32, %v1579_v10 }
 0x3fb   : > { %v1628_v60 = vmul.f32 1.442695, %v1611_v7  ;;  %v1626_v22 = vmul.f32 1.442695, %v1610_v30 }
 0x3fc   : > { %v6678_v62 = vpop.permute.xlu1 %1837  ;;  %v6680_v46 = vpop.permute.xlu0 %2291 }
 0x3fd   : > { %5009 = vpow2.f32 %v1628_v60 }
 0x3fe   : > { %v6667_v27 = vpop.eup %5007  ;;  %5011 = vpow2.f32 %v1626_v22 }
 0x3ff   : > { %1662 = vadd.xlane.f32.xlu0 %v6667_v27 }
 0x407   : > { %v6670_v28 = vpop.eup %5009 }
 0x408   : > { %v6672_v55 = vpop.eup %5011  ;;  %1660 = vadd.xlane.f32.xlu1 %v6670_v28 }
 0x409   : > { %1658 = vadd.xlane.f32.xlu0 %v6672_v55 }
 0x419   : > { %2295 = vrot.lane.b32.xlu1 %v5919_v35, %s5414_s12 }
 0x42d   : > { %v1591_v32 = vpop.xlane.xlu1 %1590  ;;  %v1585_v52 = vpop.xlane.xlu0 %1584 }
 0x42e   : > { %v1613_v20 = vsub.f32 %v6427_v6, %v1585_v52 }
 0x430   : > { %v1632_v45 = vmul.f32 1.442695, %v1613_v20 }
 0x431   : > { %v1587_v29 = vpop.xlane.xlu1 %1586  ;;  %v6692_v6 = vpop.permute.xlu0 %2293 }
 0x432   : > { %v1614_v24 = vsub.f32 %v6456_v58, %v1587_v29  ;;  %5013 = vpow2.f32 %v1632_v45  ;;  %v1616_v58 = vsub.f32 %v6425_v57, %v1591_v32 }
 0x434   : > { %v1634_v16 = vmul.f32 1.442695, %v1614_v24  ;;  %v1638_v22 = vmul.f32 1.442695, %v1616_v58 }
 0x435   : > { %v1599_v7 = vpop.xlane.xlu1 %1598 }
 0x436   : > { %5015 = vpow2.f32 %v1634_v16  ;;  %v1620_v29 = vsub.f32 %v6477_v21, %v1599_v7 }
 0x437   : > { %5017 = vpow2.f32 %v1638_v22 }
 0x438   : > { %v1646_v48 = vmul.f32 1.442695, %v1620_v29 }
 0x439   : > { %v1595_v30 = vpop.xlane.xlu1 %1594 }
 0x43a   : > { %v1618_v39 = vsub.f32 %v6488_v1, %v1595_v30 }
 0x43c   : > { %v6684_v10 = vpop.eup %5013  ;;  %v1642_v58 = vmul.f32 1.442695, %v1618_v39 }
 0x43d   : > { %1664 = vadd.xlane.f32.xlu0 %v6684_v10  ;;  %v1607_v20 = vpop.xlane.xlu1 %1606 }
 0x43e   : > { %v1624_v16 = vsub.f32 %v6492_v18, %v1607_v20 }
 0x440   : > { %v6687_v35 = vpop.eup %5015  ;;  %v1654_v57 = vmul.f32 1.442695, %v1624_v16 }
 0x441   : > { %1666 = vadd.xlane.f32.xlu1 %v6687_v35  ;;  %v1603_v21 = vpop.xlane.xlu1 %1602 }
 0x442   : > { %v1622_v18 = vsub.f32 %v6496_v50, %v1603_v21 }
 0x444   : > { %v1650_v39 = vmul.f32 1.442695, %v1622_v18  ;;  %v1842_v18 = vadd.bf16 %v6678_v62, %v5907_v26  ;;  %v4196_v26 = vld [vmem:[%s7912_s4 + $0x1] ss:$0 sm:$0xff] }
 0x453   : > { %2297 = vrot.lane.b32.xlu0 %v5929_v42, %s5414_s12 }
 0x462   : > { %v1589_v60 = vpop.xlane.xlu0 %1588 }
 0x463   : > { %v1615_v52 = vsub.f32 %v6614_v59, %v1589_v60 }
 0x465   : > { %v1636_v42 = vmul.f32 1.442695, %v1615_v52 }
 0x466   : > { %v1593_v45 = vpop.xlane.xlu0 %1592 }
 0x467   : > { %v1617_v24 = vsub.f32 %v6628_v12, %v1593_v45  ;;  %v6701_v12 = vpop.eup %5017 }
 0x469   : > { %v1640_v44 = vmul.f32 1.442695, %v1617_v24 }
 0x46a   : > { %v1597_v51 = vpop.xlane.xlu0 %1596 }
 0x46b   : > { %5019 = vpow2.f32 %v1640_v44  ;;  %v1619_v59 = vsub.f32 %v6642_v0, %v1597_v51 }
 0x46c   : > { %5021 = vpow2.f32 %v1636_v42 }
 0x46d   : > { %5023 = vpow2.f32 %v1646_v48  ;;  %v1644_v7 = vmul.f32 1.442695, %v1619_v59 }
 0x46e   : > { %v1601_v32 = vpop.xlane.xlu0 %1600  ;;  %5025 = vpow2.f32 %v1654_v57 }
 0x46f   : > { %5027 = vpow2.f32 %v1642_v58  ;;  %v1621_v22 = vsub.f32 %v6653_v9, %v1601_v32  ;;  %v1840_v32 = vadd.bf16 %v6678_v62, %v5880_v11 }
 0x470   : > { %5029 = vpow2.f32 %v1644_v7 }
 0x471   : > { %v1648_v50 = vmul.f32 1.442695, %v1621_v22  ;;  %v2031_v22 = vadd.f32 %v6152_v36, %v4196_v26  ;;  %v2060_v36 = vadd.f32 %v6523_v15, %v4196_v26 }
 0x472   : > { %v1609_v60 = vpop.xlane.xlu0 %1608  ;;  %1670 = vadd.xlane.f32.xlu0 %v6701_v12 }
 0x473   : > { %v1625_v1 = vsub.f32 %v6657_v4, %v1609_v60  ;;  %v1844_v60 = vadd.bf16 %v6678_v62, %v5927_v40  ;;  %v1847_v40 = vadd.bf16 %v6678_v62, %v5957_v61  ;;  %v2044_v61 = vadd.f32 %v6504_v23, %v4196_v26 }
 0x474   : > { %v2068_v23 = vadd.f32 %v4196_v26, %v6587_v17 }
 0x475   : > { %v6707_v44 = vpop.eup %5019  ;;  %v1656_v51 = vmul.f32 1.442695, %v1625_v1 }
 0x476   : > { %v6709_v48 = vpop.eup %5021  ;;  %1672 = vadd.xlane.f32.xlu1 %v6707_v44  ;;  %v1605_v0 = vpop.xlane.xlu0 %1604 }
 0x477   : > { %5031 = vpow2.f32 %v1656_v51  ;;  %1668 = vadd.xlane.f32.xlu0 %v6709_v48  ;;  %v1623_v9 = vsub.f32 %v6661_v13, %v1605_v0  ;;  %v6714_v30 = vpop.eup %5023 }
 0x478   : > { %v6716_v52 = vpop.eup %5025  ;;  %5033 = vpow2.f32 %v1650_v39 }
 0x479   : > { %5035 = vpow2.f32 %v1648_v50  ;;  %v1652_v4 = vmul.f32 1.442695, %v1623_v9  ;;  %v6720_v20 = vpop.eup %5027 }
 0x47a   : > { %1678 = vadd.xlane.f32.xlu1 %v6714_v30  ;;  %v6723_v45 = vpop.eup %5029 }
 0x47b   : > { %1686 = vadd.xlane.f32.xlu0 %v6716_v52  ;;  %5037 = vpow2.f32 %v1652_v4 }
 0x47e   : > { %1674 = vadd.xlane.f32.xlu1 %v6720_v20 }
 0x481   : > { %v6725_v29 = vpop.eup %5031 }
 0x482   : > { %1676 = vadd.xlane.f32.xlu1 %v6723_v45  ;;  %1688 = vadd.xlane.f32.xlu0 %v6725_v29  ;;  %v6729_v13 = vpop.eup %5033 }
 0x483   : > { %v6731_v24 = vpop.eup %5035 }
 0x485   : > { %v6735_v16 = vpop.eup %5037 }
 0x486   : > { %1680 = vadd.xlane.f32.xlu1 %v6731_v24  ;;  %1682 = vadd.xlane.f32.xlu0 %v6729_v13 }
 0x48a   : > { %1684 = vadd.xlane.f32.xlu1 %v6735_v16 }
 0x48c   : > { %v1663_v42 = vpop.xlane.xlu0 %1662 }
 0x495   : > { %v1661_v57 = vpop.xlane.xlu1 %1660 }
 0x496   : > { %5039 = vrcp.f32 %v1661_v57  ;;  %v1659_v59 = vpop.xlane.xlu0 %1658 }
 0x497   : > { %5041 = vrcp.f32 %v1659_v59 }
 0x498   : > { %5043 = vrcp.f32 %v1663_v42 }
 0x49b   : > { %2299 = vrot.lane.b32.xlu1 %v5939_v49, %s5414_s12  ;;  %v1841_v49 = vadd.bf16 %v6678_v62, %v5895_v19  ;;  %v1846_v19 = vadd.bf16 %v6678_v62, %v5947_v54  ;;  %v2028_v54 = vadd.f32 %v6146_v31, %v4196_v26  ;;  %v2052_v31 = vadd.f32 %v4196_v26, %v6536_v5  ;;  %v8095_v5 = vld [vmem:[#allocation55_spill] sm:$0xff] }
 0x49c   : > { %2301 = vrot.lane.b32.xlu0 %v5949_v56, %s5414_s12 }
 0x49f   : > { %2265 = vrot.lane.b32.xlu1 %v1840_v32, %s5414_s12 }
 0x4a0   : > { %v5040_v58 = vpop.eup %5039  ;;  %2303 = vrot.lane.b32.xlu0 %v5959_v63, %s5414_s12  ;;  %v1843_v63 = vadd.bf16 %v6678_v62, %v5917_v33  ;;  %v2020_v33 = vadd.f32 %v4196_v26, %v6150_v34  ;;  %v2039_v34 = vadd.f32 %v4196_v26, %v6510_v25  ;;  %v2063_v25 = vadd.f32 %v6538_v8, %v4196_v26 }
 0x4a1   : > { %v5042_v21 = vpop.eup %5041  ;;  %v1707_v7 = vmul.f32 %v5040_v58, %v6670_v28  ;;  %v1845_v28 = vadd.bf16 %v6678_v62, %v5937_v47  ;;  %v2036_v47 = vadd.f32 %v4196_v26, %v6506_v43  ;;  %v2055_v43 = vadd.f32 %v4196_v26, %v6546_v53 }
 0x4a2   : > { %v1706_v56 = vmul.f32 %v5042_v21, %v6672_v55  ;;  %v2023_v55 = vadd.f32 %v4196_v26, %v6154_v37  ;;  %v2047_v37 = vadd.f32 %v6508_v14, %v4196_v26  ;;  %v2076_v14 = vadd.f32 %v8095_v5, %v4196_v26  ;;  %v5044_v8 = vpop.eup %5043 }
 0x4a3   : > { %2269 = vrot.lane.b32.xlu1 %v1842_v18, %s5414_s12  ;;  %v2071_v62 = vadd.f32 %v4196_v26, %v6596_v2  ;;  %v2079_v53 = vadd.f32 %v6589_v38, %v4196_v26  ;;  %v1708_v1 = vmul.f32 %v5044_v8, %v6667_v27  ;;  %v8098_v2 = vld [vmem:[#allocation26_spill] sm:$0xff]  ;;  %v2333_v38 = vsel %vm1095_vm0, %v6680_v46, 0 }
 0x4a4   : > { %2267 = vrot.lane.b32.xlu0 %v1841_v49, %s5414_s12  ;;  %v1722_v11 = vpack.c.bf16 %v1707_v7, %v1706_v56  ;;  %v2330_v0 = vsel %vm1095_vm0, %v8098_v2, 0  ;;  %v2336_v27 = vsel %vm1095_vm0, %v6692_v6, 0 }
 0x4a6   : > { %4577 = vmatprep.mubr.bf16.mxu0 %v1722_v11 }
 0x4a7   : > { %2273 = vrot.lane.b32.xlu1 %v1844_v60, %s5414_s12 }
 0x4a8   : > { %2271 = vrot.lane.b32.xlu0 %v1843_v63, %s5414_s12 }
 0x4ab   : > { %2277 = vrot.lane.b32.xlu1 %v1846_v19, %s5414_s12 }
 0x4ac   : > { %2275 = vrot.lane.b32.xlu0 %v1845_v28, %s5414_s12 }
 0x4af   : > { %2083 = vrot.lane.b32.xlu1 %v2020_v33, %s5416_s27  ;;  %s8093_s27 = smov 328  }
 0x4b0   : > { %2279 = vrot.lane.b32.xlu0 %v1847_v40, %s5414_s12 }
 0x4b3   : > { %2091 = vrot.lane.b32.xlu1 %v2028_v54, %s5415_s28  ;;  %s8092_s28 = smov 336  }
 0x4b4   : > { %2087 = vrot.lane.b32.xlu0 %v2023_v55, %s5418_s25  ;;  %s8096_s25 = smov 360  }
 0x4b7   : > { %2099 = vrot.lane.b32.xlu1 %v2036_v47, %s5420_s21  ;;  %s8164_s21 = sshll.u32 %s5712_s29, 7 }
 0x4b8   : > { %2095 = vrot.lane.b32.xlu0 %v2031_v22, %s5417_s24  ;;  %s8094_s24 = smov 344  }
 0x4bb   : > { %2107 = vrot.lane.b32.xlu1 %v2044_v61, %s5419_s23  ;;  %s8097_s23 = smov 376  }
 0x4bc   : > { %2103 = vrot.lane.b32.xlu0 %v2039_v34, %s5422_s9  ;;  %s8158_s9 = sld [smem:[#allocation60_spill]] }
 0x4bf   : > { %2115 = vrot.lane.b32.xlu1 %v2052_v31, %s5425_s7 }
 0x4c0   : > { %2111 = vrot.lane.b32.xlu0 %v2047_v37, %s5421_s19  ;;  %s7796_s19 = scalar_lea.vmem [#allocation10], %s8164_s21 }
 0x4c3   : > { %2123 = vrot.lane.b32.xlu1 %v2060_v36, %s8092_s28 }
 0x4c4   : > { %2119 = vrot.lane.b32.xlu0 %v2055_v43, %s8093_s27  ;;  %s8161_s27 = sld [smem:[#allocation62_spill]] }
 0x4c7   : > { %2131 = vrot.lane.b32.xlu1 %v2068_v23, %s5429_s18  ;;  %s4012_s18 = sshll.u32 %s7796_s19, 4  ;;  %s7861_s18 = int_to_ptr.vmem [resolvable:$true] %s4012_s18 }
 0x4c8   : > { %2127 = vrot.lane.b32.xlu0 %v2063_v25, %s8094_s24  ;;  %s5432_s24 = smov [#allocation10]  }
 0x4ca   : > { %v1665_v15 = vpop.xlane.xlu0 %1664 }
 0x4cb   : > { %2139 = vrot.lane.b32.xlu1 %v2076_v14, %s5427_s20  ;;  %5045 = vrcp.f32 %v1665_v15  ;;  %s8099_s20 = smov 1  }
 0x4cc   : > { %2135 = vrot.lane.b32.xlu0 %v2071_v62, %s8096_s25  ;;  %s5333_s25 = sshll.u32 %s5432_s24, 4  ;;  %s5334_s25 = int_to_ptr.vmem [resolvable:$false] %s5333_s25 }
 0x4cd   : > { %p5336_p12 = scmp.lt.s32.totalorder %s7861_s18, %s5334_s25 }
 0x4ce   : > { %v2298_v9 = vpop.permute.xlu0 %2297 }
 0x4cf   : > { %v2342_v4 = vsel %vm1095_vm0, %v2298_v9, 0 }
 0x4d0   : > { %2143 = vrot.lane.b32.xlu0 %v2079_v53, %s8097_s23  ;;  %s8162_s23 = sld [smem:[#allocation63_spill]] }
 0x4d5   : > { %v5046_v17 = vpop.eup %5045 }
 0x4d6   : > { %v1709_v51 = vmul.f32 %v5046_v17, %v6684_v10  ;;  %v2296_v10 = vpop.permute.xlu1 %2295 }
 0x4d7   : > { %v2339_v50 = vsel %vm1095_vm0, %v2296_v10, 0 }
 0x4d8   : > { %v1723_v39 = vpack.c.bf16 %v1709_v51, %v1708_v1 }
 0x4da   : > { %4578 = vmatmul.mubr.bf16.vlgmr.msra.gmra.mrb[48].mxu0 %v1723_v39 }
 0x4db   : > { %4626 = vmatpush3.bf16.xpose.msra.mxu0 %v2330_v0 }
 0x4dc   : > { %4762 = vmatprep.subr.msk.bf16.mxu0 %vm1095_vm0, %v6680_v46  ;;  %v1667_v46 = vpop.xlane.xlu1 %1666 }
 0x4e3   : > { %4628 = vmatpush3.bf16.xpose.msra.mxu0 %v2333_v38 }
 0x4e4   : > { %4763 = vmatprep.subr.msk.bf16.mxu0 %vm1095_vm0, %v6692_v6 }
 0x4eb   : > { %4630 = vmatpush3.bf16.xpose.msra.mxu0 %v2336_v27 }
 0x4ec   : > { %4764 = vmatprep.subr.msk.bf16.mxu0 %vm1095_vm0, %v2296_v10 }
 0x4f3   : > { %4632 = vmatpush3.bf16.xpose.msra.mxu0 %v2339_v50 }
 0x4f4   : > { %4765 = vmatprep.subr.msk.bf16.mxu0 %vm1095_vm0, %v2298_v9 }
 0x4fb   : > { %4634 = vmatpush3.bf16.xpose.msra.mxu0 %v2342_v4 }
 0x4ff   : > { %v1671_v42 = vpop.xlane.xlu0 %1670 }
 0x500   : > { %5047 = vrcp.f32 %v1671_v42 }
 0x501   : > { %5049 = vrcp.f32 %v1667_v46 }
 0x503   : > { %v1673_v57 = vpop.xlane.xlu1 %1672 }
 0x504   : > { %5051 = vrcp.f32 %v1673_v57  ;;  %v1669_v6 = vpop.xlane.xlu0 %1668 }
 0x505   : > { %5053 = vrcp.f32 %v1669_v6 }
 0x507   : > { %v1679_v59 = vpop.xlane.xlu1 %1678 }
 0x508   : > { %v1687_v32 = vpop.xlane.xlu0 %1686 }
 0x50a   : > { %v5048_v21 = vpop.eup %5047 }
 0x50b   : > { %v1675_v58 = vpop.xlane.xlu1 %1674  ;;  %v5050_v18 = vpop.eup %5049  ;;  %v1712_v60 = vmul.f32 %v5048_v21, %v6701_v12 }
 0x50c   : > { %5055 = vrcp.f32 %v1675_v58  ;;  %v1710_v19 = vmul.f32 %v5050_v18, %v6687_v35 }
 0x50e   : > { %v5052_v7 = vpop.eup %5051 }
 0x50f   : > { %v5054_v49 = vpop.eup %5053  ;;  %v1677_v56 = vpop.xlane.xlu1 %1676  ;;  %v1713_v63 = vmul.f32 %v5052_v7, %v6707_v44 }
 0x510   : > { %v1689_v11 = vpop.xlane.xlu0 %1688  ;;  %5057 = vrcp.f32 %v1677_v56  ;;  %v1711_v26 = vmul.f32 %v5054_v49, %v6709_v48  ;;  %v8100_v49 = vld [vmem:[#allocation18_spill] sm:$0xff]  ;;  %v8101_v56 = vld [vmem:[#allocation19_spill] sm:$0xff] }
 0x511   : > { %v1725_v28 = vpack.c.bf16 %v1713_v63, %v1712_v60  ;;  %5059 = vrcp.f32 %v1679_v59  ;;  %v8103_v60 = vld [vmem:[#allocation20_spill] sm:$0xff] }
 0x512   : > { %v1724_v33 = vpack.c.bf16 %v1711_v26, %v1710_v19 }
 0x513   : > { %v1681_v40 = vpop.xlane.xlu1 %1680 }
 0x514   : > { %v1683_v54 = vpop.xlane.xlu0 %1682  ;;  %5061 = vrcp.f32 %v1681_v40  ;;  %4581 = vmatprep.mubr.bf16.mxu0 %v1724_v33 }
 0x515   : > { %4582 = vmatmul.mubr.bf16.gmra.mrb[52].mxu0 %v1725_v28  ;;  %5063 = vrcp.f32 %v1683_v54 }
 0x516   : > { %5065 = vrcp.f32 %v1689_v11  ;;  %v5056_v12 = vpop.eup %5055  ;;  %v8102_v11 = vld [vmem:[#allocation21_spill] sm:$0xff] }
 0x517   : > { %v1685_v55 = vpop.xlane.xlu1 %1684  ;;  %v1714_v48 = vmul.f32 %v5056_v12, %v6720_v20 }
 0x518   : > { %v2302_v47 = vpop.permute.xlu0 %2301  ;;  %5067 = vrcp.f32 %v1685_v55 }
 0x519   : > { %5069 = vrcp.f32 %v1687_v32  ;;  %v2348_v51 = vsel %vm1095_vm0, %v2302_v47, 0 }
 0x51a   : > { %v5058_v44 = vpop.eup %5057 }
 0x51b   : > { %v2300_v22 = vpop.permute.xlu1 %2299  ;;  %v1715_v61 = vmul.f32 %v5058_v44, %v6723_v45  ;;  %v5060_v34 = vpop.eup %5059 }
 0x51c   : > { %v2304_v35 = vpop.permute.xlu0 %2303  ;;  %4766 = vmatprep.subr.msk.bf16.mxu0 %vm1095_vm0, %v2300_v22  ;;  %v2345_v31 = vsel %vm1095_vm0, %v2300_v22, 0  ;;  %v1716_v25 = vmul.f32 %v5060_v34, %v6714_v30 }
 0x51d   : > { %4636 = vmatpush3.bf16.xpose.msra.mxu0 %v2345_v31  ;;  %v1726_v37 = vpack.c.bf16 %v1715_v61, %v1714_v48 }
 0x51e   : > { %v5062_v36 = vpop.eup %5061  ;;  %4767 = vmatprep.subr.msk.bf16.mxu0 %vm1095_vm0, %v2302_v47 }
 0x51f   : > { %v2266_v43 = vpop.permute.xlu1 %2265  ;;  %4585 = vmatprep.mubr.bf16.mxu0 %v1726_v37  ;;  %v1717_v5 = vmul.f32 %v5062_v36, %v6731_v24  ;;  %v5064_v20 = vpop.eup %5063 }
 0x520   : > { %v2268_v23 = vpop.permute.xlu0 %2267  ;;  %v5066_v14 = vpop.eup %5065  ;;  %v1718_v8 = vmul.f32 %v5064_v20, %v6729_v13 }
 0x521   : > { %v1727_v45 = vpack.c.bf16 %v1717_v5, %v1716_v25  ;;  %v1721_v30 = vmul.f32 %v5066_v14, %v6725_v29 }
 0x522   : > { %v5068_v62 = vpop.eup %5067 }
 0x523   : > { %v2270_v15 = vpop.permute.xlu1 %2269  ;;  %4586 = vmatmul.mubr.bf16.gmra.mrb[56].mxu0 %v1727_v45  ;;  %v1719_v17 = vmul.f32 %v5068_v62, %v6735_v16  ;;  %v5070_v1 = vpop.eup %5069  ;;  %v2351_v16 = vsel %vm1095_vm0, %v2304_v35, 0 }
 0x524   : > { %v2272_v53 = vpop.permute.xlu0 %2271  ;;  %v1720_v0 = vmul.f32 %v5070_v1, %v6716_v52 }
 0x525   : > { %4638 = vmatpush3.bf16.xpose.msra.mxu0 %v2348_v51  ;;  %v1728_v39 = vpack.c.bf16 %v1719_v17, %v1718_v8 }
 0x526   : > { %4768 = vmatprep.subr.msk.bf16.mxu0 %vm1095_vm0, %v2304_v35  ;;  %v1729_v38 = vpack.c.bf16 %v1721_v30, %v1720_v0 }
 0x527   : > { %v2274_v24 = vpop.permute.xlu1 %2273  ;;  %4589 = vmatprep.mubr.bf16.mxu0 %v1728_v39 }
 0x528   : > { %v2276_v2 = vpop.permute.xlu0 %2275 }
 0x52b   : > { %v2278_v27 = vpop.permute.xlu1 %2277  ;;  %4590 = vmatmul.mubr.bf16.gmra.mrb[60].mxu0 %v1729_v38 }
 0x52c   : > { %v2280_v13 = vpop.permute.xlu0 %2279  ;;  %4641 = vmatprep.mubr.msk.bf16.mxu0 %vm1095_vm0, %v2266_v43 }
 0x52d   : > { %4640 = vmatpush3.bf16.xpose.msra.mxu0 %v2351_v16 }
 0x52f   : > { %v2084_v10 = vpop.permute.xlu1 %2083 }
 0x530   : > { %v2088_v50 = vpop.permute.xlu0 %2087  ;;  %2145 = vrot.lane.b32.xlu1 %v2084_v10, %s8099_s20 }
 0x531   : > { %2147 = vrot.lane.b32.xlu0 %v2088_v50, %s8099_s20 }
 0x533   : > { %v2092_v29 = vpop.permute.xlu1 %2091 }
 0x534   : > { %v2096_v9 = vpop.permute.xlu0 %2095  ;;  %2149 = vrot.lane.b32.xlu1 %v2092_v29, %s8099_s20  ;;  %4642 = vmatmul.mubr.msk.bf16.vlgmr.msra.gmra.mrb[64].mxu0 %vm1095_vm0, %v2268_v23 }
 0x535   : > { %2151 = vrot.lane.b32.xlu0 %v2096_v9, %s8099_s20  ;;  %4645 = vmatprep.mubr.msk.bf16.mxu0 %vm1095_vm0, %v2270_v15 }
 0x537   : > { %v2100_v52 = vpop.permute.xlu1 %2099 }
 0x538   : > { %v2104_v4 = vpop.permute.xlu0 %2103  ;;  %2153 = vrot.lane.b32.xlu1 %v2100_v52, %s8099_s20 }
 0x539   : > { %2155 = vrot.lane.b32.xlu0 %v2104_v4, %s8099_s20 }
 0x53b   : > { %v2108_v46 = vpop.permute.xlu1 %2107 }
 0x53c   : > { %v2112_v42 = vpop.permute.xlu0 %2111  ;;  %2157 = vrot.lane.b32.xlu1 %v2108_v46, %s8099_s20  ;;  %4646 = vmatmul.mubr.msk.bf16.gmra.mrb[68].mxu0 %vm1095_vm0, %v2272_v53 }
 0x53d   : > { %2159 = vrot.lane.b32.xlu0 %v2112_v42, %s8099_s20  ;;  %4649 = vmatprep.mubr.msk.bf16.mxu0 %vm1095_vm0, %v2274_v24 }
 0x53f   : > { %v2116_v57 = vpop.permute.xlu1 %2115 }
 0x540   : > { %v2120_v6 = vpop.permute.xlu0 %2119  ;;  %2161 = vrot.lane.b32.xlu1 %v2116_v57, %s8099_s20 }
 0x541   : > { %2163 = vrot.lane.b32.xlu0 %v2120_v6, %s8099_s20 }
 0x543   : > { %v2124_v59 = vpop.permute.xlu1 %2123 }
 0x544   : > { %v2128_v32 = vpop.permute.xlu0 %2127  ;;  %2165 = vrot.lane.b32.xlu1 %v2124_v59, %s8099_s20  ;;  %4650 = vmatmul.mubr.msk.bf16.gmra.mrb[72].mxu0 %vm1095_vm0, %v2276_v2 }
 0x545   : > { %2167 = vrot.lane.b32.xlu0 %v2128_v32, %s8099_s20  ;;  %4653 = vmatprep.mubr.msk.bf16.mxu0 %vm1095_vm0, %v2278_v27 }
 0x547   : > { %v2132_v58 = vpop.permute.xlu1 %2131 }
 0x548   : > { %v2136_v21 = vpop.permute.xlu0 %2135  ;;  %2169 = vrot.lane.b32.xlu1 %v2132_v58, %s8099_s20 }
 0x549   : > { %2171 = vrot.lane.b32.xlu0 %v2136_v21, %s8099_s20 }
 0x54b   : > { %v2140_v18 = vpop.permute.xlu1 %2139 }
 0x54c   : > { %v2144_v7 = vpop.permute.xlu0 %2143  ;;  %2173 = vrot.lane.b32.xlu1 %v2140_v18, %s8099_s20  ;;  %4654 = vmatmul.mubr.msk.bf16.gmra.mrb[76].mxu0 %vm1095_vm0, %v2280_v13 }
 0x54d   : > { %2175 = vrot.lane.b32.xlu0 %v2144_v7, %s8099_s20 }
 0x550   : > { %2628 = vrot.lane.b32.xlu1 %v8100_v49, %s5414_s12 }
 0x551   : > { %2626 = vrot.lane.b32.xlu0 %v8101_v56, %s5414_s12  ;;  %v8113_v56 = vld [vmem:[#allocation34_spill] sm:$0xff] }
 0x555   : > { %2630 = vrot.lane.b32.xlu0 %v8102_v11, %s5414_s12 }
 0x559   : > { %2632 = vrot.lane.b32.xlu0 %v8103_v60, %s5414_s12 }
 0x5a2   : > { %v6871_v63 = vpop.permute.xlu1 %2145 }
 0x5a3   : > { %v6873_v19 = vpop.permute.xlu0 %2147  ;;  %v2177_v30 = vrot.slane %v6871_v63, 1  ;;  %v2209_v58 = vsel %vm968_vm4, %v6871_v63, 0.0 }
 0x5a4   : > { %v2178_v24 = vrot.slane %v6873_v19, 1 }
 0x5a6   : > { %v2150_v26 = vpop.permute.xlu1 %2149  ;;  %v2207_v10 = vsel %vm1352_vm1, %v2177_v30, %v2178_v24 }
 0x5a7   : > { %v6875_v28 = vpop.permute.xlu0 %2151  ;;  %v2179_v51 = vrot.slane %v2150_v26, 1  ;;  %v2225_v57 = vsel %vm1000_vm7, %v2207_v10, 0.0  ;;  %v2211_v32 = vsel %vm970_vm2, %v2150_v26, 0.0  ;;  %vm8114_vm2 = vcmp.le.s32.totalorder %v6183_v41, %v8113_v56  ;;  %v8125_v56 = vld [vmem:[#allocation42_spill] sm:$0xff] }
 0x5a8   : > { %v2180_v39 = vrot.slane %v6875_v28, 1 }
 0x5a9   : > { %v2206_v52 = vsel %vm1352_vm1, %v2178_v24, %v2179_v51 }
 0x5aa   : > { %v6877_v33 = vpop.permute.xlu1 %2153  ;;  %v2205_v13 = vsel %vm1352_vm1, %v2179_v51, %v2180_v39  ;;  %v2226_v11 = vsel %vm1001_vm6, %v2206_v52, 0.0  ;;  %v8119_v51 = vld [vmem:[#allocation50_spill] sm:$0xff] }
 0x5ab   : > { %v6879_v40 = vpop.permute.xlu0 %2155  ;;  %v2181_v0 = vrot.slane %v6877_v33, 1  ;;  %v2227_v29 = vsel %vm1002_vm3, %v2205_v13, 0.0 }
 0x5ac   : > { %v2182_v6 = vrot.slane %v6879_v40, 1  ;;  %v2243_v18 = vadd.f32 %v2227_v29, %v2211_v32 }
 0x5ad   : > { %v6881_v54 = vpop.f32.mrb[48].mxu0  ;;  %v2204_v9 = vsel %vm1352_vm1, %v2180_v39, %v2181_v0  ;;  %v2210_v39 = vsel %vm969_vm5, %v6873_v19, 0.0  ;;  %vm8120_vm5 = vcmp.ge.s32.totalorder %v6183_v41, %v8119_v51 }
 0x5ae   : > { %v6883_v55 = vpop.permute.xlu1 %2157  ;;  %v6885_v47 = vpop.f32.mrb[49].mxu0  ;;  %v2228_v49 = vsel %vm1003_vm12, %v2204_v9, 0.0  ;;  %v2242_v29 = vadd.f32 %v2226_v11, %v2210_v39  ;;  %v2203_v9 = vsel %vm1352_vm1, %v2181_v0, %v2182_v6 }
 0x5af   : > { %v6887_v12 = vpop.permute.xlu0 %2159  ;;  %v6889_v44 = vpop.f32.mrb[50].mxu0  ;;  %v2183_v4 = vrot.slane %v6883_v55, 1  ;;  %v2215_v11 = vsel %vm8114_vm2, %v6883_v55, 0.0 }
 0x5b0   : > { %v6891_v22 = vpop.f32.mrb[51].mxu0  ;;  %v2184_v46 = vrot.slane %v6887_v12, 1 }
 0x5b2   : > { %v6893_v35 = vpop.permute.xlu1 %2161  ;;  %v2201_v24 = vsel %vm1352_vm1, %v2183_v4, %v2184_v46 }
 0x5b3   : > { %v6895_v48 = vpop.permute.xlu0 %2163  ;;  %v2185_v21 = vrot.slane %v6893_v35, 1 }
 0x5b4   : > { %v2186_v7 = vrot.slane %v6895_v48, 1 }
 0x5b6   : > { %v6897_v61 = vpop.permute.xlu1 %2165 }
 0x5b7   : > { %v6899_v34 = vpop.permute.xlu0 %2167  ;;  %v2187_v0 = vrot.slane %v6897_v61, 1 }
 0x5ba   : > { %v6901_v31 = vpop.permute.xlu1 %2169 }
 0x5bb   : > { %v6903_v37 = vpop.permute.xlu0 %2171 }
 0x5be   : > { %v6905_v36 = vpop.permute.xlu1 %2173 }
 0x5bf   : > { %v6907_v43 = vpop.permute.xlu0 %2175 }
 0x5c2   : > { %v2629_v25 = vpop.permute.xlu1 %2628 }
 0x5c3   : > { %v2627_v23 = vpop.permute.xlu0 %2626 }
 0x5c4   : > { %4657 = vmatprep.subr.bf16.mxu1 %v2627_v23 }
 0x5c5   : > { %4658 = vmatpush3.bf16.msra.mxu1 %v2627_v23  ;;  %v2241_v23 = vadd.f32 %v2225_v57, %v2209_v58  ;;  %v2202_v57 = vsel %vm1352_vm1, %v2182_v6, %v2183_v4  ;;  %v2229_v4 = vsel %vm1004_vm15, %v2203_v9, 0.0 }
 0x5c6   : > { %4659 = vmatprep.subr.bf16.mxu1 %v2629_v25  ;;  %v2230_v39 = vsel %vm8120_vm5, %v2202_v57, 0.0 }
 0x5c7   : > { %v2631_v5 = vpop.permute.xlu0 %2630 }
 0x5c9   : > { %4660 = vmatpush3.bf16.msra.mxu1 %v2629_v25 }
 0x5ca   : > { %4661 = vmatprep.subr.bf16.mxu1 %v2631_v5 }
 0x5cb   : > { %v2633_v20 = vpop.permute.xlu0 %2632 }
 0x5cd   : > { %4662 = vmatpush3.bf16.msra.mxu1 %v2631_v5  ;;  %v8117_v5 = vld [vmem:[#allocation36_spill] sm:$0xff] }
 0x5ce   : > { %4663 = vmatprep.subr.bf16.mxu1 %v2633_v20  ;;  %vm8118_vm4 = vcmp.le.s32.totalorder %v6183_v41, %v8117_v5  ;;  %v2192_v5 = vrot.slane %v6907_v43, 1 }
 0x5d1   : > { %4664 = vmatpush3.bf16.msra.mxu1 %v2633_v20  ;;  %v2212_v20 = vsel %vm971_vm13, %v6875_v28, 0.0  ;;  %v2200_v28 = vsel %vm1352_vm1, %v2184_v46, %v2185_v21 }
 0x5d2   : > { %v2244_v10 = vadd.f32 %v2228_v49, %v2212_v20  ;;  %v2188_v49 = vrot.slane %v6899_v34, 1  ;;  %v2213_v20 = vsel %vm8118_vm4, %v6877_v33, 0.0 }
 0x5d3   : > { %v2245_v55 = vadd.f32 %v2229_v4, %v2213_v20 }
 0x5d4   : > { %v2197_v57 = vsel %vm1352_vm1, %v2187_v0, %v2188_v49 }
 0x5e8   : > { %v6909_v14 = vpop.f32.mrb[52].mxu0 }
 0x5e9   : > { %v6911_v45 = vpop.f32.mrb[53].mxu0 }
 0x5ea   : > { %v6913_v62 = vpop.f32.mrb[54].mxu0 }
 0x5eb   : > { %v6915_v15 = vpop.f32.mrb[55].mxu0 }
 0x5f6   : > { %v6917_v53 = vpop.f32.mrb[56].mxu0 }
 0x5f7   : > { %v6919_v8 = vpop.f32.mrb[57].mxu0 }
 0x5f8   : > { %v6921_v17 = vpop.f32.mrb[58].mxu0 }
 0x5f9   : > { %v6923_v1 = vpop.f32.mrb[59].mxu0 }
 0x5fe   : > { %v6928_v2 = vpop.f32.mrb[60].mxu0 }
 0x5ff   : > { %v6931_v38 = vpop.f32.mrb[61].mxu0 }
 0x600   : > { %v6933_v27 = vpop.f32.mrb[62].mxu0 }
 0x601   : > { %v6937_v16 = vpop.f32.mrb[63].mxu0 }
 0x607   : > { %v4643_v60 = vpop.f32.mrb[64].mxu0 }
 0x608   : > { %v2396_v25 = vadd.f32 %v4643_v60, %v2243_v18  ;;  %v2387_v26 = vpop.f32.mrb[65].mxu0  ;;  %v2231_v18 = vsel %vm1006_vm11, %v2201_v24, 0.0  ;;  %v8115_v60 = vld [vmem:[#allocation52_spill] sm:$0xff]  ;;  %vm8126_vm11 = vcmp.ge.s32.totalorder %v6183_v41, %v8125_v56 }
 0x609   : > { %v2388_v13 = vadd.f32 %v2387_v26, %v2241_v23  ;;  %v4644_v50 = vpop.f32.mrb[66].mxu0  ;;  %vm8116_vm3 = vcmp.ge.s32.totalorder %v6183_v41, %v8115_v60  ;;  %v2247_v26 = vadd.f32 %v2231_v18, %v2215_v11  ;;  %v2235_v11 = vsel %vm8126_vm11, %v2197_v57, 0.0  ;;  %v8127_v60 = vld [vmem:[#allocation43_spill] sm:$0xff] }
 0x60a   : > { %v6982_v52 = vmul.f32 0.125, %v2396_v25  ;;  %v2390_v42 = vpop.f32.mrb[67].mxu0  ;;  %v2399_v59 = vadd.f32 %v4644_v50, %v2244_v10  ;;  %v2232_v23 = vsel %vm8116_vm3, %v2200_v28, 0.0  ;;  %v2189_v25 = vrot.slane %v6901_v31, 1  ;;  %v8121_v10 = vld [vmem:[#allocation49_spill] sm:$0xff] }
 0x60b   : > { %v6988_v19 = vmul.f32 0.125, %v2388_v13  ;;  %v2391_v32 = vadd.f32 %v2390_v42, %v2242_v29  ;;  %vm8122_vm6 = vcmp.le.s32.totalorder %v6183_v41, %v8121_v10  ;;  %v8123_v29 = vld [vmem:[#allocation48_spill] sm:$0xff]  ;;  %vm8128_vm12 = vcmp.ge.s32.totalorder %v6183_v41, %v8127_v60 }
 0x60c   : > { %2470 = vmax.xlane.f32.xlu0 %v6982_v52  ;;  %v7018_v24 = vmul.f32 0.125, %v2399_v59  ;;  %v2216_v50 = vsel %vm8122_vm6, %v6887_v12, 0.0  ;;  %vm8124_vm7 = vcmp.le.s32.totalorder %v6183_v41, %v8123_v29  ;;  %v2199_v59 = vsel %vm1352_vm1, %v2185_v21, %v2186_v7 }
 0x60d   : > { %v7000_v6 = vmul.f32 0.125, %v2391_v32  ;;  %2466 = vmax.xlane.f32.xlu1 %v6988_v19  ;;  %v2214_v9 = vsel %vm8124_vm7, %v6879_v40, 0.0  ;;  %v2248_v28 = vadd.f32 %v2232_v23, %v2216_v50  ;;  %v2196_v4 = vsel %vm1352_vm1, %v2188_v49, %v2189_v25  ;;  %v8132_v50 = vld [vmem:[#allocation41_spill] sm:$0xff] }
 0x60e   : > { %v2246_v12 = vadd.f32 %v2230_v39, %v2214_v9  ;;  %v2233_v21 = vsel %vm8128_vm12, %v2199_v59, 0.0  ;;  %v2198_v23 = vsel %vm1352_vm1, %v2186_v7, %v2187_v0  ;;  %v2190_v49 = vrot.slane %v6903_v37, 1  ;;  %v8129_v39 = vld [vmem:[#allocation40_spill] sm:$0xff]  ;;  %v8137_v59 = vld [vmem:[#allocation51_spill] sm:$0xff] }
 0x60f   : > { %v4647_v13 = vpop.f32.mrb[68].mxu0  ;;  %vm8130_vm13 = vcmp.le.s32.totalorder %v6183_v41, %v8129_v39  ;;  %v2236_v7 = vsel %vm1011_vm9, %v2196_v4, 0.0  ;;  %vm8133_vm15 = vcmp.le.s32.totalorder %v6183_v41, %v8132_v50  ;;  %vm8138_vm2 = vcmp.le.s32.totalorder %v6183_v41, %v8137_v59 }
 0x610   : > { %v2412_v42 = vadd.f32 %v4647_v13, %v2247_v26  ;;  %v2403_v33 = vpop.f32.mrb[69].mxu0  ;;  %2468 = vmax.xlane.f32.xlu0 %v7000_v6  ;;  %v2191_v26 = vrot.slane %v6905_v36, 1  ;;  %v2219_v13 = vsel %vm8130_vm13, %v6897_v61, 0.0  ;;  %v2217_v29 = vsel %vm8133_vm15, %v6893_v35, 0.0 }
 0x611   : > { %v4648_v32 = vpop.f32.mrb[70].mxu0  ;;  %2472 = vmax.xlane.f32.xlu1 %v7018_v24  ;;  %v2404_v18 = vadd.f32 %v2403_v33, %v2245_v55  ;;  %v2251_v10 = vadd.f32 %v2235_v11, %v2219_v13  ;;  %v2249_v61 = vadd.f32 %v2233_v21, %v2217_v29 }
 0x612   : > { %v7034_v58 = vmul.f32 0.125, %v2412_v42  ;;  %v2415_v46 = vadd.f32 %v4648_v32, %v2248_v28  ;;  %v2406_v40 = vpop.f32.mrb[71].mxu0  ;;  %v2234_v42 = vsel %vm1009_vm10, %v2198_v23, 0.0  ;;  %v8135_v28 = vld [vmem:[#allocation53_spill] sm:$0xff]  ;;  %v2218_v32 = vsel %vm8138_vm2, %v6895_v48, 0.0 }
 0x613   : > { %v2407_v51 = vadd.f32 %v2406_v40, %v2246_v12  ;;  %v7059_v0 = vmul.f32 0.125, %v2404_v18  ;;  %vm8136_vm9 = vcmp.le.s32.totalorder %v6183_v41, %v8135_v28  ;;  %v2193_v40 = vsel %vm1352_vm1, %v2191_v26, %v2192_v5 }
 0x614   : > { %v7048_v20 = vmul.f32 0.125, %v2415_v46  ;;  %2478 = vmax.xlane.f32.xlu0 %v7034_v58  ;;  %v2220_v57 = vsel %vm8136_vm9, %v6899_v34, 0.0  ;;  %v2250_v56 = vadd.f32 %v2234_v42, %v2218_v32  ;;  %v2195_v34 = vsel %vm1352_vm1, %v2189_v25, %v2190_v49  ;;  %v8141_v25 = vld [vmem:[#allocation44_spill] sm:$0xff]  ;;  %v8147_v42 = vld [vmem:[#allocation45_spill] sm:$0xff] }
 0x615   : > { %v7077_v12 = vmul.f32 0.125, %v2407_v51  ;;  %v2252_v46 = vadd.f32 %v2236_v7, %v2220_v57  ;;  %v2208_v23 = vsel %vm1352_vm1, %v2192_v5, %v2177_v30  ;;  %v8139_v51 = vld [vmem:[#allocation46_spill] sm:$0xff]  ;;  %vm8142_vm3 = vcmp.le.s32.totalorder %v6183_v41, %v8141_v25  ;;  %v8145_v30 = vld [vmem:[#allocation33_spill] sm:$0xff] }
 0x616   : > { %2480 = vmax.xlane.f32.xlu1 %v7048_v20  ;;  %vm8140_vm10 = vcmp.ge.s32.totalorder %v6183_v41, %v8139_v51  ;;  %v2223_v7 = vsel %vm8142_vm3, %v6905_v36, 0.0  ;;  %vm8146_vm5 = vcmp.ge.s32.totalorder %v6183_v41, %v8145_v30  ;;  %vm8148_vm6 = vcmp.le.s32.totalorder %v6183_v41, %v8147_v42 }
 0x617   : > { %v4651_v33 = vpop.f32.mrb[72].mxu0  ;;  %v2239_v39 = vsel %vm8140_vm10, %v2193_v40, 0.0  ;;  %v2240_v5 = vsel %vm8146_vm5, %v2208_v23, 0.0 }
 0x618   : > { %v2428_v18 = vadd.f32 %v4651_v33, %v2251_v10  ;;  %v2419_v35 = vpop.f32.mrb[73].mxu0  ;;  %2474 = vmax.xlane.f32.xlu0 %v7059_v0  ;;  %v8143_v10 = vld [vmem:[#allocation47_spill] sm:$0xff]  ;;  %v2255_v29 = vadd.f32 %v2239_v39, %v2223_v7  ;;  %v2221_v33 = vsel %vm8148_vm6, %v6901_v31, 0.0  ;;  %v2222_v39 = vsel %vm981_vm14, %v6903_v37, 0.0 }
 0x619   : > { %v4652_v4 = vpop.f32.mrb[74].mxu0  ;;  %v2420_v48 = vadd.f32 %v2419_v35, %v2249_v61  ;;  %vm8144_vm4 = vcmp.ge.s32.totalorder %v6183_v41, %v8143_v10  ;;  %v8149_v61 = vld [vmem:[#allocation32_spill] sm:$0xff] }
 0x61a   : > { %v7086_v11 = vmul.f32 0.125, %v2428_v18  ;;  %v2431_v60 = vadd.f32 %v4652_v4, %v2252_v46  ;;  %v2422_v21 = vpop.f32.mrb[75].mxu0  ;;  %2476 = vmax.xlane.f32.xlu1 %v7077_v12  ;;  %v2237_v63 = vsel %vm8144_vm4, %v2195_v34, 0.0  ;;  %vm8150_vm7 = vcmp.le.s32.totalorder %v6183_v41, %v8149_v61 }
 0x61b   : > { %v2423_v55 = vadd.f32 %v2422_v21, %v2250_v56  ;;  %v7109_v50 = vmul.f32 0.125, %v2420_v48  ;;  %v2224_v28 = vsel %vm8150_vm7, %v6907_v43, 0.0  ;;  %v2253_v32 = vadd.f32 %v2237_v63, %v2221_v33  ;;  %v8151_v43 = vld [vmem:[#allocation22_spill] sm:$0xff]  ;;  %v8152_v48 = vld [vmem:[#allocation23_spill] sm:$0xff] }
 0x61c   : > { %v7096_v13 = vmul.f32 0.125, %v2431_v60  ;;  %2486 = vmax.xlane.f32.xlu0 %v7086_v11  ;;  %v2256_v35 = vadd.f32 %v2240_v5, %v2224_v28  ;;  %v2194_v60 = vsel %vm1352_vm1, %v2190_v49, %v2191_v26 }
 0x61d   : > { %v7120_v57 = vmul.f32 0.125, %v2423_v55  ;;  %v2238_v23 = vsel %vm1013_vm8, %v2194_v60, 0.0 }
 0x61e   : > { %2488 = vmax.xlane.f32.xlu1 %v7096_v13  ;;  %v2254_v55 = vadd.f32 %v2238_v23, %v2222_v39 }
 0x61f   : > { %v4655_v9 = vpop.f32.mrb[76].mxu0 }
 0x620   : > { %v2444_v59 = vadd.f32 %v4655_v9, %v2255_v29  ;;  %v2435_v18 = vpop.f32.mrb[77].mxu0  ;;  %2482 = vmax.xlane.f32.xlu0 %v7109_v50 }
 0x621   : > { %v4656_v46 = vpop.f32.mrb[78].mxu0  ;;  %v2436_v4 = vadd.f32 %v2435_v18, %v2253_v32 }
 0x622   : > { %v7123_v40 = vmul.f32 0.125, %v2444_v59  ;;  %v2447_v56 = vadd.f32 %v4656_v46, %v2256_v35  ;;  %v2438_v34 = vpop.f32.mrb[79].mxu0  ;;  %2484 = vmax.xlane.f32.xlu1 %v7120_v57 }
 0x623   : > { %v7127_v31 = vmul.f32 0.125, %v2436_v4  ;;  %v2439_v7 = vadd.f32 %v2438_v34, %v2254_v55 }
 0x624   : > { %2494 = vmax.xlane.f32.xlu0 %v7123_v40  ;;  %v7145_v25 = vmul.f32 0.125, %v2447_v56 }
 0x625   : > { %v7148_v10 = vmul.f32 0.125, %v2439_v7 }
 0x628   : > { %2490 = vmax.xlane.f32.xlu0 %v7127_v31 }
 0x633   : > { %2636 = vrot.lane.b32.xlu1 %v8151_v43, %s5414_s12 }
 0x63e   : > { %2634 = vrot.lane.b32.xlu0 %v8152_v48, %s5414_s12 }
 0x657   : > { %2496 = vmax.xlane.f32.xlu1 %v7145_v25 }
 0x65b   : > { %2492 = vmax.xlane.f32.xlu1 %v7148_v10 }
 0x699   : > { %v2471_v36 = vpop.xlane.xlu0 %2470 }
 0x69a   : > { %v2500_v26 = vsub.f32 %v6982_v52, %v2471_v36  ;;  %v2467_v49 = vpop.xlane.xlu1 %2466 }
 0x69b   : > { %v2498_v63 = vsub.f32 %v6988_v19, %v2467_v49  ;;  %v8156_v49 = vld [vmem:[#allocation25_spill] sm:$0xff] }
 0x69c   : > { %v2518_v30 = vmul.f32 1.442695, %v2500_v26  ;;  %v8155_v26 = vld [vmem:[#allocation24_spill] sm:$0xff] }
 0x69d   : > { %v2469_v5 = vpop.xlane.xlu0 %2468  ;;  %v2514_v41 = vmul.f32 1.442695, %v2498_v63 }
 0x69e   : > { %5071 = vpow2.f32 %v2518_v30  ;;  %v2473_v37 = vpop.xlane.xlu1 %2472  ;;  %v2499_v9 = vsub.f32 %v7000_v6, %v2469_v5 }
 0x69f   : > { %v2501_v29 = vsub.f32 %v7018_v24, %v2473_v37  ;;  %5073 = vpow2.f32 %v2514_v41 }
 0x6a0   : > { %v2516_v52 = vmul.f32 1.442695, %v2499_v9 }
 0x6a1   : > { %v2520_v42 = vmul.f32 1.442695, %v2501_v29  ;;  %v2479_v33 = vpop.xlane.xlu0 %2478 }
 0x6a2   : > { %v2504_v61 = vsub.f32 %v7034_v58, %v2479_v33 }
 0x6a3   : > { %v2481_v28 = vpop.xlane.xlu1 %2480  ;;  %5075 = vpow2.f32 %v2520_v42 }
 0x6a4   : > { %v2526_v59 = vmul.f32 1.442695, %v2504_v61  ;;  %v2505_v19 = vsub.f32 %v7048_v20, %v2481_v28 }
 0x6a5   : > { %v2475_v32 = vpop.xlane.xlu0 %2474 }
 0x6a6   : > { %5077 = vpow2.f32 %v2526_v59  ;;  %v2502_v18 = vsub.f32 %v7059_v0, %v2475_v32  ;;  %v2528_v4 = vmul.f32 1.442695, %v2505_v19 }
 0x6a7   : > { %v2477_v35 = vpop.xlane.xlu1 %2476  ;;  %5079 = vpow2.f32 %v2516_v52 }
 0x6a8   : > { %v7158_v46 = vpop.eup %5071  ;;  %v2522_v24 = vmul.f32 1.442695, %v2502_v18  ;;  %v2503_v6 = vsub.f32 %v7077_v12, %v2477_v35 }
 0x6a9   : > { %2550 = vadd.xlane.f32.xlu1 %v7158_v46  ;;  %v2487_v58 = vpop.xlane.xlu0 %2486  ;;  %v7162_v34 = vpop.eup %5073 }
 0x6aa   : > { %5081 = vpow2.f32 %v2522_v24  ;;  %v2524_v56 = vmul.f32 1.442695, %v2503_v6  ;;  %v2508_v5 = vsub.f32 %v7086_v11, %v2487_v58 }
 0x6ab   : > { %5083 = vpow2.f32 %v2528_v4  ;;  %v2489_v43 = vpop.xlane.xlu1 %2488 }
 0x6ac   : > { %5085 = vpow2.f32 %v2524_v56  ;;  %v2509_v37 = vsub.f32 %v7096_v13, %v2489_v43  ;;  %v2534_v9 = vmul.f32 1.442695, %v2508_v5 }
 0x6ad   : > { %2546 = vadd.xlane.f32.xlu1 %v7162_v34  ;;  %v2483_v20 = vpop.xlane.xlu0 %2482  ;;  %v7165_v0 = vpop.eup %5075 }
 0x6ae   : > { %v2506_v63 = vsub.f32 %v7109_v50, %v2483_v20  ;;  %v2536_v42 = vmul.f32 1.442695, %v2509_v37 }
 0x6af   : > { %v2485_v23 = vpop.xlane.xlu1 %2484 }
 0x6b0   : > { %v7167_v48 = vpop.eup %5077  ;;  %v2507_v30 = vsub.f32 %v7120_v57, %v2485_v23  ;;  %v2530_v41 = vmul.f32 1.442695, %v2506_v63 }
 0x6b1   : > { %2552 = vadd.xlane.f32.xlu1 %v7165_v0  ;;  %2558 = vadd.xlane.f32.xlu0 %v7167_v48  ;;  %v2495_v12 = vpop.xlane.xlu0 %2494  ;;  %v7171_v60 = vpop.eup %5079 }
 0x6b2   : > { %v2532_v29 = vmul.f32 1.442695, %v2507_v30  ;;  %5087 = vpow2.f32 %v2530_v41  ;;  %v2512_v28 = vsub.f32 %v7123_v40, %v2495_v12 }
 0x6b3   : > { %v2637_v36 = vpop.permute.xlu1 %2636 }
 0x6b4   : > { %v7173_v21 = vpop.eup %5081  ;;  %5089 = vpow2.f32 %v2532_v29  ;;  %v2542_v52 = vmul.f32 1.442695, %v2512_v28 }
 0x6b5   : > { %2548 = vadd.xlane.f32.xlu1 %v7171_v60  ;;  %2554 = vadd.xlane.f32.xlu0 %v7173_v21  ;;  %v2491_v51 = vpop.xlane.xlu0 %2490  ;;  %v7177_v39 = vpop.eup %5083  ;;  %5091 = vpow2.f32 %v2534_v9 }
 0x6b6   : > { %v7179_v55 = vpop.eup %5085  ;;  %v2510_v33 = vsub.f32 %v7127_v31, %v2491_v51  ;;  %5093 = vpow2.f32 %v2536_v42 }
 0x6b8   : > { %v2538_v50 = vmul.f32 1.442695, %v2510_v33 }
 0x6b9   : > { %2556 = vadd.xlane.f32.xlu1 %v7179_v55  ;;  %2560 = vadd.xlane.f32.xlu0 %v7177_v39  ;;  %v2635_v7 = vpop.permute.xlu0 %2634 }
 0x6ba   : > { %4665 = vmatprep.subr.bf16.mxu1 %v2635_v7  ;;  %5095 = vpow2.f32 %v2538_v50 }
 0x6bb   : > { %4666 = vmatpush3.bf16.msra.mxu1 %v2635_v7 }
 0x6bc   : > { %4667 = vmatprep.subr.bf16.mxu1 %v2637_v36  ;;  %v7195_v19 = vpop.eup %5087 }
 0x6be   : > { %v7197_v32 = vpop.eup %5089 }
 0x6bf   : > { %4668 = vmatpush3.bf16.msra.mxu1 %v2637_v36  ;;  %v7201_v40 = vpop.eup %5091 }
 0x6c0   : > { %v7203_v31 = vpop.eup %5093 }
 0x6ca   : > { %2640 = vrot.lane.b32.xlu1 %v8155_v26, %s5414_s12 }
 0x6cf   : > { %2638 = vrot.lane.b32.xlu0 %v8156_v49, %s5414_s12 }
 0x6e4   : > { %v2497_v61 = vpop.xlane.xlu1 %2496 }
 0x6e5   : > { %v2513_v57 = vsub.f32 %v7145_v25, %v2497_v61  ;;  %v7207_v25 = vpop.eup %5095 }
 0x6e7   : > { %v2544_v18 = vmul.f32 1.442695, %v2513_v57 }
 0x6e8   : > { %v2493_v59 = vpop.xlane.xlu1 %2492 }
 0x6e9   : > { %v2511_v11 = vsub.f32 %v7148_v10, %v2493_v59 }
 0x6eb   : > { %v2540_v13 = vmul.f32 1.442695, %v2511_v11 }
 0x6ed   : > { %5097 = vpow2.f32 %v2540_v13 }
 0x6ee   : > { %2564 = vadd.xlane.f32.xlu0 %v7197_v32  ;;  %2562 = vadd.xlane.f32.xlu1 %v7195_v19  ;;  %5099 = vpow2.f32 %v2542_v52 }
 0x6ef   : > { %5101 = vpow2.f32 %v2544_v18 }
 0x6f2   : > { %2566 = vadd.xlane.f32.xlu0 %v7201_v40  ;;  %2568 = vadd.xlane.f32.xlu1 %v7203_v31 }
 0x6f6   : > { %2570 = vadd.xlane.f32.xlu0 %v7207_v25 }
 0x6f7   : > { %v7210_v10 = vpop.eup %5097 }
 0x6f8   : > { %2572 = vadd.xlane.f32.xlu1 %v7210_v10  ;;  %v7213_v35 = vpop.eup %5099 }
 0x6f9   : > { %v7216_v24 = vpop.eup %5101 }
 0x6fa   : > { %2574 = vadd.xlane.f32.xlu0 %v7213_v35 }
 0x6fc   : > { %2576 = vadd.xlane.f32.xlu1 %v7216_v24 }
 0x736   : > { %v2551_v6 = vpop.xlane.xlu1 %2550 }
 0x73a   : > { %v2547_v4 = vpop.xlane.xlu1 %2546 }
 0x73e   : > { %v2553_v58 = vpop.xlane.xlu1 %2552  ;;  %v2559_v56 = vpop.xlane.xlu0 %2558 }
 0x73f   : > { %5103 = vrcp.f32 %v2553_v58 }
 0x740   : > { %5105 = vrcp.f32 %v2547_v4 }
 0x741   : > { %5107 = vrcp.f32 %v2551_v6 }
 0x742   : > { %v2549_v20 = vpop.xlane.xlu1 %2548  ;;  %v2555_v43 = vpop.xlane.xlu0 %2554 }
 0x743   : > { %5109 = vrcp.f32 %v2549_v20 }
 0x744   : > { %5111 = vrcp.f32 %v2555_v43 }
 0x746   : > { %v2557_v12 = vpop.xlane.xlu1 %2556  ;;  %v2561_v23 = vpop.xlane.xlu0 %2560 }
 0x747   : > { %5113 = vrcp.f32 %v2557_v12 }
 0x748   : > { %5115 = vrcp.f32 %v2561_v23 }
 0x749   : > { %v5104_v51 = vpop.eup %5103  ;;  %5117 = vrcp.f32 %v2559_v56 }
 0x74a   : > { %v2639_v7 = vpop.permute.xlu0 %2638  ;;  %v5106_v36 = vpop.eup %5105  ;;  %v2597_v30 = vmul.f32 %v5104_v51, %v7165_v0 }
 0x74b   : > { %4669 = vmatprep.subr.bf16.mxu1 %v2639_v7  ;;  %v5108_v26 = vpop.eup %5107  ;;  %v2641_v49 = vpop.permute.xlu1 %2640  ;;  %v2594_v5 = vmul.f32 %v5106_v36, %v7162_v34 }
 0x74c   : > { %4670 = vmatpush3.bf16.msra.mxu1 %v2639_v7  ;;  %v2596_v29 = vmul.f32 %v5108_v26, %v7158_v46 }
 0x74d   : > { %v5110_v63 = vpop.eup %5109  ;;  %4671 = vmatprep.subr.bf16.mxu1 %v2641_v49 }
 0x74e   : > { %v2595_v41 = vmul.f32 %v5110_v63, %v7171_v60  ;;  %v5112_v37 = vpop.eup %5111  ;;  %v2611_v33 = vpack.c.bf16 %v2597_v30, %v2596_v29  ;;  %v4963_v29 = vld [vmem:[#allocation5 + $0x20] sm:$0xff]  }
 0x74f   : > { %v2598_v28 = vmul.f32 %v5112_v37, %v7173_v21  ;;  %v4960_v37 = vld [vmem:[#allocation5 + $0x8] sm:$0xff]  }
 0x750   : > { %4672 = vmatpush3.bf16.msra.mxu1 %v2641_v49  ;;  %v2610_v9 = vpack.c.bf16 %v2595_v41, %v2594_v5  ;;  %v8157_v41 = vmov 0  }
 0x751   : > { %v5114_v42 = vpop.eup %5113 }
 0x752   : > { %v5116_v61 = vpop.eup %5115  ;;  %4673 = vmatprep.mubr.bf16.mxu1 %v2610_v9  ;;  %v2599_v50 = vmul.f32 %v5114_v42, %v7179_v55  ;;  %v4966_v9 = vld [vmem:[#allocation5 + $0x38] sm:$0xff]  }
 0x753   : > { %4674 = vmatmul.mubr.bf16.vlgmr.msra.gmra.mrb[48].mxu1 %v2611_v33  ;;  %v5118_v0 = vpop.eup %5117  ;;  %v2601_v34 = vmul.f32 %v5116_v61, %v7177_v39 }
 0x754   : > { %v2612_v59 = vpack.c.bf16 %v2599_v50, %v2598_v28  ;;  %v2600_v60 = vmul.f32 %v5118_v0, %v7167_v48 }
 0x756   : > { %4677 = vmatprep.mubr.bf16.mxu1 %v2612_v59  ;;  %v2613_v57 = vpack.c.bf16 %v2601_v34, %v2600_v60 }
 0x75b   : > { %4678 = vmatmul.mubr.bf16.gmra.mrb[52].mxu1 %v2613_v57 }
 0x77b   : > { %v2563_v46 = vpop.xlane.xlu1 %2562  ;;  %v2565_v11 = vpop.xlane.xlu0 %2564 }
 0x77c   : > { %5119 = vrcp.f32 %v2563_v46 }
 0x77d   : > { %5121 = vrcp.f32 %v2565_v11 }
 0x77f   : > { %v2569_v52 = vpop.xlane.xlu1 %2568  ;;  %v2567_v13 = vpop.xlane.xlu0 %2566 }
 0x780   : > { %5123 = vrcp.f32 %v2569_v52 }
 0x781   : > { %5125 = vrcp.f32 %v2567_v13 }
 0x783   : > { %v2571_v21 = vpop.xlane.xlu0 %2570 }
 0x784   : > { %5127 = vrcp.f32 %v2571_v21 }
 0x785   : > { %v2573_v55 = vpop.xlane.xlu1 %2572 }
 0x786   : > { %v5120_v18 = vpop.eup %5119  ;;  %5129 = vrcp.f32 %v2573_v55 }
 0x787   : > { %v5122_v6 = vpop.eup %5121  ;;  %v2575_v39 = vpop.xlane.xlu0 %2574  ;;  %v2602_v4 = vmul.f32 %v5120_v18, %v7195_v19 }
 0x788   : > { %5131 = vrcp.f32 %v2575_v39  ;;  %v2603_v48 = vmul.f32 %v5122_v6, %v7197_v32 }
 0x789   : > { %v2577_v58 = vpop.xlane.xlu1 %2576 }
 0x78a   : > { %v5124_v56 = vpop.eup %5123  ;;  %5133 = vrcp.f32 %v2577_v58  ;;  %v2614_v20 = vpack.c.bf16 %v2603_v48, %v2602_v4 }
 0x78b   : > { %v5126_v43 = vpop.eup %5125  ;;  %v2605_v12 = vmul.f32 %v5124_v56, %v7203_v31 }
 0x78c   : > { %4681 = vmatprep.mubr.bf16.mxu1 %v2614_v20  ;;  %v2604_v23 = vmul.f32 %v5126_v43, %v7201_v40  ;;  %v4959_v40 = vld [vmem:[#allocation5] sm:$0xff]  }
 0x78d   : > { %4689 = vmatprep.subr.bf16.mxu0 %v4959_v40 }
 0x78e   : > { %v5128_v51 = vpop.eup %5127  ;;  %v2615_v7 = vpack.c.bf16 %v2605_v12, %v2604_v23  ;;  %4690 = vmatpush3.bf16.msra.mxu0 %v4959_v40 }
 0x78f   : > { %v2606_v26 = vmul.f32 %v5128_v51, %v7207_v25  ;;  %4691 = vmatprep.subr.bf16.mxu0 %v4960_v37  ;;  %v4961_v25 = vld [vmem:[#allocation5 + $0x10] sm:$0xff]  }
 0x790   : > { %v5130_v36 = vpop.eup %5129  ;;  %4682 = vmatmul.mubr.bf16.gmra.mrb[56].mxu1 %v2615_v7 }
 0x791   : > { %v2607_v19 = vmul.f32 %v5130_v36, %v7210_v10  ;;  %v4962_v10 = vld [vmem:[#allocation5 + $0x18] sm:$0xff]  }
 0x792   : > { %v5132_v49 = vpop.eup %5131  ;;  %4692 = vmatpush3.bf16.msra.mxu0 %v4960_v37 }
 0x793   : > { %v2616_v32 = vpack.c.bf16 %v2607_v19, %v2606_v26  ;;  %v2608_v30 = vmul.f32 %v5132_v49, %v7213_v35  ;;  %4693 = vmatprep.subr.bf16.mxu0 %v4961_v25  ;;  %v4964_v35 = vld [vmem:[#allocation5 + $0x28] sm:$0xff]  }
 0x794   : > { %v5134_v63 = vpop.eup %5133 }
 0x795   : > { %4685 = vmatprep.mubr.bf16.mxu1 %v2616_v32  ;;  %v2609_v5 = vmul.f32 %v5134_v63, %v7216_v24  ;;  %v4965_v24 = vld [vmem:[#allocation5 + $0x30] sm:$0xff]  }
 0x796   : > { %4694 = vmatpush3.bf16.msra.mxu0 %v4961_v25 }
 0x797   : > { %v2617_v31 = vpack.c.bf16 %v2609_v5, %v2608_v30  ;;  %4695 = vmatprep.subr.bf16.mxu0 %v4962_v10 }
 0x799   : > { %4686 = vmatmul.mubr.bf16.gmra.mrb[60].mxu1 %v2617_v31 }
 0x79a   : > { %3383 = vmatprep.mubr.bf16.mxu1 %v8157_v41  ;;  %4696 = vmatpush3.bf16.msra.mxu0 %v4962_v10 }
 0x79b   : > { %4697 = vmatprep.subr.bf16.mxu0 %v4963_v29 }
 0x79e   : > { %4698 = vmatpush3.bf16.msra.mxu0 %v4963_v29 }
 0x79f   : > { %4699 = vmatprep.subr.bf16.mxu0 %v4964_v35 }
 0x7a2   : > { %4700 = vmatpush3.bf16.msra.mxu0 %v4964_v35 }
 0x7a3   : > { %4701 = vmatprep.subr.bf16.mxu0 %v4965_v24 }
 0x7a6   : > { %4702 = vmatpush3.bf16.msra.mxu0 %v4965_v24 }
 0x7a7   : > { %4703 = vmatprep.subr.bf16.mxu0 %v4966_v9 }
 0x7aa   : > { %4704 = vmatpush3.bf16.msra.mxu0 %v4966_v9 }
 0x826   : > { %v4675_v42 = vpop.f32.mrb[48].mxu1 }
 0x827   : > { %v2684_v33 = vpop.f32.mrb[49].mxu1 }
 0x828   : > { %v4676_v61 = vpop.f32.mrb[50].mxu1 }
 0x829   : > { %v4876_v28 = vpack.i.bf16 %v4676_v61, %v4675_v42  ;;  %v2687_v50 = vpop.f32.mrb[51].mxu1 }
 0x82a   : > { %v4871_v0 = vpack.i.bf16 %v2687_v50, %v2684_v33 }
 0x82b   : > { %4877 = vrot.lane.b32.xlu1 %v4876_v28, %s5414_s12 }
 0x82c   : > { %4872 = vrot.lane.b32.xlu0 %v4871_v0, %s5414_s12 }
 0x82e   : > { %v4679_v59 = vpop.f32.mrb[52].mxu1 }
 0x82f   : > { %v2700_v34 = vpop.f32.mrb[53].mxu1 }
 0x830   : > { %v4680_v60 = vpop.f32.mrb[54].mxu1 }
 0x831   : > { %v4886_v57 = vpack.i.bf16 %v4680_v60, %v4679_v59  ;;  %v2703_v46 = vpop.f32.mrb[55].mxu1 }
 0x832   : > { %v4881_v11 = vpack.i.bf16 %v2703_v46, %v2700_v34 }
 0x833   : > { %4887 = vrot.lane.b32.xlu0 %v4886_v57, %s5414_s12 }
 0x834   : > { %4882 = vrot.lane.b32.xlu1 %v4881_v11, %s5414_s12 }
 0x863   : > { %v4683_v52 = vpop.f32.mrb[56].mxu1 }
 0x864   : > { %v2716_v13 = vpop.f32.mrb[57].mxu1 }
 0x865   : > { %v4684_v21 = vpop.f32.mrb[58].mxu1 }
 0x866   : > { %v4896_v55 = vpack.i.bf16 %v4684_v21, %v4683_v52  ;;  %v2719_v18 = vpop.f32.mrb[59].mxu1 }
 0x867   : > { %v4891_v6 = vpack.i.bf16 %v2719_v18, %v2716_v13  ;;  %v5199_v18 = vld [vmem:[%s5718_s5] sm:$0xff] }
 0x868   : > { %4897 = vrot.lane.b32.xlu0 %v4896_v55, %s5414_s12 }
 0x869   : > { %4892 = vrot.lane.b32.xlu1 %v4891_v6, %s5414_s12 }
 0x86c   : > { %v4687_v39 = vpop.f32.mrb[60].mxu1 }
 0x86d   : > { %v2732_v4 = vpop.f32.mrb[61].mxu1 }
 0x86e   : > { %v4688_v48 = vpop.f32.mrb[62].mxu1 }
 0x86f   : > { %v4906_v58 = vpack.i.bf16 %v4688_v48, %v4687_v39  ;;  %v2735_v56 = vpop.f32.mrb[63].mxu1  ;;  %v5200_v39 = vld [vmem:[%s5718_s5 + $0x8] sm:$0xff]  ;;  %v5202_v48 = vld [vmem:[%s5718_s5 + $0x10] sm:$0xff] }
 0x870   : > { %v4901_v20 = vpack.i.bf16 %v2735_v56, %v2732_v4 }
 0x871   : > { %4907 = vrot.lane.b32.xlu0 %v4906_v58, %s5414_s12 }
 0x872   : > { %4902 = vrot.lane.b32.xlu1 %v4901_v20, %s5414_s12  ;;  %s8163_s12 = sld [smem:[#allocation64_spill]] }
 0x89d   : > { %v4878_v43 = vpop.permute.xlu1 %4877 }
 0x89e   : > { %v4880_v12 = vunpack.i.h.bf16 %v4878_v43  ;;  %v4879_v23 = vunpack.i.l.bf16 %v4878_v43  ;;  %v4873_v51 = vpop.permute.xlu0 %4872 }
 0x89f   : > { %v4875_v7 = vunpack.i.h.bf16 %v4873_v51  ;;  %v4874_v36 = vunpack.i.l.bf16 %v4873_v51 }
 0x8a0   : > { %v2814_v26 = vsel %vm1095_vm0, %v6889_v44, %v4880_v12  ;;  %v2813_v19 = vsel %vm1095_vm0, %v6881_v54, %v4879_v23  ;;  %v5203_v23 = vld [vmem:[%s5718_s5 + $0x20] sm:$0xff] }
 0x8a1   : > { %v2828_v49 = vpack.c.bf16 %v2814_v26, %v2813_v19  ;;  %v2811_v32 = vsel %vm1095_vm0, %v6885_v47, %v4874_v36  ;;  %v2812_v63 = vsel %vm1095_vm0, %v6891_v22, %v4875_v7  ;;  %v5204_v7 = vld [vmem:[%s5718_s5 + $0x28] sm:$0xff]  ;;  %v5205_v26 = vld [vmem:[%s5718_s5 + $0x30] sm:$0xff] }
 0x8a2   : > { %v2827_v30 = vpack.c.bf16 %v2812_v63, %v2811_v32 }
 0x8a4   : > { %4705 = vmatprep.mubr.bf16.mxu0 %v2827_v30 }
 0x8a5   : > { %v4888_v5 = vpop.permute.xlu0 %4887  ;;  %4706 = vmatmul.mubr.bf16.vlgmr.msra.gmra.mrb[80].mxu0 %v2828_v49  ;;  %v5206_v49 = vld [vmem:[%s5718_s5 + $0x38] sm:$0xff] }
 0x8a6   : > { %v4890_v31 = vunpack.i.h.bf16 %v4888_v5  ;;  %v4889_v40 = vunpack.i.l.bf16 %v4888_v5  ;;  %v4883_v37 = vpop.permute.xlu1 %4882  ;;  %v5207_v5 = vld [vmem:[%s5718_s5 + $0x40] sm:$0xff] }
 0x8a7   : > { %v4885_v25 = vunpack.i.h.bf16 %v4883_v37  ;;  %v4884_v10 = vunpack.i.l.bf16 %v4883_v37 }
 0x8a8   : > { %v2817_v44 = vsel %vm1095_vm0, %v6909_v14, %v4889_v40  ;;  %v2818_v54 = vsel %vm1095_vm0, %v6913_v62, %v4890_v31 }
 0x8a9   : > { %v2815_v47 = vsel %vm1095_vm0, %v6911_v45, %v4884_v10  ;;  %v2816_v22 = vsel %vm1095_vm0, %v6915_v15, %v4885_v25  ;;  %v2830_v29 = vpack.c.bf16 %v2818_v54, %v2817_v44  ;;  %v5208_v25 = vld [vmem:[%s5718_s5 + $0x48] sm:$0xff]  ;;  %v5209_v44 = vld [vmem:[%s5718_s5 + $0x50] sm:$0xff] }
 0x8aa   : > { %v2829_v35 = vpack.c.bf16 %v2816_v22, %v2815_v47  ;;  %v5210_v47 = vld [vmem:[%s5718_s5 + $0x58] sm:$0xff] }
 0x8ac   : > { %4709 = vmatprep.mubr.bf16.mxu0 %v2829_v35 }
 0x8ad   : > { %4710 = vmatmul.mubr.bf16.gmra.mrb[84].mxu0 %v2830_v29 }
 0x8da   : > { %v4898_v24 = vpop.permute.xlu0 %4897 }
 0x8db   : > { %v4900_v9 = vunpack.i.h.bf16 %v4898_v24  ;;  %v4899_v42 = vunpack.i.l.bf16 %v4898_v24  ;;  %v4893_v33 = vpop.permute.xlu1 %4892  ;;  %v5211_v24 = vld [vmem:[%s5718_s5 + $0x60] sm:$0xff] }
 0x8dc   : > { %v4895_v61 = vunpack.i.h.bf16 %v4893_v33  ;;  %v4894_v28 = vunpack.i.l.bf16 %v4893_v33 }
 0x8dd   : > { %v2821_v14 = vsel %vm1095_vm0, %v6917_v53, %v4899_v42  ;;  %v2822_v62 = vsel %vm1095_vm0, %v6921_v17, %v4900_v9 }
 0x8de   : > { %v2819_v45 = vsel %vm1095_vm0, %v6919_v8, %v4894_v28  ;;  %v2820_v15 = vsel %vm1095_vm0, %v6923_v1, %v4895_v61  ;;  %v2832_v50 = vpack.c.bf16 %v2822_v62, %v2821_v14  ;;  %v5212_v61 = vld [vmem:[%s5718_s5 + $0x68] sm:$0xff]  ;;  %v5213_v14 = vld [vmem:[%s5718_s5 + $0x70] sm:$0xff] }
 0x8df   : > { %v2831_v0 = vpack.c.bf16 %v2820_v15, %v2819_v45  ;;  %v5214_v45 = vld [vmem:[%s5718_s5 + $0x78] sm:$0xff] }
 0x8e1   : > { %4713 = vmatprep.mubr.bf16.mxu0 %v2831_v0  ;;  %v4969_v0 = vld [vmem:[#allocation7 + $0x4] ss:$8 sps:$4 sm:$0xff]  }
 0x8e2   : > { %4714 = vmatmul.mubr.bf16.gmra.mrb[88].mxu0 %v2832_v50  ;;  %v4967_v50 = vld [vmem:[#allocation7] ss:$8 sps:$4 sm:$0xff]   ;;  %3351 = vmatprep.subr.bf16.mxu1 %v4969_v0 }
 0x8e3   : > { %v4908_v59 = vpop.permute.xlu0 %4907  ;;  %3352 = vmatpush1.bf16.msra.mxu1 %v4967_v50 }
 0x8e4   : > { %v4910_v34 = vunpack.i.h.bf16 %v4908_v59  ;;  %v4909_v60 = vunpack.i.l.bf16 %v4908_v59  ;;  %v4903_v57 = vpop.permute.xlu1 %4902  ;;  %v4972_v59 = vld [vmem:[#allocation7 + $0x14] ss:$8 sps:$4 sm:$0xff]  }
 0x8e5   : > { %v4905_v46 = vunpack.i.h.bf16 %v4903_v57  ;;  %v4904_v53 = vunpack.i.l.bf16 %v4903_v57  ;;  %3353 = vmatprep.subr.bf16.mxu1 %v4972_v59 }
 0x8e6   : > { %v2825_v17 = vsel %vm1095_vm0, %v6928_v2, %v4909_v60  ;;  %v2826_v8 = vsel %vm1095_vm0, %v6933_v27, %v4910_v34  ;;  %v4970_v34 = vld [vmem:[#allocation7 + $0x10] ss:$8 sps:$4 sm:$0xff]  }
 0x8e7   : > { %v2823_v1 = vsel %vm1095_vm0, %v6931_v38, %v4904_v53  ;;  %v2824_v11 = vsel %vm1095_vm0, %v6937_v16, %v4905_v46  ;;  %v2834_v52 = vpack.c.bf16 %v2826_v8, %v2825_v17  ;;  %v5201_v38 = vld [vmem:[%s5718_s5 + $0x18] sm:$0xff]  ;;  %3354 = vmatpush1.bf16.msra.mxu1 %v4970_v34 }
 0x8e8   : > { %v2833_v13 = vpack.c.bf16 %v2824_v11, %v2823_v1 }
 0x8ea   : > { %4717 = vmatprep.mubr.bf16.mxu0 %v2833_v13 }
 0x8eb   : > { %4718 = vmatmul.mubr.bf16.gmra.mrb[92].mxu0 %v2834_v52 }
 0x978   : > { %v4707_v21 = vpop.f32.mrb[80].mxu0 }
 0x979   : > { %v2933_v55 = vpop.f32.mrb[81].mxu0  ;;  %v7288_v58 = vadd.f32 %v5202_v48, %v4707_v21 }
 0x97a   : > { %v7277_v6 = vadd.f32 %v5199_v18, %v2933_v55  ;;  %v4708_v2 = vpop.f32.mrb[82].mxu0 }
 0x97b   : > { %v2936_v27 = vpop.f32.mrb[83].mxu0  ;;  %v7284_v16 = vadd.f32 %v5201_v38, %v4708_v2 }
 0x97c   : > { %v7280_v4 = vadd.f32 %v5200_v39, %v2936_v27  ;;  %3014 = vadd.xlane.f32.xlu1 %v7277_v6 }
 0x97e   : > { %3016 = vadd.xlane.f32.xlu0 %v7280_v4 }
 0x980   : > { %3020 = vadd.xlane.f32.xlu1 %v7284_v16  ;;  %v4711_v56 = vpop.f32.mrb[84].mxu0 }
 0x981   : > { %v2949_v20 = vpop.f32.mrb[85].mxu0  ;;  %v7301_v19 = vadd.f32 %v5205_v26, %v4711_v56 }
 0x982   : > { %3018 = vadd.xlane.f32.xlu0 %v7288_v58  ;;  %v4712_v43 = vpop.f32.mrb[86].mxu0  ;;  %v7293_v51 = vadd.f32 %v5203_v23, %v2949_v20 }
 0x983   : > { %v2952_v12 = vpop.f32.mrb[87].mxu0  ;;  %v7304_v32 = vadd.f32 %v5206_v49, %v4712_v43 }
 0x984   : > { %v7296_v36 = vadd.f32 %v5204_v7, %v2952_v12 }
 0x986   : > { %3022 = vadd.xlane.f32.xlu0 %v7293_v51  ;;  %3024 = vadd.xlane.f32.xlu1 %v7296_v36 }
 0x98a   : > { %3026 = vadd.xlane.f32.xlu0 %v7301_v19  ;;  %3028 = vadd.xlane.f32.xlu1 %v7304_v32 }
 0x9b5   : > { %v4715_v63 = vpop.f32.mrb[88].mxu0 }
 0x9b6   : > { %v2965_v30 = vpop.f32.mrb[89].mxu0  ;;  %v7316_v54 = vadd.f32 %v5209_v44, %v4715_v63  ;;  %v4975_v63 = vld [vmem:[#allocation7 + $0x24] ss:$8 sps:$4 sm:$0xff]  }
 0x9b7   : > { %v7309_v31 = vadd.f32 %v5207_v5, %v2965_v30  ;;  %v4716_v40 = vpop.f32.mrb[90].mxu0  ;;  %v4973_v30 = vld [vmem:[#allocation7 + $0x20] ss:$8 sps:$4 sm:$0xff]   ;;  %3355 = vmatprep.subr.bf16.mxu1 %v4975_v63  ;;  %v4978_v5 = vld [vmem:[#allocation7 + $0x34] ss:$8 sps:$4 sm:$0xff]  }
 0x9b8   : > { %v2968_v37 = vpop.f32.mrb[91].mxu0  ;;  %v7320_v22 = vadd.f32 %v5210_v47, %v4716_v40  ;;  %3356 = vmatpush1.bf16.msra.mxu1 %v4973_v30  ;;  %v4979_v40 = vld [vmem:[#allocation7 + $0x40] ss:$8 sps:$4 sm:$0xff]   ;;  %v4987_v44 = vld [vmem:[#allocation7 + $0x64] ss:$8 sps:$4 sm:$0xff]  }
 0x9b9   : > { %v7312_v10 = vadd.f32 %v5208_v25, %v2968_v37  ;;  %3030 = vadd.xlane.f32.xlu0 %v7309_v31  ;;  %3357 = vmatprep.subr.bf16.mxu1 %v4978_v5  ;;  %v4984_v37 = vld [vmem:[#allocation7 + $0x54] ss:$8 sps:$4 sm:$0xff]   ;;  %v4982_v25 = vld [vmem:[#allocation7 + $0x50] ss:$8 sps:$4 sm:$0xff]   ;;  %v4985_v47 = vld [vmem:[#allocation7 + $0x60] ss:$8 sps:$4 sm:$0xff]  }
 0x9ba   : > { %v7446_v63 = vld [vmem:[#allocation8 + $0x68] sm:$0xff]  }
 0x9bb   : > { %3032 = vadd.xlane.f32.xlu1 %v7312_v10 }
 0x9bd   : > { %3034 = vadd.xlane.f32.xlu0 %v7316_v54 }
 0x9be   : > { %v4719_v29 = vpop.f32.mrb[92].mxu0 }
 0x9bf   : > { %3036 = vadd.xlane.f32.xlu1 %v7320_v22  ;;  %v2981_v35 = vpop.f32.mrb[93].mxu0  ;;  %v7332_v62 = vadd.f32 %v5213_v14, %v4719_v29  ;;  %v4990_v29 = vld [vmem:[#allocation7 + $0x74] ss:$8 sps:$4 sm:$0xff]  }
 0x9c0   : > { %v7325_v9 = vadd.f32 %v5211_v24, %v2981_v35  ;;  %v4720_v42 = vpop.f32.mrb[94].mxu0  ;;  %v4988_v35 = vld [vmem:[#allocation7 + $0x70] ss:$8 sps:$4 sm:$0xff]  }
 0x9c1   : > { %v2984_v33 = vpop.f32.mrb[95].mxu0  ;;  %v7336_v15 = vadd.f32 %v5214_v45, %v4720_v42 }
 0x9c2   : > { %v7328_v28 = vadd.f32 %v5212_v61, %v2984_v33  ;;  %3038 = vadd.xlane.f32.xlu0 %v7325_v9 }
 0x9c4   : > { %3040 = vadd.xlane.f32.xlu1 %v7328_v28 }
 0x9c6   : > { %3042 = vadd.xlane.f32.xlu0 %v7332_v62 }
 0x9c8   : > { %3044 = vadd.xlane.f32.xlu1 %v7336_v15 }
 0xa09   : > { %v3015_v60 = vpop.xlane.xlu1 %3014 }
 0xa0a   : > { %v3047_v57 = vmul.f32 0.0078125, %v3015_v60 }
 0xa0b   : > { %v3017_v46 = vpop.xlane.xlu0 %3016 }
 0xa0c   : > { %v7341_v53 = vsub.f32 %v7277_v6, %v3047_v57  ;;  %v3048_v17 = vmul.f32 0.0078125, %v3017_v46 }
 0xa0d   : > { %v3021_v8 = vpop.xlane.xlu1 %3020 }
 0xa0e   : > { %v7344_v1 = vsub.f32 %v7280_v4, %v3048_v17  ;;  %v3050_v11 = vmul.f32 0.0078125, %v3021_v8  ;;  %v3079_v52 = vmul.f32 %v7341_v53, %v7341_v53 }
 0xa0f   : > { %v3019_v13 = vpop.xlane.xlu0 %3018 }
 0xa10   : > { %v7349_v21 = vsub.f32 %v7284_v16, %v3050_v11  ;;  %v3049_v55 = vmul.f32 0.0078125, %v3019_v13  ;;  %3095 = vadd.xlane.f32.xlu0 %v3079_v52  ;;  %v3080_v18 = vmul.f32 %v7344_v1, %v7344_v1 }
 0xa12   : > { %v7354_v6 = vsub.f32 %v7288_v58, %v3049_v55  ;;  %3097 = vadd.xlane.f32.xlu1 %v3080_v18  ;;  %v3082_v16 = vmul.f32 %v7349_v21, %v7349_v21 }
 0xa13   : > { %v3023_v2 = vpop.xlane.xlu0 %3022  ;;  %v3025_v27 = vpop.xlane.xlu1 %3024 }
 0xa14   : > { %v3051_v39 = vmul.f32 0.0078125, %v3023_v2  ;;  %v3052_v4 = vmul.f32 0.0078125, %v3025_v27  ;;  %v3081_v38 = vmul.f32 %v7354_v6, %v7354_v6 }
 0xa16   : > { %v7361_v48 = vsub.f32 %v7293_v51, %v3051_v39  ;;  %v7364_v56 = vsub.f32 %v7296_v36, %v3052_v4  ;;  %3099 = vadd.xlane.f32.xlu0 %v3081_v38  ;;  %3101 = vadd.xlane.f32.xlu1 %v3082_v16 }
 0xa17   : > { %v3027_v58 = vpop.xlane.xlu0 %3026  ;;  %v3029_v20 = vpop.xlane.xlu1 %3028 }
 0xa18   : > { %v3053_v43 = vmul.f32 0.0078125, %v3027_v58  ;;  %v3054_v12 = vmul.f32 0.0078125, %v3029_v20  ;;  %v3083_v23 = vmul.f32 %v7361_v48, %v7361_v48  ;;  %v3084_v7 = vmul.f32 %v7364_v56, %v7364_v56  ;;  %v4991_v58 = vld [vmem:[#allocation8 + $0x40] sm:$0xff]   ;;  %v7422_v20 = vld [vmem:[#allocation8 + $0x48] sm:$0xff]  }
 0xa19   : > { %4401 = vmatprep.subr.bf16.mxu0 %v4991_v58 }
 0xa1a   : > { %v7371_v26 = vsub.f32 %v7301_v19, %v3053_v43  ;;  %v7374_v51 = vsub.f32 %v7304_v32, %v3054_v12  ;;  %3103 = vadd.xlane.f32.xlu0 %v3083_v23  ;;  %3105 = vadd.xlane.f32.xlu1 %v3084_v7  ;;  %v4976_v19 = vld [vmem:[#allocation7 + $0x30] ss:$8 sps:$4 sm:$0xff]   ;;  %v4981_v32 = vld [vmem:[#allocation7 + $0x44] ss:$8 sps:$4 sm:$0xff]  }
 0xa1b   : > { %3358 = vmatpush1.bf16.msra.mxu1 %v4976_v19  ;;  %v7428_v43 = vld [vmem:[#allocation8 + $0x50] sm:$0xff]   ;;  %v7434_v23 = vld [vmem:[#allocation8 + $0x58] sm:$0xff]  }
 0xa1c   : > { %v3085_v36 = vmul.f32 %v7371_v26, %v7371_v26  ;;  %v3086_v49 = vmul.f32 %v7374_v51, %v7374_v51  ;;  %3359 = vmatprep.subr.bf16.mxu1 %v4981_v32  ;;  %v7431_v12 = vld [vmem:[#allocation8 + $0x10] sm:$0xff]   ;;  %v7437_v7 = vld [vmem:[#allocation8 + $0x18] sm:$0xff]  }
 0xa1e   : > { %3107 = vadd.xlane.f32.xlu0 %v3085_v36  ;;  %3109 = vadd.xlane.f32.xlu1 %v3086_v49  ;;  %v7440_v36 = vld [vmem:[#allocation8 + $0x60] sm:$0xff]  }
 0xa1f   : > { %3360 = vmatpush1.bf16.msra.mxu1 %v4979_v40  ;;  %v7443_v49 = vld [vmem:[#allocation8 + $0x20] sm:$0xff]  }
 0xa20   : > { %3361 = vmatprep.subr.bf16.mxu1 %v4984_v37 }
 0xa23   : > { %3362 = vmatpush1.bf16.msra.mxu1 %v4982_v25 }
 0xa24   : > { %3363 = vmatprep.subr.bf16.mxu1 %v4987_v44 }
 0xa27   : > { %3364 = vmatpush1.bf16.msra.mxu1 %v4985_v47 }
 0xa28   : > { %3365 = vmatprep.subr.bf16.mxu1 %v4990_v29 }
 0xa2b   : > { %3366 = vmatpush1.bf16.msra.mxu1 %v4988_v35 }
 0xa2c   : > { %4721 = vmatprep.subr.bf16.mxu1 %v4991_v58 }
 0xa46   : > { %v3031_v24 = vpop.xlane.xlu0 %3030 }
 0xa47   : > { %v3055_v42 = vmul.f32 0.0078125, %v3031_v24 }
 0xa48   : > { %v3033_v33 = vpop.xlane.xlu1 %3032 }
 0xa49   : > { %v7381_v61 = vsub.f32 %v7309_v31, %v3055_v42  ;;  %v3056_v14 = vmul.f32 0.0078125, %v3033_v33 }
 0xa4a   : > { %v3035_v45 = vpop.xlane.xlu0 %3034 }
 0xa4b   : > { %v7384_v50 = vsub.f32 %v7312_v10, %v3056_v14  ;;  %v3057_v0 = vmul.f32 0.0078125, %v3035_v45  ;;  %v3087_v59 = vmul.f32 %v7381_v61, %v7381_v61 }
 0xa4c   : > { %v3037_v34 = vpop.xlane.xlu1 %3036 }
 0xa4d   : > { %v7389_v60 = vsub.f32 %v7316_v54, %v3057_v0  ;;  %v3058_v57 = vmul.f32 0.0078125, %v3037_v34  ;;  %3111 = vadd.xlane.f32.xlu0 %v3087_v59  ;;  %v3088_v46 = vmul.f32 %v7384_v50, %v7384_v50 }
 0xa4f   : > { %v7394_v31 = vsub.f32 %v7320_v22, %v3058_v57  ;;  %3113 = vadd.xlane.f32.xlu1 %v3088_v46  ;;  %v3039_v17 = vpop.xlane.xlu0 %3038  ;;  %v3089_v10 = vmul.f32 %v7389_v60, %v7389_v60 }
 0xa50   : > { %v3059_v8 = vmul.f32 0.0078125, %v3039_v17  ;;  %v7453_v17 = vld [vmem:[%s7914_s6] ss:$0 sm:$0xff] }
 0xa51   : > { %3115 = vadd.xlane.f32.xlu0 %v3089_v10  ;;  %v3041_v11 = vpop.xlane.xlu1 %3040  ;;  %v3090_v54 = vmul.f32 %v7394_v31, %v7394_v31 }
 0xa52   : > { %v7401_v52 = vsub.f32 %v7325_v9, %v3059_v8  ;;  %v3060_v13 = vmul.f32 0.0078125, %v3041_v11 }
 0xa53   : > { %3117 = vadd.xlane.f32.xlu1 %v3090_v54  ;;  %v3043_v55 = vpop.xlane.xlu0 %3042 }
 0xa54   : > { %v7404_v22 = vsub.f32 %v7328_v28, %v3060_v13  ;;  %v3061_v18 = vmul.f32 0.0078125, %v3043_v55  ;;  %v3091_v2 = vmul.f32 %v7401_v52, %v7401_v52 }
 0xa55   : > { %v3045_v27 = vpop.xlane.xlu1 %3044 }
 0xa56   : > { %v7409_v39 = vsub.f32 %v7332_v62, %v3061_v18  ;;  %v3062_v4 = vmul.f32 0.0078125, %v3045_v27  ;;  %3119 = vadd.xlane.f32.xlu0 %v3091_v2  ;;  %v3092_v9 = vmul.f32 %v7404_v22, %v7404_v22  ;;  %v7420_v62 = vld [vmem:[#allocation8] sm:$0xff]  }
 0xa57   : > { %4402 = vmatpush3.bf16.msra.mxu0 %v7420_v62  ;;  %v7461_v27 = vld [vmem:[%s8158_s9] ss:$0 sm:$0xff]  ;;  %s4272_s9 = sshll.u32 %s5531_s17, 11  ;;  %s3999_s17 = scalar_lea.sflag [#allocation4], %s5712_s29 }
 0xa58   : > { %v7414_v38 = vsub.f32 %v7336_v15, %v3062_v4  ;;  %3121 = vadd.xlane.f32.xlu1 %v3092_v9  ;;  %v3093_v28 = vmul.f32 %v7409_v39, %v7409_v39  ;;  %v7425_v15 = vld [vmem:[#allocation8 + $0x8] sm:$0xff]   ;;  %4403 = vmatprep.subr.bf16.mxu0 %v7422_v20  ;;  %s7859_s28 = scalar_lea.hbm %s8165_s26, %s4272_s9 }
 0xa5a   : > { %3123 = vadd.xlane.f32.xlu0 %v3093_v28  ;;  %v3094_v16 = vmul.f32 %v7414_v38, %v7414_v38 }
 0xa5b   : > { %4404 = vmatpush3.bf16.msra.mxu0 %v7425_v15 }
 0xa5c   : > { %3125 = vadd.xlane.f32.xlu1 %v3094_v16  ;;  %4405 = vmatprep.subr.bf16.mxu0 %v7428_v43 }
 0xa5f   : > { %4406 = vmatpush3.bf16.msra.mxu0 %v7431_v12 }
 0xa60   : > { %4407 = vmatprep.subr.bf16.mxu0 %v7434_v23 }
 0xa63   : > { %4408 = vmatpush3.bf16.msra.mxu0 %v7437_v7 }
 0xa64   : > { %4409 = vmatprep.subr.bf16.mxu0 %v7440_v36 }
 0xa67   : > { %4410 = vmatpush3.bf16.msra.mxu0 %v7443_v49 }
 0xa68   : > { %4411 = vmatprep.subr.bf16.mxu0 %v7446_v63 }
 0xa9d   : > { %v3096_v30 = vpop.xlane.xlu0 %3095 }
 0xa9e   : > { %v3127_v5 = vmul.f32 0.0078125, %v3096_v30 }
 0xa9f   : > { %v3098_v19 = vpop.xlane.xlu1 %3097 }
 0xaa0   : > { %v3143_v32 = vadd.f32 1e-05, %v3127_v5  ;;  %v3128_v40 = vmul.f32 0.0078125, %v3098_v19 }
 0xaa2   : > { %5135 = vrsqrt.f32 %v3143_v32  ;;  %v3144_v37 = vadd.f32 1e-05, %v3128_v40 }
 0xaa3   : > { %v3100_v25 = vpop.xlane.xlu0 %3099  ;;  %v3102_v44 = vpop.xlane.xlu1 %3101 }
 0xaa4   : > { %5137 = vrsqrt.f32 %v3144_v37  ;;  %v3129_v47 = vmul.f32 0.0078125, %v3100_v25  ;;  %v3130_v29 = vmul.f32 0.0078125, %v3102_v44 }
 0xaa6   : > { %v3145_v35 = vadd.f32 1e-05, %v3129_v47  ;;  %v3146_v24 = vadd.f32 1e-05, %v3130_v29 }
 0xaa7   : > { %v3104_v42 = vpop.xlane.xlu0 %3103  ;;  %v3106_v33 = vpop.xlane.xlu1 %3105 }
 0xaa8   : > { %5139 = vrsqrt.f32 %v3145_v35  ;;  %v3131_v14 = vmul.f32 0.0078125, %v3104_v42  ;;  %v3132_v45 = vmul.f32 0.0078125, %v3106_v33 }
 0xaa9   : > { %5141 = vrsqrt.f32 %v3146_v24 }
 0xaaa   : > { %v3147_v0 = vadd.f32 1e-05, %v3131_v14  ;;  %v3148_v59 = vadd.f32 1e-05, %v3132_v45 }
 0xaab   : > { %v3108_v34 = vpop.xlane.xlu0 %3107  ;;  %v3110_v57 = vpop.xlane.xlu1 %3109 }
 0xaac   : > { %v5136_v46 = vpop.eup %5135  ;;  %5143 = vrsqrt.f32 %v3147_v0  ;;  %v3133_v10 = vmul.f32 0.0078125, %v3108_v34  ;;  %v3134_v8 = vmul.f32 0.0078125, %v3110_v57 }
 0xaad   : > { %v3175_v11 = vmul.f32 %v5136_v46, %v7341_v53  ;;  %5145 = vrsqrt.f32 %v3148_v59 }
 0xaae   : > { %v5138_v54 = vpop.eup %5137  ;;  %v3149_v18 = vadd.f32 1e-05, %v3133_v10  ;;  %v3150_v2 = vadd.f32 1e-05, %v3134_v8 }
 0xaaf   : > { %v3197_v13 = vmul.f32 %v7453_v17, %v3175_v11  ;;  %v3176_v55 = vmul.f32 %v5138_v54, %v7344_v1 }
 0xab0   : > { %5147 = vrsqrt.f32 %v3149_v18 }
 0xab1   : > { %v3198_v4 = vmul.f32 %v7453_v17, %v3176_v55  ;;  %v7465_v53 = vadd.f32 %v7461_v27, %v3197_v13  ;;  %5149 = vrsqrt.f32 %v3150_v2 }
 0xab2   : > { %v5140_v9 = vpop.eup %5139 }
 0xab3   : > { %v5142_v28 = vpop.eup %5141  ;;  %v7468_v16 = vadd.f32 %v7461_v27, %v3198_v4  ;;  %v3177_v1 = vmul.f32 %v5140_v9, %v7354_v6 }
 0xab4   : > { %v3178_v58 = vmul.f32 %v5142_v28, %v7349_v21 }
 0xab5   : > { %v3235_v30 = vpack.c.bf16 %v7468_v16, %v7465_v53  ;;  %v3199_v5 = vmul.f32 %v7453_v17, %v3177_v1 }
 0xab6   : > { %v5144_v19 = vpop.eup %5143  ;;  %v3200_v32 = vmul.f32 %v7453_v17, %v3178_v58 }
 0xab7   : > { %v5146_v40 = vpop.eup %5145  ;;  %3384 = vmatmul.mubr.bf16.vlgmr.msra.gmra.mrb[64].mxu1 %v3235_v30  ;;  %v7479_v37 = vadd.f32 %v7461_v27, %v3199_v5  ;;  %v3179_v21 = vmul.f32 %v5144_v19, %v7361_v48 }
 0xab8   : > { %3393 = vmatprep.mubr.bf16.mxu1 %v8157_v41  ;;  %4729 = vmatpush3.bf16.msra.mxu1 %v7420_v62  ;;  %v7482_v6 = vadd.f32 %v7461_v27, %v3200_v32  ;;  %v3180_v25 = vmul.f32 %v5146_v40, %v7364_v56 }
 0xab9   : > { %4722 = vmatprep.subr.bf16.mxu1 %v7422_v20  ;;  %v3201_v62 = vmul.f32 %v7453_v17, %v3179_v21 }
 0xaba   : > { %v5148_v44 = vpop.eup %5147  ;;  %v3236_v47 = vpack.c.bf16 %v7482_v6, %v7479_v37  ;;  %v3202_v29 = vmul.f32 %v7453_v17, %v3180_v25 }
 0xabb   : > { %v5150_v35 = vpop.eup %5149  ;;  %v7496_v48 = vadd.f32 %v7461_v27, %v3201_v62  ;;  %v3181_v20 = vmul.f32 %v5148_v44, %v7371_v26 }
 0xabc   : > { %4730 = vmatpush3.bf16.msra.mxu1 %v7425_v15  ;;  %v7499_v56 = vadd.f32 %v7461_v27, %v3202_v29  ;;  %v3182_v15 = vmul.f32 %v5150_v35, %v7374_v51 }
 0xabd   : > { %4723 = vmatprep.subr.bf16.mxu1 %v7428_v43  ;;  %v3203_v24 = vmul.f32 %v7453_v17, %v3181_v20 }
 0xabe   : > { %v3237_v43 = vpack.c.bf16 %v7499_v56, %v7496_v48 }
 0xabf   : > { %3394 = vmatmul.mubr.bf16.gmra.mrb[68].mxu1 %v3236_v47  ;;  %v7513_v26 = vadd.f32 %v7461_v27, %v3203_v24 }
 0xac0   : > { %3403 = vmatprep.mubr.bf16.mxu1 %v8157_v41  ;;  %4731 = vmatpush3.bf16.msra.mxu1 %v7431_v12  ;;  %v3204_v12 = vmul.f32 %v7453_v17, %v3182_v15 }
 0xac1   : > { %4724 = vmatprep.subr.bf16.mxu1 %v7434_v23 }
 0xac2   : > { %v7516_v51 = vadd.f32 %v7461_v27, %v3204_v12 }
 0xac4   : > { %4732 = vmatpush3.bf16.msra.mxu1 %v7437_v7  ;;  %v3238_v23 = vpack.c.bf16 %v7516_v51, %v7513_v26 }
 0xac5   : > { %4725 = vmatprep.subr.bf16.mxu1 %v7440_v36 }
 0xac7   : > { %3404 = vmatmul.mubr.bf16.gmra.mrb[72].mxu1 %v3237_v43 }
 0xac8   : > { %3413 = vmatprep.mubr.bf16.mxu1 %v8157_v41  ;;  %4733 = vmatpush3.bf16.msra.mxu1 %v7443_v49 }
 0xac9   : > { %4726 = vmatprep.subr.bf16.mxu1 %v7446_v63 }
 0xacf   : > { %3414 = vmatmul.mubr.bf16.gmra.mrb[76].mxu1 %v3238_v23 }
 0xad0   : > { %3423 = vmatprep.mubr.bf16.mxu1 %v8157_v41 }
 0xada   : > { %v3112_v7 = vpop.xlane.xlu0 %3111 }
 0xadb   : > { %v3135_v36 = vmul.f32 0.0078125, %v3112_v7 }
 0xadc   : > { %v3114_v42 = vpop.xlane.xlu1 %3113 }
 0xadd   : > { %v3151_v33 = vadd.f32 1e-05, %v3135_v36  ;;  %v3136_v14 = vmul.f32 0.0078125, %v3114_v42 }
 0xade   : > { %v3116_v49 = vpop.xlane.xlu0 %3115 }
 0xadf   : > { %5151 = vrsqrt.f32 %v3151_v33  ;;  %v3152_v45 = vadd.f32 1e-05, %v3136_v14  ;;  %v3137_v0 = vmul.f32 0.0078125, %v3116_v49 }
 0xae0   : > { %v3118_v59 = vpop.xlane.xlu1 %3117 }
 0xae1   : > { %5153 = vrsqrt.f32 %v3152_v45  ;;  %v3153_v34 = vadd.f32 1e-05, %v3137_v0  ;;  %v3138_v57 = vmul.f32 0.0078125, %v3118_v59 }
 0xae3   : > { %5155 = vrsqrt.f32 %v3153_v34  ;;  %v3154_v63 = vadd.f32 1e-05, %v3138_v57  ;;  %v3120_v46 = vpop.xlane.xlu0 %3119  ;;  %v5003_v34 = vld [vmem:[#allocation8 + $0x70] sm:$0xff]  }
 0xae4   : > { %v3139_v10 = vmul.f32 0.0078125, %v3120_v46  ;;  %v5004_v57 = vld [vmem:[#allocation8 + $0x30] sm:$0xff]   ;;  %v8160_v46 = vld [vmem:[#allocation17_spill] sm:$0xff] }
 0xae5   : > { %5157 = vrsqrt.f32 %v3154_v63  ;;  %v3122_v8 = vpop.xlane.xlu1 %3121  ;;  %v3267_v63 = vsub.s32 1, %v5869_v3 }
 0xae6   : > { %v3140_v11 = vmul.f32 0.0078125, %v3122_v8  ;;  %v3155_v54 = vadd.f32 1e-05, %v3139_v10 }
 0xae7   : > { %v3124_v55 = vpop.xlane.xlu0 %3123 }
 0xae8   : > { %v3156_v13 = vadd.f32 1e-05, %v3140_v11  ;;  %v3141_v1 = vmul.f32 0.0078125, %v3124_v55 }
 0xae9   : > { %v5152_v18 = vpop.eup %5151  ;;  %v3126_v2 = vpop.xlane.xlu1 %3125 }
 0xaea   : > { %5159 = vrsqrt.f32 %v3156_v13  ;;  %v3142_v4 = vmul.f32 0.0078125, %v3126_v2  ;;  %v3183_v9 = vmul.f32 %v5152_v18, %v7381_v61  ;;  %v3157_v21 = vadd.f32 1e-05, %v3141_v1 }
 0xaeb   : > { %v5154_v28 = vpop.eup %5153  ;;  %5161 = vrsqrt.f32 %v3155_v54 }
 0xaec   : > { %v3184_v58 = vmul.f32 %v5154_v28, %v7384_v50  ;;  %v3205_v30 = vmul.f32 %v7453_v17, %v3183_v9  ;;  %v3158_v19 = vadd.f32 1e-05, %v3142_v4 }
 0xaed   : > { %v5156_v5 = vpop.eup %5155 }
 0xaee   : > { %v3206_v32 = vmul.f32 %v7453_v17, %v3184_v58  ;;  %v7527_v25 = vadd.f32 %v7461_v27, %v3205_v30  ;;  %v3185_v61 = vmul.f32 %v5156_v5, %v7389_v60  ;;  %5163 = vrsqrt.f32 %v3158_v19 }
 0xaef   : > { %v5158_v40 = vpop.eup %5157  ;;  %5165 = vrsqrt.f32 %v3157_v21 }
 0xaf0   : > { %v7530_v44 = vadd.f32 %v7461_v27, %v3206_v32  ;;  %v3186_v47 = vmul.f32 %v5158_v40, %v7394_v31  ;;  %v3207_v35 = vmul.f32 %v7453_v17, %v3185_v61 }
 0xaf2   : > { %v3239_v50 = vpack.c.bf16 %v7530_v44, %v7527_v25  ;;  %v3208_v62 = vmul.f32 %v7453_v17, %v3186_v47  ;;  %v7544_v31 = vadd.f32 %v7461_v27, %v3207_v35 }
 0xaf4   : > { %v5160_v29 = vpop.eup %5159  ;;  %3424 = vmatmul.mubr.bf16.gmra.mrb[80].mxu1 %v3239_v50  ;;  %v7540_v15 = vadd.f32 %v7461_v27, %v3208_v62 }
 0xaf5   : > { %v5162_v20 = vpop.eup %5161  ;;  %3433 = vmatprep.mubr.bf16.mxu1 %v8157_v41  ;;  %v3188_v60 = vmul.f32 %v5160_v29, %v7404_v22 }
 0xaf6   : > { %v3187_v43 = vmul.f32 %v5162_v20, %v7401_v52  ;;  %v3240_v24 = vpack.c.bf16 %v7540_v15, %v7544_v31 }
 0xaf7   : > { %v3210_v12 = vmul.f32 %v7453_v17, %v3188_v60 }
 0xaf8   : > { %v5164_v23 = vpop.eup %5163  ;;  %v3209_v7 = vmul.f32 %v7453_v17, %v3187_v43 }
 0xaf9   : > { %v5166_v36 = vpop.eup %5165  ;;  %v7553_v42 = vadd.f32 %v7461_v27, %v3210_v12  ;;  %v3190_v22 = vmul.f32 %v5164_v23, %v7414_v38 }
 0xafa   : > { %v7557_v33 = vadd.f32 %v7461_v27, %v3209_v7  ;;  %v3189_v52 = vmul.f32 %v5166_v36, %v7409_v39  ;;  %v5002_v39 = vld [vmem:[#allocation8 + $0x28] sm:$0xff]  }
 0xafb   : > { %v3212_v49 = vmul.f32 %v7453_v17, %v3190_v22  ;;  %4412 = vmatpush3.bf16.msra.mxu0 %v5002_v39  ;;  %4734 = vmatpush3.bf16.msra.mxu1 %v5002_v39 }
 0xafc   : > { %3434 = vmatmul.mubr.bf16.gmra.mrb[84].mxu1 %v3240_v24  ;;  %v3241_v14 = vpack.c.bf16 %v7553_v42, %v7557_v33  ;;  %v3211_v45 = vmul.f32 %v7453_v17, %v3189_v52  ;;  %4413 = vmatprep.subr.bf16.mxu0 %v5003_v34  ;;  %v5005_v17 = vld [vmem:[#allocation8 + $0x78] sm:$0xff]  }
 0xafd   : > { %3443 = vmatprep.mubr.bf16.mxu1 %v8157_v41  ;;  %v7566_v0 = vadd.f32 %v7461_v27, %v3212_v49  ;;  %4727 = vmatprep.subr.bf16.mxu1 %v5003_v34 }
 0xafe   : > { %v7569_v38 = vadd.f32 %v7461_v27, %v3211_v45  ;;  %v3259_v27 = vld [vmem:[%s8159_s14] sm:$0x3] }
 0xaff   : > { %4414 = vmatpush3.bf16.msra.mxu0 %v5004_v57  ;;  %4735 = vmatpush3.bf16.msra.mxu1 %v5004_v57  ;;  %v7578_v10 = vrot.slane %v3259_v27, %v8160_v46  ;;  %v7580_v8 = vrot.slane %v3259_v27, %v3267_v63 }
 0xb00   : > { %v3242_v59 = vpack.c.bf16 %v7566_v0, %v7569_v38  ;;  %4415 = vmatprep.subr.bf16.mxu0 %v5005_v17  ;;  %4728 = vmatprep.subr.bf16.mxu1 %v5005_v17 }
 0xb04   : > { %3444 = vmatmul.mubr.bf16.gmra.mrb[88].mxu1 %v3241_v14 }
 0xb05   : > { %3453 = vmatprep.mubr.bf16.mxu1 %v8157_v41  ;;  %v5006_v41 = vld [vmem:[#allocation8 + $0x38] sm:$0xff]  }
 0xb06   : > { %4416 = vmatpush3.bf16.msra.mxu0 %v5006_v41  ;;  %4736 = vmatpush3.bf16.msra.mxu1 %v5006_v41 }
 0xb0c   : > { %3454 = vmatmul.mubr.bf16.gmra.mrb[92].mxu1 %v3242_v59 }
 0xb8a   : > { %v3385_v11 = vpop.f32.mrb[64].mxu1 }
 0xb8b   : > { %v3386_v54 = vadd.f32 %v3385_v11, %v7578_v10  ;;  %v3387_v13 = vpop.f32.mrb[65].mxu1 }
 0xb8c   : > { %v3388_v55 = vadd.f32 %v3387_v13, %v7580_v8  ;;  %v3389_v18 = vpop.f32.mrb[66].mxu1 }
 0xb8d   : > { %v3390_v2 = vadd.f32 %v3389_v18, %v7578_v10  ;;  %v3391_v4 = vpop.f32.mrb[67].mxu1  ;;  %v3464_v28 = vmax.f32 %v3386_v54, 0.0 }
 0xb8e   : > { %v3392_v9 = vadd.f32 %v3391_v4, %v7580_v8  ;;  %v3465_v3 = vmax.f32 %v3388_v55, 0.0 }
 0xb8f   : > { %v3466_v1 = vmax.f32 %v3390_v2, 0.0 }
 0xb90   : > { %v3467_v58 = vmax.f32 %v3392_v9, 0.0 }
 0xb91   : > { %v3496_v30 = vpack.c.bf16 %v3466_v1, %v3464_v28 }
 0xb92   : > { %v3497_v5 = vpack.c.bf16 %v3467_v58, %v3465_v3  ;;  %v3395_v19 = vpop.f32.mrb[68].mxu1 }
 0xb93   : > { %v3396_v32 = vadd.f32 %v3395_v19, %v7578_v10  ;;  %v3397_v40 = vpop.f32.mrb[69].mxu1 }
 0xb94   : > { %v3398_v21 = vadd.f32 %v3397_v40, %v7580_v8  ;;  %v3399_v61 = vpop.f32.mrb[70].mxu1  ;;  %3679 = vmatprep.mubr.bf16.mxu0 %v3497_v5 }
 0xb95   : > { %v3400_v47 = vadd.f32 %v3399_v61, %v7578_v10  ;;  %v3401_v50 = vpop.f32.mrb[71].mxu1  ;;  %3680 = vmatmul.mubr.bf16.vlgmr.msra.gmra.mrb[96].mxu0 %v3496_v30  ;;  %v3468_v29 = vmax.f32 %v3396_v32, 0.0 }
 0xb96   : > { %v3402_v62 = vadd.f32 %v3401_v50, %v7580_v8  ;;  %v3469_v20 = vmax.f32 %v3398_v21, 0.0 }
 0xb97   : > { %v3470_v35 = vmax.f32 %v3400_v47, 0.0 }
 0xb98   : > { %v3471_v60 = vmax.f32 %v3402_v62, 0.0 }
 0xb99   : > { %v3498_v43 = vpack.c.bf16 %v3470_v35, %v3468_v29 }
 0xb9a   : > { %v3499_v24 = vpack.c.bf16 %v3471_v60, %v3469_v20  ;;  %v3405_v12 = vpop.f32.mrb[72].mxu1 }
 0xb9b   : > { %v3406_v23 = vadd.f32 %v3405_v12, %v7578_v10  ;;  %v3407_v7 = vpop.f32.mrb[73].mxu1 }
 0xb9c   : > { %v3408_v36 = vadd.f32 %v3407_v7, %v7580_v8  ;;  %v3409_v22 = vpop.f32.mrb[74].mxu1  ;;  %3687 = vmatprep.mubr.bf16.mxu0 %v3499_v24 }
 0xb9d   : > { %v3410_v52 = vadd.f32 %v3409_v22, %v7578_v10  ;;  %v3411_v14 = vpop.f32.mrb[75].mxu1  ;;  %3688 = vmatmul.mubr.bf16.gmra.mrb[100].mxu0 %v3498_v43  ;;  %v3472_v45 = vmax.f32 %v3406_v23, 0.0 }
 0xb9e   : > { %v3412_v49 = vadd.f32 %v3411_v14, %v7580_v8  ;;  %v3473_v39 = vmax.f32 %v3408_v36, 0.0 }
 0xb9f   : > { %v3474_v59 = vmax.f32 %v3410_v52, 0.0 }
 0xba0   : > { %v3475_v34 = vmax.f32 %v3412_v49, 0.0 }
 0xba1   : > { %v3500_v57 = vpack.c.bf16 %v3474_v59, %v3472_v45 }
 0xba2   : > { %v3501_v17 = vpack.c.bf16 %v3475_v34, %v3473_v39  ;;  %v3415_v41 = vpop.f32.mrb[76].mxu1 }
 0xba3   : > { %v3416_v27 = vadd.f32 %v3415_v41, %v7578_v10  ;;  %v3417_v63 = vpop.f32.mrb[77].mxu1 }
 0xba4   : > { %v3418_v46 = vadd.f32 %v3417_v63, %v7580_v8  ;;  %v3419_v11 = vpop.f32.mrb[78].mxu1  ;;  %3695 = vmatprep.mubr.bf16.mxu0 %v3501_v17 }
 0xba5   : > { %v3420_v54 = vadd.f32 %v3419_v11, %v7578_v10  ;;  %v3421_v13 = vpop.f32.mrb[79].mxu1  ;;  %3696 = vmatmul.mubr.bf16.gmra.mrb[104].mxu0 %v3500_v57  ;;  %v3476_v18 = vmax.f32 %v3416_v27, 0.0 }
 0xba6   : > { %v3422_v55 = vadd.f32 %v3421_v13, %v7580_v8  ;;  %v3477_v4 = vmax.f32 %v3418_v46, 0.0 }
 0xba7   : > { %v3478_v2 = vmax.f32 %v3420_v54, 0.0 }
 0xba8   : > { %v3479_v9 = vmax.f32 %v3422_v55, 0.0 }
 0xba9   : > { %v3502_v28 = vpack.c.bf16 %v3478_v2, %v3476_v18 }
 0xbaa   : > { %v3503_v1 = vpack.c.bf16 %v3479_v9, %v3477_v4 }
 0xbac   : > { %3703 = vmatprep.mubr.bf16.mxu0 %v3503_v1 }
 0xbad   : > { %3704 = vmatmul.mubr.bf16.gmra.mrb[108].mxu0 %v3502_v28 }
 0xbc7   : > { %v3425_v3 = vpop.f32.mrb[80].mxu1 }
 0xbc8   : > { %v3426_v58 = vadd.f32 %v3425_v3, %v7578_v10  ;;  %v3427_v30 = vpop.f32.mrb[81].mxu1 }
 0xbc9   : > { %v3428_v5 = vadd.f32 %v3427_v30, %v7580_v8  ;;  %v3429_v19 = vpop.f32.mrb[82].mxu1 }
 0xbca   : > { %v3430_v32 = vadd.f32 %v3429_v19, %v7578_v10  ;;  %v3431_v40 = vpop.f32.mrb[83].mxu1  ;;  %v3480_v61 = vmax.f32 %v3426_v58, 0.0 }
 0xbcb   : > { %v3432_v21 = vadd.f32 %v3431_v40, %v7580_v8  ;;  %v3481_v50 = vmax.f32 %v3428_v5, 0.0 }
 0xbcc   : > { %v3482_v47 = vmax.f32 %v3430_v32, 0.0 }
 0xbcd   : > { %v3483_v62 = vmax.f32 %v3432_v21, 0.0 }
 0xbce   : > { %v3504_v29 = vpack.c.bf16 %v3482_v47, %v3480_v61 }
 0xbcf   : > { %v3505_v35 = vpack.c.bf16 %v3483_v62, %v3481_v50  ;;  %v3435_v20 = vpop.f32.mrb[84].mxu1  ;;  %v7617_v62 = vld [vmem:[%s8161_s27] ss:$0 sm:$0xff]  ;;  %s5329_s27 = scalar_lea.vmem %s7861_s18, 2048 }
 0xbd0   : > { %v3436_v60 = vadd.f32 %v3435_v20, %v7578_v10  ;;  %v3437_v43 = vpop.f32.mrb[85].mxu1  ;;  %p5330_p10 = scmp.ne.s32.totalorder %s7861_s18, %s5329_s27 }
 0xbd1   : > { %v3438_v24 = vadd.f32 %v3437_v43, %v7580_v8  ;;  %v3439_v12 = vpop.f32.mrb[86].mxu1  ;;  %3711 = vmatprep.mubr.bf16.mxu0 %v3505_v35 }
 0xbd2   : > { %v3440_v23 = vadd.f32 %v3439_v12, %v7578_v10  ;;  %v3441_v7 = vpop.f32.mrb[87].mxu1  ;;  %3712 = vmatmul.mubr.bf16.gmra.mrb[112].mxu0 %v3504_v29  ;;  %v3484_v22 = vmax.f32 %v3436_v60, 0.0  ;;  %p5331_p3 = pnand %p5330_p10, %p5661_p5 }
 0xbd3   : > { %v3442_v36 = vadd.f32 %v3441_v7, %v7580_v8  ;;  %v3485_v14 = vmax.f32 %v3438_v24, 0.0 }
 0xbd4   : > { %v3486_v52 = vmax.f32 %v3440_v23, 0.0  ;;  %p5332_p7 = pneg %p5331_p3 }
 0xbd5   : > { %v3487_v49 = vmax.f32 %v3442_v36, 0.0 }
 0xbd6   : > { %v3506_v45 = vpack.c.bf16 %v3486_v52, %v3484_v22 }
 0xbd7   : > { %v3507_v59 = vpack.c.bf16 %v3487_v49, %v3485_v14  ;;  %v3445_v39 = vpop.f32.mrb[88].mxu1 }
 0xbd8   : > { %v3446_v34 = vadd.f32 %v3445_v39, %v7578_v10  ;;  %v3447_v57 = vpop.f32.mrb[89].mxu1 }
 0xbd9   : > { %v3448_v17 = vadd.f32 %v3447_v57, %v7580_v8  ;;  %v3449_v41 = vpop.f32.mrb[90].mxu1  ;;  %3719 = vmatprep.mubr.bf16.mxu0 %v3507_v59 }
 0xbda   : > { %v3450_v27 = vadd.f32 %v3449_v41, %v7578_v10  ;;  %v3451_v63 = vpop.f32.mrb[91].mxu1  ;;  %3720 = vmatmul.mubr.bf16.gmra.mrb[116].mxu0 %v3506_v45  ;;  %v3488_v11 = vmax.f32 %v3446_v34, 0.0 }
 0xbdb   : > { %v3452_v46 = vadd.f32 %v3451_v63, %v7580_v8  ;;  %v3489_v13 = vmax.f32 %v3448_v17, 0.0 }
 0xbdc   : > { %v3490_v54 = vmax.f32 %v3450_v27, 0.0 }
 0xbdd   : > { %v3491_v55 = vmax.f32 %v3452_v46, 0.0 }
 0xbde   : > { %v3508_v18 = vpack.c.bf16 %v3490_v54, %v3488_v11 }
 0xbdf   : > { %v3509_v2 = vpack.c.bf16 %v3491_v55, %v3489_v13  ;;  %v3455_v4 = vpop.f32.mrb[92].mxu1 }
 0xbe0   : > { %v3456_v9 = vadd.f32 %v3455_v4, %v7578_v10  ;;  %v3457_v28 = vpop.f32.mrb[93].mxu1 }
 0xbe1   : > { %v3458_v1 = vadd.f32 %v3457_v28, %v7580_v8  ;;  %v3459_v3 = vpop.f32.mrb[94].mxu1  ;;  %3727 = vmatprep.mubr.bf16.mxu1 %v3509_v2 }
 0xbe2   : > { %v3460_v58 = vadd.f32 %v3459_v3, %v7578_v10  ;;  %v3461_v30 = vpop.f32.mrb[95].mxu1  ;;  %3728 = vmatmul.mubr.bf16.vlgmr.msra.gmra.mrb[96].mxu1 %v3508_v18  ;;  %v3492_v19 = vmax.f32 %v3456_v9, 0.0 }
 0xbe3   : > { %v3462_v5 = vadd.f32 %v3461_v30, %v7580_v8  ;;  %v3493_v40 = vmax.f32 %v3458_v1, 0.0 }
 0xbe4   : > { %v3494_v32 = vmax.f32 %v3460_v58, 0.0 }
 0xbe5   : > { %v3495_v21 = vmax.f32 %v3462_v5, 0.0 }
 0xbe6   : > { %v3510_v61 = vpack.c.bf16 %v3494_v32, %v3492_v19 }
 0xbe7   : > { %v3511_v47 = vpack.c.bf16 %v3495_v21, %v3493_v40 }
 0xbe9   : > { %3735 = vmatprep.mubr.bf16.mxu1 %v3511_v47 }
 0xbea   : > { %3736 = vmatmul.mubr.bf16.gmra.mrb[100].mxu1 %v3510_v61 }
 0xc68   : > { %v4417_v50 = vpop.f32.mrb[96].mxu0 }
 0xc69   : > { %v4418_v29 = vpop.f32.mrb[97].mxu0 }
 0xc6a   : > { %v4419_v10 = vadd.f32 %v4418_v29, %v4417_v50  ;;  %v4420_v35 = vpop.f32.mrb[98].mxu0 }
 0xc6b   : > { %v4421_v20 = vpop.f32.mrb[99].mxu0 }
 0xc6c   : > { %v3682_v8 = vadd.f32 %v4419_v10, %v7617_v62  ;;  %v4422_v60 = vadd.f32 %v4421_v20, %v4420_v35 }
 0xc6e   : > { %v3685_v43 = vadd.f32 %v4422_v60, %v7617_v62  ;;  %v7622_v24 = vadd.f32 %v3682_v8, %v7465_v53 }
 0xc70   : > { %3762 = vadd.xlane.f32.xlu0 %v7622_v24  ;;  %v4423_v12 = vpop.f32.mrb[100].mxu0  ;;  %v7626_v23 = vadd.f32 %v3685_v43, %v7468_v16 }
 0xc71   : > { %v4424_v7 = vpop.f32.mrb[101].mxu0 }
 0xc72   : > { %v4425_v36 = vadd.f32 %v4424_v7, %v4423_v12  ;;  %3764 = vadd.xlane.f32.xlu1 %v7626_v23  ;;  %v4426_v22 = vpop.f32.mrb[102].mxu0 }
 0xc73   : > { %v4427_v52 = vpop.f32.mrb[103].mxu0 }
 0xc74   : > { %v3690_v14 = vadd.f32 %v4425_v36, %v7617_v62  ;;  %v4428_v49 = vadd.f32 %v4427_v52, %v4426_v22 }
 0xc76   : > { %v3693_v45 = vadd.f32 %v4428_v49, %v7617_v62  ;;  %v7632_v53 = vadd.f32 %v3690_v14, %v7479_v37 }
 0xc78   : > { %3766 = vadd.xlane.f32.xlu0 %v7632_v53  ;;  %v4429_v59 = vpop.f32.mrb[104].mxu0  ;;  %v7636_v16 = vadd.f32 %v3693_v45, %v7482_v6 }
 0xc79   : > { %v4430_v39 = vpop.f32.mrb[105].mxu0 }
 0xc7a   : > { %v4431_v34 = vadd.f32 %v4430_v39, %v4429_v59  ;;  %3768 = vadd.xlane.f32.xlu1 %v7636_v16  ;;  %v4432_v57 = vpop.f32.mrb[106].mxu0 }
 0xc7b   : > { %v4433_v17 = vpop.f32.mrb[107].mxu0 }
 0xc7c   : > { %v3698_v41 = vadd.f32 %v4431_v34, %v7617_v62  ;;  %v4434_v27 = vadd.f32 %v4433_v17, %v4432_v57 }
 0xc7e   : > { %v3701_v63 = vadd.f32 %v4434_v27, %v7617_v62  ;;  %v7642_v37 = vadd.f32 %v3698_v41, %v7496_v48 }
 0xc80   : > { %3770 = vadd.xlane.f32.xlu0 %v7642_v37  ;;  %v4435_v46 = vpop.f32.mrb[108].mxu0  ;;  %v7646_v6 = vadd.f32 %v3701_v63, %v7499_v56 }
 0xc81   : > { %v4436_v11 = vpop.f32.mrb[109].mxu0 }
 0xc82   : > { %v4437_v54 = vadd.f32 %v4436_v11, %v4435_v46  ;;  %3772 = vadd.xlane.f32.xlu1 %v7646_v6  ;;  %v4438_v13 = vpop.f32.mrb[110].mxu0 }
 0xc83   : > { %v4439_v55 = vpop.f32.mrb[111].mxu0 }
 0xc84   : > { %v3706_v18 = vadd.f32 %v4437_v54, %v7617_v62  ;;  %v4440_v2 = vadd.f32 %v4439_v55, %v4438_v13 }
 0xc86   : > { %v3709_v4 = vadd.f32 %v4440_v2, %v7617_v62  ;;  %v7652_v48 = vadd.f32 %v3706_v18, %v7513_v26 }
 0xc88   : > { %3774 = vadd.xlane.f32.xlu0 %v7652_v48  ;;  %v7656_v9 = vadd.f32 %v3709_v4, %v7516_v51 }
 0xc8a   : > { %3776 = vadd.xlane.f32.xlu1 %v7656_v9 }
 0xca5   : > { %v4441_v56 = vpop.f32.mrb[112].mxu0 }
 0xca6   : > { %v4442_v28 = vpop.f32.mrb[113].mxu0 }
 0xca7   : > { %v4443_v1 = vadd.f32 %v4442_v28, %v4441_v56  ;;  %v4444_v3 = vpop.f32.mrb[114].mxu0 }
 0xca8   : > { %v4445_v58 = vpop.f32.mrb[115].mxu0 }
 0xca9   : > { %v3714_v30 = vadd.f32 %v4443_v1, %v7617_v62  ;;  %v4446_v5 = vadd.f32 %v4445_v58, %v4444_v3 }
 0xcab   : > { %v3717_v19 = vadd.f32 %v4446_v5, %v7617_v62  ;;  %v7662_v26 = vadd.f32 %v3714_v30, %v7527_v25 }
 0xcad   : > { %3778 = vadd.xlane.f32.xlu0 %v7662_v26  ;;  %v4447_v32 = vpop.f32.mrb[116].mxu0  ;;  %v7666_v51 = vadd.f32 %v3717_v19, %v7530_v44 }
 0xcae   : > { %v4448_v40 = vpop.f32.mrb[117].mxu0 }
 0xcaf   : > { %v4449_v21 = vadd.f32 %v4448_v40, %v4447_v32  ;;  %3780 = vadd.xlane.f32.xlu1 %v7666_v51  ;;  %v4450_v61 = vpop.f32.mrb[118].mxu0 }
 0xcb0   : > { %v4451_v47 = vpop.f32.mrb[119].mxu0 }
 0xcb1   : > { %v3722_v50 = vadd.f32 %v4449_v21, %v7617_v62  ;;  %v4452_v29 = vadd.f32 %v4451_v47, %v4450_v61 }
 0xcb3   : > { %v3725_v10 = vadd.f32 %v4452_v29, %v7617_v62  ;;  %v7672_v25 = vadd.f32 %v3722_v50, %v7544_v31 }
 0xcb5   : > { %3782 = vadd.xlane.f32.xlu0 %v7672_v25  ;;  %v4453_v35 = vpop.f32.mrb[96].mxu1  ;;  %v7676_v44 = vadd.f32 %v3725_v10, %v7540_v15 }
 0xcb6   : > { %v4454_v20 = vpop.f32.mrb[97].mxu1 }
 0xcb7   : > { %v4455_v8 = vadd.f32 %v4454_v20, %v4453_v35  ;;  %3784 = vadd.xlane.f32.xlu1 %v7676_v44  ;;  %v4456_v60 = vpop.f32.mrb[98].mxu1 }
 0xcb8   : > { %v4457_v43 = vpop.f32.mrb[99].mxu1 }
 0xcb9   : > { %v3730_v12 = vadd.f32 %v4455_v8, %v7617_v62  ;;  %v4458_v7 = vadd.f32 %v4457_v43, %v4456_v60 }
 0xcbb   : > { %v3733_v36 = vadd.f32 %v4458_v7, %v7617_v62  ;;  %v7682_v31 = vadd.f32 %v3730_v12, %v7557_v33 }
 0xcbd   : > { %3786 = vadd.xlane.f32.xlu0 %v7682_v31  ;;  %v4459_v22 = vpop.f32.mrb[100].mxu1  ;;  %v7686_v15 = vadd.f32 %v3733_v36, %v7553_v42 }
 0xcbe   : > { %v4460_v52 = vpop.f32.mrb[101].mxu1 }
 0xcbf   : > { %v4461_v14 = vadd.f32 %v4460_v52, %v4459_v22  ;;  %3788 = vadd.xlane.f32.xlu1 %v7686_v15  ;;  %v4462_v49 = vpop.f32.mrb[102].mxu1 }
 0xcc0   : > { %v4463_v45 = vpop.f32.mrb[103].mxu1 }
 0xcc1   : > { %v3738_v59 = vadd.f32 %v4461_v14, %v7617_v62  ;;  %v4464_v39 = vadd.f32 %v4463_v45, %v4462_v49 }
 0xcc3   : > { %v3741_v34 = vadd.f32 %v4464_v39, %v7617_v62  ;;  %v7692_v33 = vadd.f32 %v3738_v59, %v7569_v38 }
 0xcc5   : > { %3790 = vadd.xlane.f32.xlu0 %v7692_v33  ;;  %v7696_v57 = vadd.f32 %v3741_v34, %v7566_v0 }
 0xcc7   : > { %3792 = vadd.xlane.f32.xlu1 %v7696_v57 }
 0xcfd   : > { %v3763_v42 = vpop.xlane.xlu0 %3762 }
 0xcfe   : > { %v3794_v17 = vmul.f32 0.0078125, %v3763_v42 }
 0xcff   : > { %v3765_v41 = vpop.xlane.xlu1 %3764 }
 0xd00   : > { %v7700_v27 = vsub.f32 %v7622_v24, %v3794_v17  ;;  %v3795_v63 = vmul.f32 0.0078125, %v3765_v41 }
 0xd02   : > { %v7703_v46 = vsub.f32 %v7626_v23, %v3795_v63  ;;  %v3826_v38 = vmul.f32 %v7700_v27, %v7700_v27 }
 0xd04   : > { %3842 = vadd.xlane.f32.xlu0 %v3826_v38  ;;  %v3827_v0 = vmul.f32 %v7703_v46, %v7703_v46 }
 0xd05   : > { %v3767_v62 = vpop.xlane.xlu0 %3766 }
 0xd06   : > { %v3796_v11 = vmul.f32 0.0078125, %v3767_v62  ;;  %3844 = vadd.xlane.f32.xlu1 %v3827_v0 }
 0xd07   : > { %v3769_v54 = vpop.xlane.xlu1 %3768 }
 0xd08   : > { %v7710_v13 = vsub.f32 %v7632_v53, %v3796_v11  ;;  %v3797_v24 = vmul.f32 0.0078125, %v3769_v54 }
 0xd0a   : > { %v7713_v55 = vsub.f32 %v7636_v16, %v3797_v24  ;;  %v3828_v23 = vmul.f32 %v7710_v13, %v7710_v13 }
 0xd0c   : > { %3846 = vadd.xlane.f32.xlu0 %v3828_v23  ;;  %v3829_v18 = vmul.f32 %v7713_v55, %v7713_v55 }
 0xd0d   : > { %v3771_v2 = vpop.xlane.xlu0 %3770 }
 0xd0e   : > { %v3798_v4 = vmul.f32 0.0078125, %v3771_v2  ;;  %3848 = vadd.xlane.f32.xlu1 %v3829_v18 }
 0xd0f   : > { %v3773_v56 = vpop.xlane.xlu1 %3772 }
 0xd10   : > { %v7720_v28 = vsub.f32 %v7642_v37, %v3798_v4  ;;  %v3799_v53 = vmul.f32 0.0078125, %v3773_v56  ;;  %v7782_v4 = vld [vmem:[%s8162_s23] ss:$0 sm:$0xff]  ;;  %s5335_s23 = scalar_lea.vmem %s5334_s25, 4096 }
 0xd11   : > { %p5337_p1 = scmp.lt.s32.totalorder %s5335_s23, %s5329_s27 }
 0xd12   : > { %v7723_v1 = vsub.f32 %v7646_v6, %v3799_v53  ;;  %v3830_v16 = vmul.f32 %v7720_v28, %v7720_v28 }
 0xd13   : > { %p5338_p2 = por %p5337_p1, %p5336_p12 }
 0xd14   : > { %3850 = vadd.xlane.f32.xlu0 %v3830_v16  ;;  %v3831_v3 = vmul.f32 %v7723_v1, %v7723_v1 }
 0xd15   : > { %v3775_v58 = vpop.xlane.xlu0 %3774  ;;  %p5339_p4 = pnand %p5338_p2, %p5332_p7 }
 0xd16   : > { %v3800_v30 = vmul.f32 0.0078125, %v3775_v58  ;;  %3852 = vadd.xlane.f32.xlu1 %v3831_v3  ;;  %v7788_v3 = vld [vmem:[%s8163_s12] ss:$0 sm:$0xff] }
 0xd17   : > { %v3777_v5 = vpop.xlane.xlu1 %3776 }
 0xd18   : > { %v7730_v19 = vsub.f32 %v7652_v48, %v3800_v30  ;;  %v3801_v37 = vmul.f32 0.0078125, %v3777_v5 }
 0xd1a   : > { %v7733_v32 = vsub.f32 %v7656_v9, %v3801_v37  ;;  %v3832_v6 = vmul.f32 %v7730_v19, %v7730_v19 }
 0xd1c   : > { %3854 = vadd.xlane.f32.xlu0 %v3832_v6  ;;  %v3833_v40 = vmul.f32 %v7733_v32, %v7733_v32 }
 0xd1e   : > { %3856 = vadd.xlane.f32.xlu1 %v3833_v40 }
 0xd3a   : > { %v3779_v21 = vpop.xlane.xlu0 %3778 }
 0xd3b   : > { %v3802_v61 = vmul.f32 0.0078125, %v3779_v21 }
 0xd3c   : > { %v3781_v47 = vpop.xlane.xlu1 %3780 }
 0xd3d   : > { %v7740_v50 = vsub.f32 %v7662_v26, %v3802_v61  ;;  %v3803_v48 = vmul.f32 0.0078125, %v3781_v47 }
 0xd3f   : > { %v7743_v29 = vsub.f32 %v7666_v51, %v3803_v48  ;;  %v3834_v9 = vmul.f32 %v7740_v50, %v7740_v50 }
 0xd41   : > { %3858 = vadd.xlane.f32.xlu0 %v3834_v9  ;;  %v3835_v10 = vmul.f32 %v7743_v29, %v7743_v29 }
 0xd42   : > { %v3783_v35 = vpop.xlane.xlu0 %3782 }
 0xd43   : > { %v3804_v20 = vmul.f32 0.0078125, %v3783_v35  ;;  %3860 = vadd.xlane.f32.xlu1 %v3835_v10 }
 0xd44   : > { %v3785_v8 = vpop.xlane.xlu1 %3784 }
 0xd45   : > { %v7750_v60 = vsub.f32 %v7672_v25, %v3804_v20  ;;  %v3805_v26 = vmul.f32 0.0078125, %v3785_v8 }
 0xd47   : > { %v7753_v43 = vsub.f32 %v7676_v44, %v3805_v26  ;;  %v3836_v51 = vmul.f32 %v7750_v60, %v7750_v60 }
 0xd49   : > { %3862 = vadd.xlane.f32.xlu0 %v3836_v51  ;;  %v3837_v12 = vmul.f32 %v7753_v43, %v7753_v43 }
 0xd4a   : > { %v3787_v7 = vpop.xlane.xlu0 %3786 }
 0xd4b   : > { %v3806_v36 = vmul.f32 0.0078125, %v3787_v7  ;;  %3864 = vadd.xlane.f32.xlu1 %v3837_v12 }
 0xd4c   : > { %v3789_v22 = vpop.xlane.xlu1 %3788 }
 0xd4d   : > { %v7760_v52 = vsub.f32 %v7682_v31, %v3806_v36  ;;  %v3807_v25 = vmul.f32 0.0078125, %v3789_v22 }
 0xd4f   : > { %v7763_v14 = vsub.f32 %v7686_v15, %v3807_v25  ;;  %v3838_v44 = vmul.f32 %v7760_v52, %v7760_v52 }
 0xd51   : > { %3866 = vadd.xlane.f32.xlu0 %v3838_v44  ;;  %v3839_v49 = vmul.f32 %v7763_v14, %v7763_v14 }
 0xd52   : > { %v3791_v45 = vpop.xlane.xlu0 %3790 }
 0xd53   : > { %v3808_v59 = vmul.f32 0.0078125, %v3791_v45  ;;  %3868 = vadd.xlane.f32.xlu1 %v3839_v49 }
 0xd54   : > { %v3793_v39 = vpop.xlane.xlu1 %3792 }
 0xd55   : > { %v7770_v34 = vsub.f32 %v7692_v33, %v3808_v59  ;;  %v3809_v31 = vmul.f32 0.0078125, %v3793_v39 }
 0xd57   : > { %v7773_v42 = vsub.f32 %v7696_v57, %v3809_v31  ;;  %v3840_v15 = vmul.f32 %v7770_v34, %v7770_v34 }
 0xd59   : > { %3870 = vadd.xlane.f32.xlu0 %v3840_v15  ;;  %v3841_v17 = vmul.f32 %v7773_v42, %v7773_v42 }
 0xd5b   : > { %3872 = vadd.xlane.f32.xlu1 %v3841_v17 }
 0xd91   : > { %v3843_v41 = vpop.xlane.xlu0 %3842 }
 0xd92   : > { %v3874_v63 = vmul.f32 0.0078125, %v3843_v41 }
 0xd93   : > { %v3845_v38 = vpop.xlane.xlu1 %3844 }
 0xd94   : > { %v3890_v0 = vadd.f32 1e-05, %v3874_v63  ;;  %v3875_v62 = vmul.f32 0.0078125, %v3845_v38 }
 0xd96   : > { %5167 = vrsqrt.f32 %v3890_v0  ;;  %v3891_v33 = vadd.f32 1e-05, %v3875_v62 }
 0xd98   : > { %5169 = vrsqrt.f32 %v3891_v33 }
 0xd99   : > { %v3847_v11 = vpop.xlane.xlu0 %3846 }
 0xd9a   : > { %v3876_v54 = vmul.f32 0.0078125, %v3847_v11 }
 0xd9b   : > { %v3849_v57 = vpop.xlane.xlu1 %3848 }
 0xd9c   : > { %v3892_v24 = vadd.f32 1e-05, %v3876_v54  ;;  %v3877_v23 = vmul.f32 0.0078125, %v3849_v57 }
 0xd9e   : > { %5171 = vrsqrt.f32 %v3892_v24  ;;  %v3893_v18 = vadd.f32 1e-05, %v3877_v23 }
 0xda0   : > { %v5168_v2 = vpop.eup %5167  ;;  %5173 = vrsqrt.f32 %v3893_v18 }
 0xda1   : > { %v3922_v56 = vmul.f32 %v5168_v2, %v7700_v27  ;;  %v3851_v53 = vpop.xlane.xlu0 %3850 }
 0xda2   : > { %v5170_v16 = vpop.eup %5169  ;;  %v3878_v58 = vmul.f32 0.0078125, %v3851_v53 }
 0xda3   : > { %v3944_v30 = vmul.f32 %v7782_v4, %v3922_v56  ;;  %v3923_v5 = vmul.f32 %v5170_v16, %v7703_v46  ;;  %v3853_v37 = vpop.xlane.xlu1 %3852 }
 0xda4   : > { %v3894_v6 = vadd.f32 1e-05, %v3878_v58  ;;  %v3879_v40 = vmul.f32 0.0078125, %v3853_v37 }
 0xda5   : > { %v3966_v21 = vadd.f32 %v7788_v3, %v3944_v30  ;;  %v3945_v61 = vmul.f32 %v7782_v4, %v3923_v5 }
 0xda6   : > { %5175 = vrsqrt.f32 %v3894_v6  ;;  %v3895_v27 = vadd.f32 1e-05, %v3879_v40 }
 0xda7   : > { %3982 = vst [vmem:[%s7796_s19] sm:$0xff] %v3966_v21  ;;  %v3967_v47 = vadd.f32 %v7788_v3, %v3945_v61 }
 0xda8   : > { %v5172_v48 = vpop.eup %5171  ;;  %5177 = vrsqrt.f32 %v3895_v27 }
 0xda9   : > { %3983 = vst [vmem:[%s7796_s19 + $0x8] sm:$0xff] %v3967_v47  ;;  %v3924_v46 = vmul.f32 %v5172_v48, %v7710_v13  ;;  %v3855_v9 = vpop.xlane.xlu0 %3854 }
 0xdaa   : > { %v5174_v10 = vpop.eup %5173  ;;  %v3880_v35 = vmul.f32 0.0078125, %v3855_v9 }
 0xdab   : > { %v3946_v20 = vmul.f32 %v7782_v4, %v3924_v46  ;;  %v3925_v8 = vmul.f32 %v5174_v10, %v7713_v55  ;;  %v3857_v26 = vpop.xlane.xlu1 %3856 }
 0xdac   : > { %v3896_v51 = vadd.f32 1e-05, %v3880_v35  ;;  %v3881_v12 = vmul.f32 0.0078125, %v3857_v26 }
 0xdad   : > { %v3968_v7 = vadd.f32 %v7788_v3, %v3946_v20  ;;  %v3947_v36 = vmul.f32 %v7782_v4, %v3925_v8 }
 0xdae   : > { %5179 = vrsqrt.f32 %v3896_v51  ;;  %v3897_v22 = vadd.f32 1e-05, %v3881_v12 }
 0xdaf   : > { %3984 = vst [vmem:[%s7796_s19 + $0x10] sm:$0xff] %v3968_v7  ;;  %v3969_v13 = vadd.f32 %v7788_v3, %v3947_v36 }
 0xdb0   : > { %v5176_v25 = vpop.eup %5175  ;;  %5181 = vrsqrt.f32 %v3897_v22 }
 0xdb1   : > { %3985 = vst [vmem:[%s7796_s19 + $0x18] sm:$0xff] %v3969_v13  ;;  %v3926_v44 = vmul.f32 %v5176_v25, %v7720_v28 }
 0xdb2   : > { %v5178_v55 = vpop.eup %5177 }
 0xdb3   : > { %v3948_v49 = vmul.f32 %v7782_v4, %v3926_v44  ;;  %v3927_v45 = vmul.f32 %v5178_v55, %v7723_v1 }
 0xdb5   : > { %v3970_v59 = vadd.f32 %v7788_v3, %v3948_v49  ;;  %v3949_v39 = vmul.f32 %v7782_v4, %v3927_v45 }
 0xdb7   : > { %3986 = vst [vmem:[%s7796_s19 + $0x20] sm:$0xff] %v3970_v59  ;;  %v3971_v31 = vadd.f32 %v7788_v3, %v3949_v39 }
 0xdb8   : > { %v5180_v15 = vpop.eup %5179 }
 0xdb9   : > { %3987 = vst [vmem:[%s7796_s19 + $0x28] sm:$0xff] %v3971_v31  ;;  %v3928_v17 = vmul.f32 %v5180_v15, %v7730_v19 }
 0xdba   : > { %v5182_v41 = vpop.eup %5181 }
 0xdbb   : > { %v3950_v28 = vmul.f32 %v7782_v4, %v3928_v17  ;;  %v3929_v63 = vmul.f32 %v5182_v41, %v7733_v32 }
 0xdbd   : > { %v3972_v38 = vadd.f32 %v7788_v3, %v3950_v28  ;;  %v3951_v1 = vmul.f32 %v7782_v4, %v3929_v63 }
 0xdbf   : > { %3988 = vst [vmem:[%s7796_s19 + $0x30] sm:$0xff] %v3972_v38  ;;  %v3973_v0 = vadd.f32 %v7788_v3, %v3951_v1 }
 0xdc1   : > { %3989 = vst [vmem:[%s7796_s19 + $0x38] sm:$0xff] %v3973_v0 }
 0xdce   : > { %v3859_v62 = vpop.xlane.xlu0 %3858 }
 0xdcf   : > { %v3882_v33 = vmul.f32 0.0078125, %v3859_v62 }
 0xdd0   : > { %v3861_v11 = vpop.xlane.xlu1 %3860 }
 0xdd1   : > { %v3898_v54 = vadd.f32 1e-05, %v3882_v33  ;;  %v3883_v57 = vmul.f32 0.0078125, %v3861_v11 }
 0xdd3   : > { %5183 = vrsqrt.f32 %v3898_v54  ;;  %v3899_v19 = vadd.f32 1e-05, %v3883_v57 }
 0xdd5   : > { %5185 = vrsqrt.f32 %v3899_v19 }
 0xdd6   : > { %v3863_v24 = vpop.xlane.xlu0 %3862 }
 0xdd7   : > { %v3884_v23 = vmul.f32 0.0078125, %v3863_v24 }
 0xdd8   : > { %v3865_v18 = vpop.xlane.xlu1 %3864 }
 0xdd9   : > { %v3900_v32 = vadd.f32 1e-05, %v3884_v23  ;;  %v3885_v2 = vmul.f32 0.0078125, %v3865_v18 }
 0xddb   : > { %5187 = vrsqrt.f32 %v3900_v32  ;;  %v3901_v56 = vadd.f32 1e-05, %v3885_v2 }
 0xddd   : > { %v5184_v53 = vpop.eup %5183  ;;  %5189 = vrsqrt.f32 %v3901_v56 }
 0xdde   : > { %v3930_v16 = vmul.f32 %v5184_v53, %v7740_v50  ;;  %v3867_v58 = vpop.xlane.xlu0 %3866 }
 0xddf   : > { %v5186_v30 = vpop.eup %5185  ;;  %v3886_v5 = vmul.f32 0.0078125, %v3867_v58 }
 0xde0   : > { %v3952_v37 = vmul.f32 %v7782_v4, %v3930_v16  ;;  %v3931_v6 = vmul.f32 %v5186_v30, %v7743_v29  ;;  %v3869_v40 = vpop.xlane.xlu1 %3868 }
 0xde1   : > { %v3902_v21 = vadd.f32 1e-05, %v3886_v5  ;;  %v3887_v61 = vmul.f32 0.0078125, %v3869_v40 }
 0xde2   : > { %v3974_v27 = vadd.f32 %v7788_v3, %v3952_v37  ;;  %v3953_v47 = vmul.f32 %v7782_v4, %v3931_v6 }
 0xde3   : > { %5191 = vrsqrt.f32 %v3902_v21  ;;  %v3903_v48 = vadd.f32 1e-05, %v3887_v61 }
 0xde4   : > { %3990 = vst [vmem:[%s7796_s19 + $0x40] sm:$0xff] %v3974_v27  ;;  %v3975_v50 = vadd.f32 %v7788_v3, %v3953_v47 }
 0xde5   : > { %v5188_v46 = vpop.eup %5187  ;;  %5193 = vrsqrt.f32 %v3903_v48 }
 0xde6   : > { %3991 = vst [vmem:[%s7796_s19 + $0x48] sm:$0xff] %v3975_v50  ;;  %v3932_v9 = vmul.f32 %v5188_v46, %v7750_v60  ;;  %v3871_v10 = vpop.xlane.xlu0 %3870 }
 0xde7   : > { %v5190_v29 = vpop.eup %5189  ;;  %v3888_v35 = vmul.f32 0.0078125, %v3871_v10 }
 0xde8   : > { %v3954_v20 = vmul.f32 %v7782_v4, %v3932_v9  ;;  %v3933_v8 = vmul.f32 %v5190_v29, %v7753_v43  ;;  %v3873_v26 = vpop.xlane.xlu1 %3872 }
 0xde9   : > { %v3904_v51 = vadd.f32 1e-05, %v3888_v35  ;;  %v3889_v12 = vmul.f32 0.0078125, %v3873_v26 }
 0xdea   : > { %v3976_v7 = vadd.f32 %v7788_v3, %v3954_v20  ;;  %v3955_v36 = vmul.f32 %v7782_v4, %v3933_v8 }
 0xdeb   : > { %5195 = vrsqrt.f32 %v3904_v51  ;;  %v3905_v22 = vadd.f32 1e-05, %v3889_v12 }
 0xdec   : > { %3992 = vst [vmem:[%s7796_s19 + $0x50] sm:$0xff] %v3976_v7  ;;  %v3977_v60 = vadd.f32 %v7788_v3, %v3955_v36 }
 0xded   : > { %v5192_v13 = vpop.eup %5191  ;;  %5197 = vrsqrt.f32 %v3905_v22 }
 0xdee   : > { %3993 = vst [vmem:[%s7796_s19 + $0x58] sm:$0xff] %v3977_v60  ;;  %v3934_v43 = vmul.f32 %v5192_v13, %v7760_v52 }
 0xdef   : > { %v5194_v25 = vpop.eup %5193 }
 0xdf0   : > { %v3956_v44 = vmul.f32 %v7782_v4, %v3934_v43  ;;  %v3935_v55 = vmul.f32 %v5194_v25, %v7763_v14 }
 0xdf2   : > { %v3978_v49 = vadd.f32 %v7788_v3, %v3956_v44  ;;  %v3957_v45 = vmul.f32 %v7782_v4, %v3935_v55 }
 0xdf4   : > { %3994 = vst [vmem:[%s7796_s19 + $0x60] sm:$0xff] %v3978_v49  ;;  %v3979_v59 = vadd.f32 %v7788_v3, %v3957_v45 }
 0xdf5   : > { %v5196_v39 = vpop.eup %5195 }
 0xdf6   : > { %3995 = vst [vmem:[%s7796_s19 + $0x68] sm:$0xff] %v3979_v59  ;;  %v3936_v31 = vmul.f32 %v5196_v39, %v7770_v34 }
 0xdf7   : > { %v5198_v52 = vpop.eup %5197 }
 0xdf8   : > { %v3958_v15 = vmul.f32 %v7782_v4, %v3936_v31  ;;  %v3937_v14 = vmul.f32 %v5198_v52, %v7773_v42 }
 0xdfa   : > { %v3980_v17 = vadd.f32 %v7788_v3, %v3958_v15  ;;  %v3959_v41 = vmul.f32 %v7782_v4, %v3937_v14 }
 0xdfc   : > { %3996 = vst [vmem:[%s7796_s19 + $0x70] sm:$0xff] %v3980_v17  ;;  %v3981_v34 = vadd.f32 %v7788_v3, %v3959_v41 }
 0xdfe   : > { %3997 = vst [vmem:[%s7796_s19 + $0x78] sm:$0xff] %v3981_v34 }
 0xdff   : > { %5342 = shalt.err (!%p5339_p4)
}
 0xe00   : > { %s5343_s20 = scalar_lea.hbm %s7859_s28, 2048  ;;  %s5347_s21 = scalar_lea.hbm %s8165_s26, 4096 }
 0xe01   : > { %p5344_p9 = scmp.ne.s32.totalorder %s7859_s28, %s5343_s20  ;;  %p5348_p8 = scmp.lt.u32.totalorder %s7859_s28, %s8165_s26 }
 0xe02   : > { %p5349_p13 = scmp.lt.u32.totalorder %s5347_s21, %s5343_s20  ;;  %p5351_p10 = scmp.lt.u32.totalorder %s5343_s20, %s7859_s28 }
 0xe03   : > { %p5345_p0 = pnand %p5344_p9, %p5661_p5 }
 0xe04   : > { %p5350_p6 = por %p5349_p13, %p5348_p8 }
 0xe05   : > { %p5346_p11 = pneg %p5345_p0 }
 0xe06   : > { %p5352_p3 = por %p5351_p10, %p5350_p6 }
 0xe08   : > { %p5353_p7 = pnand %p5352_p3, %p5346_p11 }
 0xe0a   : > { %5356 = shalt.err (!%p5353_p7)
}
 0xe0b   : > { %s5433_s7 = smov 128   ;;  %s5434_s14 = smov 8  }
 0xe0c   : > { %4783 = dma.vmem_to_hbm [thread:$0]  (%p5661_p5), %s7861_s18, 2048, %s7859_s28, %s3999_s17, %s5433_s7, %s5433_s7, %s5434_s14  }
 0xe0d PF: > { %s8166_s27 = sld [smem:[#allocation15_spill]]  ;;  %s8167_s24 = sld [smem:[#allocation16_spill]] }
 0xe0e   : > { %p8169_p1 = scmp.ge.s32.totalorder %s5403_s16, 2 }
 0xe13   : > { %s4027_s25 = sand.u32 1, %s8166_s27   ;;  %p8168_p12 = scmp.ne.s32.totalorder %s8167_s24, 0 }
 0xe14   : > { %s4028_s23 = scalar_lea.sflag [#allocation4], %s4027_s25 }
 0xe15   : > { %p4800_p2 = pnand %p8169_p1, %p8168_p12 }
 0xe17   : > { %5386 = dma.done.wait (!%p4800_p2), %s4028_s23, 2048  }
 0xe18   : > { %5388 = vsyncadd (!%p4800_p2), %s4028_s23, 4294965248  ;;  %p29_p4 = scmp.ge.s32.totalorder %s5626_s22, 4   ;;  %s8170_s29 = smov %s5395_s30 }
 0xe19   : > { %s8171_s30 = smov %s5399_s15  ;;  %s8172_s15 = smov %s5657_s11 }
 0xe1a   : > { %s8173_s16 = smov %s5626_s22  ;;  %31 = sbr.rel (!%p29_p4) target bundleno = 15 (0xf), region = 136 }
 0xe21   :  { %4033 = vsyncpa [#allocation3], 1 }
 0xe22   :  { %4035 = vsyncpa [#allocation3 + $0x1], 1 }
 0xe23   :  { %4036 = vsyncpa [#allocation6], 1 }
 0xe24   :  { %4037 = vsyncpa [#allocation9], 1 }
 0xe25   :  { %4038 = vsyncpa [#allocation4], 1 }
 0xe26   :  { %4040 = vsyncpa [#allocation4 + $0x1], 1 }

</bundles_post_ra>
